<compile_context>
chip_gen: v6e
topology: v6e:2x2x1
jax: 0.10.0
libtpu: 0.0.40
codegen_flags: <defaults>
</compile_context>

<pallas_src>
import functools

import jax
import jax.numpy as jnp
from jax.experimental import pallas as pl
from jax.experimental.pallas import tpu as pltpu

NEG_SLOPE = 0.2  # DGL GATConv default LeakyReLU slope


def _gat_fused_kernel(x_ref, adj_ref, w0_ref, b0_ref, w1_ref, b1_ref, o_ref,
                      *, h0, hid, h1, dout):
    """Fused 2-layer GAT forward; whole graph resident in VMEM.

    x:   (N, F_in)                 node features
    adj: (N, N)                    dense adjacency, adj[dst, src] in {0,1}
    w0:  (F_in, H0*hid + 2*H0)     layer-0 projection with attn vecs folded in
    b0:  (1, H0*hid)               layer-0 bias, flattened over heads
    w1:  (H0*hid, H1*out + 2*H1)   layer-1 projection with attn vecs folded in
    b1:  (1, out)                  layer-1 bias already averaged over heads
    o:   (N, out)                  output
    """
    # Mask bias computed once, shared by both layers and every head.
    bias_mask = jnp.where(adj_ref[...] > 0.0,
                          jnp.float32(0.0), jnp.float32(-1e30))      # (N, N)

    def softmax_alpha(er_col, el_row):
        # e[i, j] = leaky_relu(er[i] + el[j]), masked, row-softmaxed.
        e = er_col + el_row                                          # (N, N)
        e = jnp.where(e > 0.0, e, NEG_SLOPE * e)                     # LeakyReLU(0.2)
        e = e + bias_mask                                            # mask non-edges
        e_max = jnp.max(e, axis=-1, keepdims=True)
        p = jnp.exp(e - e_max)                                       # masked -> 0
        denom = jnp.sum(p, axis=-1, keepdims=True)
        # Precondition: every node has >=1 in-neighbor (driver adds self-loops);
        # approx reciprocal gives ~1e-4 rel. error, acceptable for inference.
        inv = pl.reciprocal(jnp.maximum(denom, jnp.float32(1e-30)), approx=True)
        return (p * inv).astype(jnp.bfloat16)                        # bf16 MXU operand

    # ---------------- layer 0 ----------------
    # One MXU pass: columns [0 : H0*hid] = per-head features, [H0*hid :] = el/er.
    feat_aug0 = jnp.dot(x_ref[...], w0_ref[...], preferred_element_type=jnp.float32)
    d0 = h0 * hid
    feat0_bf = feat_aug0[:, :d0].astype(jnp.bfloat16)                # (N, H0*hid)
    scores0 = feat_aug0[:, d0:]                                      # (N, 2*H0)
    el0T = jnp.transpose(scores0[:, :h0])                            # (H0, N) one XLU pass

    outs0 = []
    for h in range(h0):  # unrolled, H0 is tiny; alpha consumed immediately
        alpha = softmax_alpha(scores0[:, h0 + h:h0 + h + 1], el0T[h:h + 1, :])
        outs0.append(jnp.dot(alpha, feat0_bf[:, h * hid:(h + 1) * hid],
                             preferred_element_type=jnp.float32))    # (N, hid)

    # Flattened slab built in registers (== torch flatten(1)); bias + ELU once.
    hflat = jnp.concatenate(outs0, axis=-1) + b0_ref[...]            # (N, H0*hid)
    hflat = jnp.where(hflat > 0.0, hflat, jnp.exp(hflat) - 1.0)      # ELU

    # ---------------- layer 1 ----------------
    feat_aug1 = jnp.dot(hflat, w1_ref[...], preferred_element_type=jnp.float32)
    d1 = h1 * dout
    feat1_bf = feat_aug1[:, :d1].astype(jnp.bfloat16)                # (N, H1*out)
    scores1 = feat_aug1[:, d1:]                                      # (N, 2*H1)
    el1T = jnp.transpose(scores1[:, :h1])                            # (H1, N)

    alphas1 = [softmax_alpha(scores1[:, h1 + h:h1 + h + 1], el1T[h:h + 1, :])
               for h in range(h1)]
    # Merge the head matmuls: K = H1*N fills the MXU; head-sum happens in the
    # f32 MXU accumulator.
    alpha_cat = jnp.concatenate(alphas1, axis=-1)                    # (N, H1*N) bf16
    feat_stack = jnp.concatenate(
        [feat1_bf[:, h * dout:(h + 1) * dout] for h in range(h1)], axis=0)  # (H1*N, out)
    acc = jnp.dot(alpha_cat, feat_stack, preferred_element_type=jnp.float32)  # (N, out)

    # mean over heads + head-averaged bias (== torch h.mean(1))
    o_ref[...] = (acc * jnp.float32(1.0 / h1) + b1_ref[...]).astype(o_ref.dtype)


def _pack_layer(w, al, ar):
    """Pack per-head params, folding attention vectors into the projection.

    w:  (H, F, D) -> (F, H*D)      heads concatenated along the lane axis
    al/ar: (H, D) -> block-diagonal (H*D, H) each; the folded matrix
    W_aug = [W_all | W_all @ [al_blk | ar_blk]]  has shape (F, H*D + 2H), so a
    single matmul x @ W_aug yields every head's features AND el/er scores.
    """
    H, F, D = w.shape
    w_all = jnp.transpose(w, (1, 0, 2)).reshape(F, H * D)
    eye = jnp.eye(H, dtype=w.dtype)
    al_blk = (al[:, :, None] * eye[:, None, :]).reshape(H * D, H)
    ar_blk = (ar[:, :, None] * eye[:, None, :]).reshape(H * D, H)
    a_blk = jnp.concatenate([al_blk, ar_blk], axis=-1)               # (H*D, 2H)
    return jnp.concatenate([w_all, w_all @ a_blk], axis=-1)          # (F, H*D+2H)


def gat_forward(x, adj, params):
    """Two-layer GAT: ELU + flatten(heads) after layer 0, mean(heads) after layer 1."""
    h0, hid = params["al0"].shape
    h1, dout = params["al1"].shape
    N, _ = x.shape

    w0_aug = _pack_layer(params["w0"], params["al0"], params["ar0"])
    w1_aug = _pack_layer(params["w1"], params["al1"], params["ar1"])
    b0_flat = params["b0"].reshape(1, h0 * hid)
    b1_mean = jnp.mean(params["b1"], axis=0, keepdims=True)          # folded head-mean bias

    kernel = functools.partial(_gat_fused_kernel, h0=h0, hid=hid, h1=h1, dout=dout)
    vmem = pl.BlockSpec(memory_space=pltpu.MemorySpace.VMEM)

    # Whole problem fits comfortably in VMEM at this size -> single gridless call.
    # (See TODO at top for the large-N / v7x dual-core tiling plan.)
    return pl.pallas_call(
        kernel,
        out_shape=jax.ShapeDtypeStruct((N, dout), jnp.float32),
        in_specs=[vmem] * 6,
        out_specs=vmem,
    )(x, adj, w0_aug, b0_flat, w1_aug, b1_mean)


def init_params(key, in_size, hid_size, out_size, heads):
    h0, h1 = heads
    ks = jax.random.split(key, 6)
    s = 0.1
    return {
        # layer 0: in_size -> hid_size, h0 heads
        "w0":  s * jax.random.normal(ks[0], (h0, in_size, hid_size), jnp.float32),
        "al0": s * jax.random.normal(ks[1], (h0, hid_size), jnp.float32),
        "ar0": s * jax.random.normal(ks[2], (h0, hid_size), jnp.float32),
        "b0":  jnp.zeros((h0, hid_size), jnp.float32),
        # layer 1: hid_size*h0 -> out_size, h1 heads
        "w1":  s * jax.random.normal(ks[3], (h1, hid_size * h0, out_size), jnp.float32),
        "al1": s * jax.random.normal(ks[4], (h1, out_size), jnp.float32),
        "ar1": s * jax.random.normal(ks[5], (h1, out_size), jnp.float32),
        "b1":  jnp.zeros((h1, out_size), jnp.float32),
    }


if __name__ == "__main__":
    key = jax.random.PRNGKey(0)
    k_x, k_adj, k_p = jax.random.split(key, 3)

    # Small synthetic graph.
    N = 128
    in_size, hid_size, out_size = 16, 16, 8
    heads = (4, 2)

    x = jax.random.normal(k_x, (N, in_size), jnp.float32)

    # Random sparse-ish adjacency adj[dst, src] with guaranteed self-loops
    # (precondition: every node has at least one in-neighbor).
    adj = (jax.random.uniform(k_adj, (N, N)) < 0.1).astype(jnp.float32)
    adj = jnp.maximum(adj, jnp.eye(N, dtype=jnp.float32))

    params = init_params(k_p, in_size, hid_size, out_size, heads)

    out = jax.jit(gat_forward)(x, adj, params)     # (N, out_size)
    jax.block_until_ready(out)

    assert out.shape == (N, out_size), out.shape
    assert bool(jnp.all(jnp.isfinite(out))), "non-finite output"
    print("KERNEL_OK")
</pallas_src>

<mosaic_0001>
module attributes {stable_mosaic.version = 11 : i64} {
  func.func @_gat_fused_kernel(%arg0: memref<128x16xf32, #tpu.memory_space<vmem>>, %arg1: memref<128x128xf32, #tpu.memory_space<vmem>>, %arg2: memref<16x72xf32, #tpu.memory_space<vmem>>, %arg3: memref<1x64xf32, #tpu.memory_space<vmem>>, %arg4: memref<64x20xf32, #tpu.memory_space<vmem>>, %arg5: memref<1x8xf32, #tpu.memory_space<vmem>>, %arg6: memref<128x8xf32, #tpu.memory_space<vmem>>) attributes {dimension_semantics = [], scalar_prefetch = 0 : i64, scratch_operands = 0 : i64, tpu.core_type = #tpu.core_type<tc>} {
    %c0 = arith.constant 0 : index
    %c0_0 = arith.constant 0 : index
    %0 = vector.load %arg1[%c0, %c0_0] : memref<128x128xf32, #tpu.memory_space<vmem>>, vector<128x128xf32>
    %cst = arith.constant 0.000000e+00 : f32
    %1 = vector.broadcast %cst : f32 to vector<128x128xf32>
    %2 = arith.cmpf ogt, %0, %1 : vector<128x128xf32>
    %cst_1 = arith.constant 0.000000e+00 : f32
    %cst_2 = arith.constant -1.000000e+30 : f32
    %3 = vector.broadcast %cst_1 : f32 to vector<128x128xf32>
    %4 = vector.broadcast %cst_2 : f32 to vector<128x128xf32>
    %5 = arith.select %2, %3, %4 : vector<128x128xi1>, vector<128x128xf32>
    %c0_3 = arith.constant 0 : index
    %c0_4 = arith.constant 0 : index
    %6 = vector.load %arg0[%c0_3, %c0_4] : memref<128x16xf32, #tpu.memory_space<vmem>>, vector<128x16xf32>
    %c0_5 = arith.constant 0 : index
    %c0_6 = arith.constant 0 : index
    %7 = vector.load %arg2[%c0_5, %c0_6] : memref<16x72xf32, #tpu.memory_space<vmem>>, vector<16x72xf32>
    %cst_7 = arith.constant dense<0.000000e+00> : vector<128x72xf32>
    %8 = tpu.matmul %6, %7, %cst_7 {dimension_numbers = #tpu.dot_dimension_numbers<[1], [0], [0], [1], [0, 0, 1, 1], [], []>} : vector<128x16xf32>, vector<16x72xf32>, vector<128x72xf32> -> vector<128x72xf32>
    %9 = vector.extract_strided_slice %8 {offsets = [0, 0], sizes = [128, 64], strides = [1, 1]} : vector<128x72xf32> to vector<128x64xf32>
    %10 = arith.truncf %9 : vector<128x64xf32> to vector<128x64xbf16>
    %11 = vector.extract_strided_slice %8 {offsets = [0, 64], sizes = [128, 8], strides = [1, 1]} : vector<128x72xf32> to vector<128x8xf32>
    %12 = vector.extract_strided_slice %11 {offsets = [0, 0], sizes = [128, 4], strides = [1, 1]} : vector<128x8xf32> to vector<128x4xf32>
    %13 = tpu.transpose %12, [1, 0] : vector<128x4xf32> -> vector<4x128xf32>
    %14 = vector.extract_strided_slice %11 {offsets = [0, 4], sizes = [128, 1], strides = [1, 1]} : vector<128x8xf32> to vector<128x1xf32>
    %15 = vector.extract_strided_slice %13 {offsets = [0, 0], sizes = [1, 128], strides = [1, 1]} : vector<4x128xf32> to vector<1x128xf32>
    %16 = vector.broadcast %14 : vector<128x1xf32> to vector<128x128xf32>
    %17 = vector.broadcast %15 : vector<1x128xf32> to vector<128x128xf32>
    %18 = arith.addf %16, %17 : vector<128x128xf32>
    %cst_8 = arith.constant 0.000000e+00 : f32
    %19 = vector.broadcast %cst_8 : f32 to vector<128x128xf32>
    %20 = arith.cmpf ogt, %18, %19 : vector<128x128xf32>
    %cst_9 = arith.constant 2.000000e-01 : f32
    %21 = vector.broadcast %cst_9 : f32 to vector<128x128xf32>
    %22 = arith.mulf %21, %18 : vector<128x128xf32>
    %23 = arith.select %20, %18, %22 : vector<128x128xi1>, vector<128x128xf32>
    %24 = arith.addf %23, %5 : vector<128x128xf32>
    %cst_10 = arith.constant dense<0xFF800000> : vector<128xf32>
    %25 = vector.multi_reduction <maximumf>, %24, %cst_10 [1] : vector<128x128xf32> to vector<128xf32>
    %26 = vector.shape_cast %25 : vector<128xf32> to vector<128x1xf32>
    %27 = vector.broadcast %26 : vector<128x1xf32> to vector<128x128xf32>
    %28 = arith.subf %24, %27 : vector<128x128xf32>
    %29 = math.exp %28 : vector<128x128xf32>
    %cst_11 = arith.constant dense<0.000000e+00> : vector<128xf32>
    %30 = vector.multi_reduction <add>, %29, %cst_11 [1] : vector<128x128xf32> to vector<128xf32>
    %31 = vector.shape_cast %30 : vector<128xf32> to vector<128x1xf32>
    %cst_12 = arith.constant 1.000000e-30 : f32
    %32 = vector.broadcast %cst_12 : f32 to vector<128x1xf32>
    %33 = arith.maximumf %31, %32 : vector<128x1xf32>
    %34 = tpu.reciprocal %33 {approx = true} : vector<128x1xf32> -> vector<128x1xf32>
    %35 = vector.broadcast %34 : vector<128x1xf32> to vector<128x128xf32>
    %36 = arith.mulf %29, %35 : vector<128x128xf32>
    %37 = arith.truncf %36 : vector<128x128xf32> to vector<128x128xbf16>
    %38 = vector.extract_strided_slice %10 {offsets = [0, 0], sizes = [128, 16], strides = [1, 1]} : vector<128x64xbf16> to vector<128x16xbf16>
    %cst_13 = arith.constant dense<0.000000e+00> : vector<128x16xf32>
    %39 = tpu.matmul %37, %38, %cst_13 {dimension_numbers = #tpu.dot_dimension_numbers<[1], [0], [0], [1], [0, 0, 1, 1], [], []>} : vector<128x128xbf16>, vector<128x16xbf16>, vector<128x16xf32> -> vector<128x16xf32>
    %40 = vector.extract_strided_slice %11 {offsets = [0, 5], sizes = [128, 1], strides = [1, 1]} : vector<128x8xf32> to vector<128x1xf32>
    %41 = vector.extract_strided_slice %13 {offsets = [1, 0], sizes = [1, 128], strides = [1, 1]} : vector<4x128xf32> to vector<1x128xf32>
    %42 = vector.broadcast %40 : vector<128x1xf32> to vector<128x128xf32>
    %43 = vector.broadcast %41 : vector<1x128xf32> to vector<128x128xf32>
    %44 = arith.addf %42, %43 : vector<128x128xf32>
    %cst_14 = arith.constant 0.000000e+00 : f32
    %45 = vector.broadcast %cst_14 : f32 to vector<128x128xf32>
    %46 = arith.cmpf ogt, %44, %45 : vector<128x128xf32>
    %cst_15 = arith.constant 2.000000e-01 : f32
    %47 = vector.broadcast %cst_15 : f32 to vector<128x128xf32>
    %48 = arith.mulf %47, %44 : vector<128x128xf32>
    %49 = arith.select %46, %44, %48 : vector<128x128xi1>, vector<128x128xf32>
    %50 = arith.addf %49, %5 : vector<128x128xf32>
    %cst_16 = arith.constant dense<0xFF800000> : vector<128xf32>
    %51 = vector.multi_reduction <maximumf>, %50, %cst_16 [1] : vector<128x128xf32> to vector<128xf32>
    %52 = vector.shape_cast %51 : vector<128xf32> to vector<128x1xf32>
    %53 = vector.broadcast %52 : vector<128x1xf32> to vector<128x128xf32>
    %54 = arith.subf %50, %53 : vector<128x128xf32>
    %55 = math.exp %54 : vector<128x128xf32>
    %cst_17 = arith.constant dense<0.000000e+00> : vector<128xf32>
    %56 = vector.multi_reduction <add>, %55, %cst_17 [1] : vector<128x128xf32> to vector<128xf32>
    %57 = vector.shape_cast %56 : vector<128xf32> to vector<128x1xf32>
    %cst_18 = arith.constant 1.000000e-30 : f32
    %58 = vector.broadcast %cst_18 : f32 to vector<128x1xf32>
    %59 = arith.maximumf %57, %58 : vector<128x1xf32>
    %60 = tpu.reciprocal %59 {approx = true} : vector<128x1xf32> -> vector<128x1xf32>
    %61 = vector.broadcast %60 : vector<128x1xf32> to vector<128x128xf32>
    %62 = arith.mulf %55, %61 : vector<128x128xf32>
    %63 = arith.truncf %62 : vector<128x128xf32> to vector<128x128xbf16>
    %64 = vector.extract_strided_slice %10 {offsets = [0, 16], sizes = [128, 16], strides = [1, 1]} : vector<128x64xbf16> to vector<128x16xbf16>
    %cst_19 = arith.constant dense<0.000000e+00> : vector<128x16xf32>
    %65 = tpu.matmul %63, %64, %cst_19 {dimension_numbers = #tpu.dot_dimension_numbers<[1], [0], [0], [1], [0, 0, 1, 1], [], []>} : vector<128x128xbf16>, vector<128x16xbf16>, vector<128x16xf32> -> vector<128x16xf32>
    %66 = vector.extract_strided_slice %11 {offsets = [0, 6], sizes = [128, 1], strides = [1, 1]} : vector<128x8xf32> to vector<128x1xf32>
    %67 = vector.extract_strided_slice %13 {offsets = [2, 0], sizes = [1, 128], strides = [1, 1]} : vector<4x128xf32> to vector<1x128xf32>
    %68 = vector.broadcast %66 : vector<128x1xf32> to vector<128x128xf32>
    %69 = vector.broadcast %67 : vector<1x128xf32> to vector<128x128xf32>
    %70 = arith.addf %68, %69 : vector<128x128xf32>
    %cst_20 = arith.constant 0.000000e+00 : f32
    %71 = vector.broadcast %cst_20 : f32 to vector<128x128xf32>
    %72 = arith.cmpf ogt, %70, %71 : vector<128x128xf32>
    %cst_21 = arith.constant 2.000000e-01 : f32
    %73 = vector.broadcast %cst_21 : f32 to vector<128x128xf32>
    %74 = arith.mulf %73, %70 : vector<128x128xf32>
    %75 = arith.select %72, %70, %74 : vector<128x128xi1>, vector<128x128xf32>
    %76 = arith.addf %75, %5 : vector<128x128xf32>
    %cst_22 = arith.constant dense<0xFF800000> : vector<128xf32>
    %77 = vector.multi_reduction <maximumf>, %76, %cst_22 [1] : vector<128x128xf32> to vector<128xf32>
    %78 = vector.shape_cast %77 : vector<128xf32> to vector<128x1xf32>
    %79 = vector.broadcast %78 : vector<128x1xf32> to vector<128x128xf32>
    %80 = arith.subf %76, %79 : vector<128x128xf32>
    %81 = math.exp %80 : vector<128x128xf32>
    %cst_23 = arith.constant dense<0.000000e+00> : vector<128xf32>
    %82 = vector.multi_reduction <add>, %81, %cst_23 [1] : vector<128x128xf32> to vector<128xf32>
    %83 = vector.shape_cast %82 : vector<128xf32> to vector<128x1xf32>
    %cst_24 = arith.constant 1.000000e-30 : f32
    %84 = vector.broadcast %cst_24 : f32 to vector<128x1xf32>
    %85 = arith.maximumf %83, %84 : vector<128x1xf32>
    %86 = tpu.reciprocal %85 {approx = true} : vector<128x1xf32> -> vector<128x1xf32>
    %87 = vector.broadcast %86 : vector<128x1xf32> to vector<128x128xf32>
    %88 = arith.mulf %81, %87 : vector<128x128xf32>
    %89 = arith.truncf %88 : vector<128x128xf32> to vector<128x128xbf16>
    %90 = vector.extract_strided_slice %10 {offsets = [0, 32], sizes = [128, 16], strides = [1, 1]} : vector<128x64xbf16> to vector<128x16xbf16>
    %cst_25 = arith.constant dense<0.000000e+00> : vector<128x16xf32>
    %91 = tpu.matmul %89, %90, %cst_25 {dimension_numbers = #tpu.dot_dimension_numbers<[1], [0], [0], [1], [0, 0, 1, 1], [], []>} : vector<128x128xbf16>, vector<128x16xbf16>, vector<128x16xf32> -> vector<128x16xf32>
    %92 = vector.extract_strided_slice %11 {offsets = [0, 7], sizes = [128, 1], strides = [1, 1]} : vector<128x8xf32> to vector<128x1xf32>
    %93 = vector.extract_strided_slice %13 {offsets = [3, 0], sizes = [1, 128], strides = [1, 1]} : vector<4x128xf32> to vector<1x128xf32>
    %94 = vector.broadcast %92 : vector<128x1xf32> to vector<128x128xf32>
    %95 = vector.broadcast %93 : vector<1x128xf32> to vector<128x128xf32>
    %96 = arith.addf %94, %95 : vector<128x128xf32>
    %cst_26 = arith.constant 0.000000e+00 : f32
    %97 = vector.broadcast %cst_26 : f32 to vector<128x128xf32>
    %98 = arith.cmpf ogt, %96, %97 : vector<128x128xf32>
    %cst_27 = arith.constant 2.000000e-01 : f32
    %99 = vector.broadcast %cst_27 : f32 to vector<128x128xf32>
    %100 = arith.mulf %99, %96 : vector<128x128xf32>
    %101 = arith.select %98, %96, %100 : vector<128x128xi1>, vector<128x128xf32>
    %102 = arith.addf %101, %5 : vector<128x128xf32>
    %cst_28 = arith.constant dense<0xFF800000> : vector<128xf32>
    %103 = vector.multi_reduction <maximumf>, %102, %cst_28 [1] : vector<128x128xf32> to vector<128xf32>
    %104 = vector.shape_cast %103 : vector<128xf32> to vector<128x1xf32>
    %105 = vector.broadcast %104 : vector<128x1xf32> to vector<128x128xf32>
    %106 = arith.subf %102, %105 : vector<128x128xf32>
    %107 = math.exp %106 : vector<128x128xf32>
    %cst_29 = arith.constant dense<0.000000e+00> : vector<128xf32>
    %108 = vector.multi_reduction <add>, %107, %cst_29 [1] : vector<128x128xf32> to vector<128xf32>
    %109 = vector.shape_cast %108 : vector<128xf32> to vector<128x1xf32>
    %cst_30 = arith.constant 1.000000e-30 : f32
    %110 = vector.broadcast %cst_30 : f32 to vector<128x1xf32>
    %111 = arith.maximumf %109, %110 : vector<128x1xf32>
    %112 = tpu.reciprocal %111 {approx = true} : vector<128x1xf32> -> vector<128x1xf32>
    %113 = vector.broadcast %112 : vector<128x1xf32> to vector<128x128xf32>
    %114 = arith.mulf %107, %113 : vector<128x128xf32>
    %115 = arith.truncf %114 : vector<128x128xf32> to vector<128x128xbf16>
    %116 = vector.extract_strided_slice %10 {offsets = [0, 48], sizes = [128, 16], strides = [1, 1]} : vector<128x64xbf16> to vector<128x16xbf16>
    %cst_31 = arith.constant dense<0.000000e+00> : vector<128x16xf32>
    %117 = tpu.matmul %115, %116, %cst_31 {dimension_numbers = #tpu.dot_dimension_numbers<[1], [0], [0], [1], [0, 0, 1, 1], [], []>} : vector<128x128xbf16>, vector<128x16xbf16>, vector<128x16xf32> -> vector<128x16xf32>
    %118 = tpu.concatenate %39, %65, %91, %117 in 1 : vector<128x16xf32>, vector<128x16xf32>, vector<128x16xf32>, vector<128x16xf32> -> vector<128x64xf32>
    %c0_32 = arith.constant 0 : index
    %c0_33 = arith.constant 0 : index
    %119 = vector.load %arg3[%c0_32, %c0_33] : memref<1x64xf32, #tpu.memory_space<vmem>>, vector<1x64xf32>
    %120 = vector.broadcast %119 : vector<1x64xf32> to vector<128x64xf32>
    %121 = arith.addf %118, %120 : vector<128x64xf32>
    %cst_34 = arith.constant 0.000000e+00 : f32
    %122 = vector.broadcast %cst_34 : f32 to vector<128x64xf32>
    %123 = arith.cmpf ogt, %121, %122 : vector<128x64xf32>
    %124 = math.exp %121 : vector<128x64xf32>
    %cst_35 = arith.constant 1.000000e+00 : f32
    %125 = vector.broadcast %cst_35 : f32 to vector<128x64xf32>
    %126 = arith.subf %124, %125 : vector<128x64xf32>
    %127 = arith.select %123, %121, %126 : vector<128x64xi1>, vector<128x64xf32>
    %c0_36 = arith.constant 0 : index
    %c0_37 = arith.constant 0 : index
    %128 = vector.load %arg4[%c0_36, %c0_37] : memref<64x20xf32, #tpu.memory_space<vmem>>, vector<64x20xf32>
    %cst_38 = arith.constant dense<0.000000e+00> : vector<128x20xf32>
    %129 = tpu.matmul %127, %128, %cst_38 {dimension_numbers = #tpu.dot_dimension_numbers<[1], [0], [0], [1], [0, 0, 1, 1], [], []>} : vector<128x64xf32>, vector<64x20xf32>, vector<128x20xf32> -> vector<128x20xf32>
    %130 = vector.extract_strided_slice %129 {offsets = [0, 0], sizes = [128, 16], strides = [1, 1]} : vector<128x20xf32> to vector<128x16xf32>
    %131 = arith.truncf %130 : vector<128x16xf32> to vector<128x16xbf16>
    %132 = vector.extract_strided_slice %129 {offsets = [0, 16], sizes = [128, 4], strides = [1, 1]} : vector<128x20xf32> to vector<128x4xf32>
    %133 = vector.extract_strided_slice %132 {offsets = [0, 0], sizes = [128, 2], strides = [1, 1]} : vector<128x4xf32> to vector<128x2xf32>
    %134 = tpu.transpose %133, [1, 0] : vector<128x2xf32> -> vector<2x128xf32>
    %135 = vector.extract_strided_slice %132 {offsets = [0, 2], sizes = [128, 1], strides = [1, 1]} : vector<128x4xf32> to vector<128x1xf32>
    %136 = vector.extract_strided_slice %134 {offsets = [0, 0], sizes = [1, 128], strides = [1, 1]} : vector<2x128xf32> to vector<1x128xf32>
    %137 = vector.broadcast %135 : vector<128x1xf32> to vector<128x128xf32>
    %138 = vector.broadcast %136 : vector<1x128xf32> to vector<128x128xf32>
    %139 = arith.addf %137, %138 : vector<128x128xf32>
    %cst_39 = arith.constant 0.000000e+00 : f32
    %140 = vector.broadcast %cst_39 : f32 to vector<128x128xf32>
    %141 = arith.cmpf ogt, %139, %140 : vector<128x128xf32>
    %cst_40 = arith.constant 2.000000e-01 : f32
    %142 = vector.broadcast %cst_40 : f32 to vector<128x128xf32>
    %143 = arith.mulf %142, %139 : vector<128x128xf32>
    %144 = arith.select %141, %139, %143 : vector<128x128xi1>, vector<128x128xf32>
    %145 = arith.addf %144, %5 : vector<128x128xf32>
    %cst_41 = arith.constant dense<0xFF800000> : vector<128xf32>
    %146 = vector.multi_reduction <maximumf>, %145, %cst_41 [1] : vector<128x128xf32> to vector<128xf32>
    %147 = vector.shape_cast %146 : vector<128xf32> to vector<128x1xf32>
    %148 = vector.broadcast %147 : vector<128x1xf32> to vector<128x128xf32>
    %149 = arith.subf %145, %148 : vector<128x128xf32>
    %150 = math.exp %149 : vector<128x128xf32>
    %cst_42 = arith.constant dense<0.000000e+00> : vector<128xf32>
    %151 = vector.multi_reduction <add>, %150, %cst_42 [1] : vector<128x128xf32> to vector<128xf32>
    %152 = vector.shape_cast %151 : vector<128xf32> to vector<128x1xf32>
    %cst_43 = arith.constant 1.000000e-30 : f32
    %153 = vector.broadcast %cst_43 : f32 to vector<128x1xf32>
    %154 = arith.maximumf %152, %153 : vector<128x1xf32>
    %155 = tpu.reciprocal %154 {approx = true} : vector<128x1xf32> -> vector<128x1xf32>
    %156 = vector.broadcast %155 : vector<128x1xf32> to vector<128x128xf32>
    %157 = arith.mulf %150, %156 : vector<128x128xf32>
    %158 = arith.truncf %157 : vector<128x128xf32> to vector<128x128xbf16>
    %159 = vector.extract_strided_slice %132 {offsets = [0, 3], sizes = [128, 1], strides = [1, 1]} : vector<128x4xf32> to vector<128x1xf32>
    %160 = vector.extract_strided_slice %134 {offsets = [1, 0], sizes = [1, 128], strides = [1, 1]} : vector<2x128xf32> to vector<1x128xf32>
    %161 = vector.broadcast %159 : vector<128x1xf32> to vector<128x128xf32>
    %162 = vector.broadcast %160 : vector<1x128xf32> to vector<128x128xf32>
    %163 = arith.addf %161, %162 : vector<128x128xf32>
    %cst_44 = arith.constant 0.000000e+00 : f32
    %164 = vector.broadcast %cst_44 : f32 to vector<128x128xf32>
    %165 = arith.cmpf ogt, %163, %164 : vector<128x128xf32>
    %cst_45 = arith.constant 2.000000e-01 : f32
    %166 = vector.broadcast %cst_45 : f32 to vector<128x128xf32>
    %167 = arith.mulf %166, %163 : vector<128x128xf32>
    %168 = arith.select %165, %163, %167 : vector<128x128xi1>, vector<128x128xf32>
    %169 = arith.addf %168, %5 : vector<128x128xf32>
    %cst_46 = arith.constant dense<0xFF800000> : vector<128xf32>
    %170 = vector.multi_reduction <maximumf>, %169, %cst_46 [1] : vector<128x128xf32> to vector<128xf32>
    %171 = vector.shape_cast %170 : vector<128xf32> to vector<128x1xf32>
    %172 = vector.broadcast %171 : vector<128x1xf32> to vector<128x128xf32>
    %173 = arith.subf %169, %172 : vector<128x128xf32>
    %174 = math.exp %173 : vector<128x128xf32>
    %cst_47 = arith.constant dense<0.000000e+00> : vector<128xf32>
    %175 = vector.multi_reduction <add>, %174, %cst_47 [1] : vector<128x128xf32> to vector<128xf32>
    %176 = vector.shape_cast %175 : vector<128xf32> to vector<128x1xf32>
    %cst_48 = arith.constant 1.000000e-30 : f32
    %177 = vector.broadcast %cst_48 : f32 to vector<128x1xf32>
    %178 = arith.maximumf %176, %177 : vector<128x1xf32>
    %179 = tpu.reciprocal %178 {approx = true} : vector<128x1xf32> -> vector<128x1xf32>
    %180 = vector.broadcast %179 : vector<128x1xf32> to vector<128x128xf32>
    %181 = arith.mulf %174, %180 : vector<128x128xf32>
    %182 = arith.truncf %181 : vector<128x128xf32> to vector<128x128xbf16>
    %183 = tpu.concatenate %158, %182 in 1 : vector<128x128xbf16>, vector<128x128xbf16> -> vector<128x256xbf16>
    %184 = vector.extract_strided_slice %131 {offsets = [0, 0], sizes = [128, 8], strides = [1, 1]} : vector<128x16xbf16> to vector<128x8xbf16>
    %185 = vector.extract_strided_slice %131 {offsets = [0, 8], sizes = [128, 8], strides = [1, 1]} : vector<128x16xbf16> to vector<128x8xbf16>
    %186 = tpu.concatenate %184, %185 in 0 : vector<128x8xbf16>, vector<128x8xbf16> -> vector<256x8xbf16>
    %cst_49 = arith.constant dense<0.000000e+00> : vector<128x8xf32>
    %187 = tpu.matmul %183, %186, %cst_49 {dimension_numbers = #tpu.dot_dimension_numbers<[1], [0], [0], [1], [0, 0, 1, 1], [], []>} : vector<128x256xbf16>, vector<256x8xbf16>, vector<128x8xf32> -> vector<128x8xf32>
    %cst_50 = arith.constant 5.000000e-01 : f32
    %188 = vector.broadcast %cst_50 : f32 to vector<128x8xf32>
    %189 = arith.mulf %187, %188 : vector<128x8xf32>
    %c0_51 = arith.constant 0 : index
    %c0_52 = arith.constant 0 : index
    %190 = vector.load %arg5[%c0_51, %c0_52] : memref<1x8xf32, #tpu.memory_space<vmem>>, vector<1x8xf32>
    %191 = vector.broadcast %190 : vector<1x8xf32> to vector<128x8xf32>
    %192 = arith.addf %189, %191 : vector<128x8xf32>
    %c0_53 = arith.constant 0 : index
    %c0_54 = arith.constant 0 : index
    %193 = vector.load %arg6[%c0_53, %c0_54] : memref<128x8xf32, #tpu.memory_space<vmem>>, vector<128x8xf32>
    tpu.vector_store %arg6[%c0_53, %c0_54], %192 {strides = array<i32>} : memref<128x8xf32, #tpu.memory_space<vmem>>, vector<128x8xf32>,
    return
  }
}

</mosaic_0001>

<bundles_post_ra>
// kernel: gat_forward.1
= control target key start
LH: loop header
LB: loop body
LE: loop exit
PB: predicated region body
PF: predicated region fallthrough
CT: control target
= control target key end

     0   :  { %vm90_vm0 = vcmask 130048   ;;  %v4544_v3 = vmov 68   ;;  %v4545_v19 = vmov 69   ;;  %s4546_s7 = smov 64   ;;  %v4547_v23 = vmov 70   ;;  %s4552_s15 = smov 80   ;;  %s6991_s2 = inlined_call_operand.vmem [shape: f32[16,72], index: 2, kind: input, shape index: {}]   ;;  %s6992_s0 = inlined_call_operand.vmem [shape: f32[128,16], index: 0, kind: input, shape index: {}]   ;;  %s6993_s1 = inlined_call_operand.vmem [shape: f32[128,128], index: 1, kind: input, shape index: {}]   ;;  %s6994_s4 = inlined_call_operand.vmem [shape: f32[64,20], index: 4, kind: input, shape index: {}]   ;;  %s6995_s3 = inlined_call_operand.vmem [shape: f32[1,64], index: 3, kind: input, shape index: {}]   ;;  %s6996_s5 = inlined_call_operand.vmem [shape: f32[1,8], index: 5, kind: input, shape index: {}]   ;;  %s6997_s6 = inlined_call_operand.vmem [shape: f32[128,8], index: 6, kind: output, shape index: {}]  }
   0x1   :  { %v89_v0 = vld [vmem:[%s6991_s2 + $0x8] sm:$0xff]  ;;  %v88_v1 = vld [vmem:[%s6991_s2] sm:$0xff]  ;;  %4039 = vset.pattern.permute.xlu1 %v4544_v3  ;;  %v74_v5 = vld [vmem:[%s6992_s0 + $0x10] sm:$0xff]  ;;  %4040 = vset.pattern.permute.xlu0 %v4545_v19  ;;  %v4548_v26 = vmov 71   ;;  %s4553_s16 = smov 16   ;;  %s4554_s17 = smov 32  }
   0x2   :  { %v72_v2 = vld [vmem:[%s6992_s0] sm:$0xff]  ;;  %3812 = vmatprep.subr.mxu0 %v89_v0  ;;  %v73_v4 = vld [vmem:[%s6992_s0 + $0x8] sm:$0xff]  ;;  %v75_v6 = vld [vmem:[%s6992_s0 + $0x18] sm:$0xff]  ;;  %s4555_s22 = smov 48  }
   0x3   :  { %3816 = vmatprep.mubr.msk.f32.mxu0 %vm90_vm0, %v72_v2  ;;  %3813 = vmatpush3.msra.mxu0 %v89_v0  ;;  %v76_v7 = vld [vmem:[%s6992_s0 + $0x20] sm:$0xff]  ;;  %v77_v8 = vld [vmem:[%s6992_s0 + $0x28] sm:$0xff]  ;;  %v78_v9 = vld [vmem:[%s6992_s0 + $0x30] sm:$0xff] }
   0x4   :  { %3814 = vmatprep.subr.mxu0 %v88_v1  ;;  %v79_v10 = vld [vmem:[%s6992_s0 + $0x38] sm:$0xff]  ;;  %v80_v11 = vld [vmem:[%s6992_s0 + $0x40] sm:$0xff]  ;;  %v81_v12 = vld [vmem:[%s6992_s0 + $0x48] sm:$0xff] }
   0x5   :  { %3815 = vmatpush3.msra.mxu0 %v88_v1  ;;  %v82_v13 = vld [vmem:[%s6992_s0 + $0x50] sm:$0xff]  ;;  %v83_v14 = vld [vmem:[%s6992_s0 + $0x58] sm:$0xff]  ;;  %v84_v15 = vld [vmem:[%s6992_s0 + $0x60] sm:$0xff] }
   0x6   :  { %3817 = vmatmul.mubr.msk.f32.vlgmr.msra.gmra.mxu0 %vm90_vm0, %v73_v4  ;;  %v85_v16 = vld [vmem:[%s6992_s0 + $0x68] sm:$0xff]  ;;  %v86_v17 = vld [vmem:[%s6992_s0 + $0x70] sm:$0xff]  ;;  %v87_v18 = vld [vmem:[%s6992_s0 + $0x78] sm:$0xff]  ;;  %s4549_s0 = smov 112  }
   0x7   :  { %3819 = vmatprep.mubr.msk.f32.mxu0 %vm90_vm0, %v74_v5 }
   0xa   :  { %3820 = vmatmul.mubr.msk.f32.gmra.mxu0 %vm90_vm0, %v75_v6 }
   0xb   :  { %3822 = vmatprep.mubr.msk.f32.mxu0 %vm90_vm0, %v76_v7 }
   0xe   :  { %3823 = vmatmul.mubr.msk.f32.gmra.mxu0 %vm90_vm0, %v77_v8 }
   0xf   :  { %3825 = vmatprep.mubr.msk.f32.mxu0 %vm90_vm0, %v78_v9 }
  0x12   :  { %3826 = vmatmul.mubr.msk.f32.gmra.mxu0 %vm90_vm0, %v79_v10 }
  0x13   :  { %3828 = vmatprep.mubr.msk.f32.mxu0 %vm90_vm0, %v80_v11 }
  0x16   :  { %3829 = vmatmul.mubr.msk.f32.gmra.mxu0 %vm90_vm0, %v81_v12 }
  0x17   :  { %3831 = vmatprep.mubr.msk.f32.mxu0 %vm90_vm0, %v82_v13 }
  0x1a   :  { %3832 = vmatmul.mubr.msk.f32.gmra.mxu0 %vm90_vm0, %v83_v14 }
  0x1b   :  { %3834 = vmatprep.mubr.msk.f32.mxu0 %vm90_vm0, %v84_v15 }
  0x1e   :  { %3835 = vmatmul.mubr.msk.f32.gmra.mxu0 %vm90_vm0, %v85_v16 }
  0x1f   :  { %3837 = vmatprep.mubr.msk.f32.mxu0 %vm90_vm0, %v86_v17 }
  0x22   :  { %3838 = vmatmul.mubr.msk.f32.gmra.mxu0 %vm90_vm0, %v87_v18 }
  0xc6   :  { %v4666_v20 = vpop.f32.mrf.mxu0 }
  0xc7   :  { %393 = vperm.xlu1 %4039, %v4666_v20   ;;  %310 = vrot.lane.b32.xlu0 %v4666_v20, %s4546_s7 }
  0xc8   :  { %v4671_v21 = vpop.f32.mrf.mxu0 }
  0xc9   :  { %v4789_v45 = vpack.c.bf16 %v4666_v20, %v4671_v21 }
  0xca   :  { %v4673_v22 = vpop.f32.mrf.mxu0 }
  0xcb   :  { %4041 = vset.pattern.permute.xlu1 %v4547_v23  ;;  %806 = vperm.xlu0 %4040, %v4666_v20   ;;  %7101 = vst [vmem:[#allocation9_spill] sm:$0xff] %v4789_v45 }
  0xcc   :  { %1251 = vperm.xlu1 %4041, %v4666_v20   ;;  %v4678_v24 = vpop.f32.mrf.mxu0 }
  0xcd   :  { %v4781_v44 = vpack.c.bf16 %v4673_v22, %v4678_v24 }
  0xce   :  { %v4680_v25 = vpop.f32.mrf.mxu0 }
  0xcf   :  { %308 = vrot.lane.b32.xlu0 %v4671_v21, %s4546_s7  ;;  %7100 = vst [vmem:[#allocation8_spill] sm:$0xff] %v4781_v44 }
  0xd0   :  { %4042 = vset.pattern.permute.xlu1 %v4548_v26  ;;  %v4685_v27 = vpop.f32.mrf.mxu0  ;;  %4043 = vset.pattern.permute.xlu0 %v4544_v3 }
  0xd1   :  { %1688 = vperm.xlu1 %4042, %v4666_v20   ;;  %v4766_v43 = vpack.c.bf16 %v4680_v25, %v4685_v27 }
  0xd2   :  { %v4689_v28 = vpop.f32.mrf.mxu0 }
  0xd3   :  { %389 = vperm.xlu0 %4043, %v4671_v21   ;;  %7099 = vst [vmem:[#allocation7_spill] sm:$0xff] %v4766_v43 }
  0xd4   :  { %v4692_v29 = vpop.f32.mrf.mxu0 }
  0xd5   :  { %4044 = vset.pattern.permute.xlu1 %v4545_v19  ;;  %v4757_v42 = vpack.c.bf16 %v4689_v28, %v4692_v29 }
  0xd6   :  { %802 = vperm.xlu1 %4044, %v4671_v21   ;;  %v4696_v30 = vpop.f32.mrf.mxu0 }
  0xd7   :  { %401 = vperm.xlu0 %4043, %v4673_v22   ;;  %7098 = vst [vmem:[#allocation6_spill] sm:$0xff] %v4757_v42 }
  0xd8   :  { %v4699_v31 = vpop.f32.mrf.mxu0 }
  0xd9   :  { %v4747_v41 = vpack.c.bf16 %v4696_v30, %v4699_v31 }
  0xda   :  { %4045 = vset.pattern.permute.xlu1 %v4547_v23  ;;  %v4702_v32 = vpop.f32.mrf.mxu0 }
  0xdb   :  { %1247 = vperm.xlu1 %4045, %v4671_v21   ;;  %4055 = vset.pattern.permute.xlu0 %v4545_v19  ;;  %7097 = vst [vmem:[#allocation5_spill] sm:$0xff] %v4747_v41 }
  0xdc   :  { %v4706_v33 = vpop.f32.mrf.mxu0  ;;  %822 = vperm.xlu0 %4055, %v4680_v25  }
  0xdd   :  { %v4739_v40 = vpack.c.bf16 %v4702_v32, %v4706_v33 }
  0xde   :  { %v4709_v34 = vpop.f32.mrf.mxu0 }
  0xdf   :  { %4046 = vset.pattern.permute.xlu1 %v4548_v26  ;;  %7096 = vst [vmem:[#allocation4_spill] sm:$0xff] %v4739_v40 }
  0xe0   :  { %1684 = vperm.xlu1 %4046, %v4671_v21   ;;  %v4713_v35 = vpop.f32.mrf.mxu0  ;;  %316 = vrot.lane.b32.xlu0 %v4685_v27, %s4546_s7 }
  0xe1   :  { %4058 = vset.pattern.permute.xlu0 %v4544_v3  ;;  %v4727_v38 = vpack.c.bf16 %v4709_v34, %v4713_v35 }
  0xe2   :  { %v4718_v36 = vpop.f32.mrf.mxu0 }
  0xe3   :  { %7094 = vst [vmem:[#allocation2_spill] sm:$0xff] %v4727_v38 }
  0xe4   :  { %314 = vrot.lane.b32.xlu1 %v4673_v22, %s4546_s7  ;;  %v4722_v37 = vpop.f32.mrf.mxu0  ;;  %405 = vperm.xlu0 %4058, %v4685_v27  }
  0xe5   :  { %v4731_v39 = vpack.c.bf16 %v4718_v36, %v4722_v37  ;;  %4047 = vset.pattern.permute.xlu1 %v4545_v19 }
  0xe7   :  { %7095 = vst [vmem:[#allocation3_spill] sm:$0xff] %v4731_v39  ;;  %3840 = vmatprep.subr.bf16.mxu1 %v4731_v39 }
  0xe8   :  { %814 = vperm.xlu1 %4047, %v4673_v22   ;;  %3841 = vmatpush3.bf16.msra.mxu1 %v4731_v39 }
  0xe9   :  { %3842 = vmatprep.subr.bf16.mxu1 %v4727_v38  ;;  %417 = vperm.xlu0 %4058, %v4689_v28  }
  0xec   :  { %4048 = vset.pattern.permute.xlu1 %v4547_v23  ;;  %3843 = vmatpush3.bf16.msra.mxu1 %v4727_v38 }
  0xed   :  { %1259 = vperm.xlu1 %4048, %v4673_v22   ;;  %3844 = vmatprep.subr.bf16.mxu1 %v4739_v40 }
  0xee   :  { %320 = vrot.lane.b32.xlu0 %v4692_v29, %s4546_s7 }
  0xef   :  { %4070 = vset.pattern.permute.xlu0 %v4545_v19 }
  0xf0   :  { %3845 = vmatpush3.bf16.msra.mxu1 %v4739_v40 }
  0xf1   :  { %4049 = vset.pattern.permute.xlu1 %v4548_v26  ;;  %3846 = vmatprep.subr.bf16.mxu1 %v4747_v41 }
  0xf2   :  { %1696 = vperm.xlu1 %4049, %v4673_v22   ;;  %838 = vperm.xlu0 %4070, %v4696_v30  }
  0xf4   :  { %3847 = vmatpush3.bf16.msra.mxu1 %v4747_v41 }
  0xf5   :  { %3848 = vmatprep.subr.bf16.mxu1 %v4757_v42 }
  0xf6   :  { %312 = vrot.lane.b32.xlu1 %v4678_v24, %s4546_s7  ;;  %324 = vrot.lane.b32.xlu0 %v4699_v31, %s4546_s7 }
  0xf7   :  { %4050 = vset.pattern.permute.xlu1 %v4544_v3  ;;  %4073 = vset.pattern.permute.xlu0 %v4544_v3 }
  0xf8   :  { %3849 = vmatpush3.bf16.msra.mxu1 %v4757_v42 }
  0xf9   :  { %3850 = vmatprep.subr.bf16.mxu1 %v4766_v43 }
  0xfa   :  { %397 = vperm.xlu1 %4050, %v4678_v24   ;;  %421 = vperm.xlu0 %4073, %v4699_v31  }
  0xfc   :  { %3851 = vmatpush3.bf16.msra.mxu1 %v4766_v43 }
  0xfd   :  { %3852 = vmatprep.subr.bf16.mxu1 %v4781_v44 }
  0xfe   :  { %4051 = vset.pattern.permute.xlu1 %v4545_v19  ;;  %433 = vperm.xlu0 %4073, %v4702_v32  }
  0xff   :  { %810 = vperm.xlu1 %4051, %v4678_v24  }
 0x100   :  { %3853 = vmatpush3.bf16.msra.mxu1 %v4781_v44 }
 0x101   :  { %3854 = vmatprep.subr.bf16.mxu1 %v4789_v45 }
 0x102   :  { %4079 = vset.pattern.permute.xlu0 %v4548_v26 }
 0x103   :  { %4052 = vset.pattern.permute.xlu1 %v4547_v23  ;;  %1728 = vperm.xlu0 %4079, %v4702_v32  }
 0x104   :  { %1255 = vperm.xlu1 %4052, %v4678_v24   ;;  %3855 = vmatpush3.bf16.msra.mxu1 %v4789_v45 }
 0x107   :  { %328 = vrot.lane.b32.xlu0 %v4706_v33, %s4546_s7 }
 0x108   :  { %4053 = vset.pattern.permute.xlu1 %v4548_v26  ;;  %4085 = vset.pattern.permute.xlu0 %v4545_v19 }
 0x109   :  { %1692 = vperm.xlu1 %4053, %v4678_v24  }
 0x10b   :  { %854 = vperm.xlu0 %4085, %v4709_v34  }
 0x10d   :  { %318 = vrot.lane.b32.xlu1 %v4680_v25, %s4546_s7 }
 0x10e   :  { %4054 = vset.pattern.permute.xlu1 %v4544_v3 }
 0x10f   :  { %332 = vrot.lane.b32.xlu0 %v4713_v35, %s4546_s7 }
 0x110   :  { %4088 = vset.pattern.permute.xlu0 %v4544_v3 }
 0x111   :  { %409 = vperm.xlu1 %4054, %v4680_v25  }
 0x113   :  { %437 = vperm.xlu0 %4088, %v4713_v35  }
 0x115   :  { %4056 = vset.pattern.permute.xlu1 %v4547_v23 }
 0x116   :  { %1267 = vperm.xlu1 %4056, %v4680_v25  }
 0x117   :  { %449 = vperm.xlu0 %4088, %v4718_v36  }
 0x11a   :  { %4057 = vset.pattern.permute.xlu1 %v4548_v26 }
 0x11b   :  { %1704 = vperm.xlu1 %4057, %v4680_v25   ;;  %336 = vrot.lane.b32.xlu0 %v4722_v37, %s4546_s7 }
 0x11f   :  { %4059 = vset.pattern.permute.xlu1 %v4545_v19  ;;  %1137 = vrot.lane.b32.xlu0 %v4727_v38, %s4549_s0 }
 0x120   :  { %818 = vperm.xlu1 %4059, %v4685_v27  }
 0x123   :  { %1133 = vrot.lane.b32.xlu0 %v4747_v41, %s4549_s0 }
 0x124   :  { %4060 = vset.pattern.permute.xlu1 %v4547_v23 }
 0x125   :  { %1263 = vperm.xlu1 %4060, %v4685_v27  }
 0x129   :  { %4061 = vset.pattern.permute.xlu1 %v4548_v26 }
 0x12a   :  { %1700 = vperm.xlu1 %4061, %v4685_v27  }
 0x12e   :  { %322 = vrot.lane.b32.xlu1 %v4689_v28, %s4546_s7 }
 0x12f   :  { %4062 = vset.pattern.permute.xlu1 %v4545_v19 }
 0x132   :  { %830 = vperm.xlu1 %4062, %v4689_v28  }
 0x136   :  { %4063 = vset.pattern.permute.xlu1 %v4547_v23 }
 0x137   :  { %1275 = vperm.xlu1 %4063, %v4689_v28  }
 0x139   :  { %v311_v46 = vpop.permute.xlu0 %310 }
 0x13b   :  { %4064 = vset.pattern.permute.xlu1 %v4548_v26 }
 0x13c   :  { %1712 = vperm.xlu1 %4064, %v4689_v28  }
 0x140   :  { %4065 = vset.pattern.permute.xlu1 %v4544_v3 }
 0x141   :  { %413 = vperm.xlu1 %4065, %v4692_v29  }
 0x142   :  { %v4840_v47 = vpop.permute.xlu1 %393 }
 0x145   :  { %4066 = vset.pattern.permute.xlu1 %v4545_v19 }
 0x146   :  { %v4843_v48 = vpop.permute.xlu0 %806  ;;  %826 = vperm.xlu1 %4066, %v4692_v29  }
 0x147   :  { %v4846_v49 = vpop.permute.xlu1 %1251 }
 0x14a   :  { %v309_v50 = vpop.permute.xlu0 %308  ;;  %4067 = vset.pattern.permute.xlu1 %v4547_v23 }
 0x14b   :  { %1271 = vperm.xlu1 %4067, %v4692_v29   ;;  %356 = vxpose.xlu0.b32.start [1/16] (narrow) %v309_v50, 8 }
 0x14c   :  { %v4850_v51 = vpop.permute.xlu1 %1688 }
 0x14e   :  { %v4874_v58 = vpop.permute.xlu0 %389 }
 0x14f   :  { %4068 = vset.pattern.permute.xlu1 %v4548_v26  ;;  %357 = vxpose.xlu0.b32.cont [2/16] (narrow) %v311_v46, 8 }
 0x150   :  { %1708 = vperm.xlu1 %4068, %v4692_v29  }
 0x151   :  { %v4854_v52 = vpop.permute.xlu1 %802 }
 0x152   :  { %v4878_v59 = vpop.permute.xlu0 %401 }
 0x154   :  { %326 = vrot.lane.b32.xlu1 %v4696_v30, %s4546_s7 }
 0x155   :  { %4069 = vset.pattern.permute.xlu1 %v4544_v3 }
 0x156   :  { %v4859_v53 = vpop.permute.xlu1 %1247 }
 0x157   :  { %v4884_v62 = vpop.permute.xlu0 %822 }
 0x158   :  { %425 = vperm.xlu1 %4069, %v4696_v30  }
 0x15b   :  { %v4862_v54 = vpop.permute.xlu1 %1684  ;;  %v317_v0 = vpop.permute.xlu0 %316 }
 0x15c   :  { %4071 = vset.pattern.permute.xlu1 %v4547_v23 }
 0x15d   :  { %1283 = vperm.xlu1 %4071, %v4696_v30  }
 0x15f   :  { %v315_v55 = vpop.permute.xlu1 %314  ;;  %v4899_v4 = vpop.permute.xlu0 %405 }
 0x161   :  { %4072 = vset.pattern.permute.xlu1 %v4548_v26 }
 0x162   :  { %1720 = vperm.xlu1 %4072, %v4696_v30  }
 0x163   :  { %v4868_v56 = vpop.permute.xlu1 %814 }
 0x164   :  { %v4904_v6 = vpop.permute.xlu0 %417 }
 0x166   :  { %4074 = vset.pattern.permute.xlu1 %v4545_v19 }
 0x167   :  { %834 = vperm.xlu1 %4074, %v4699_v31  }
 0x168   :  { %v4872_v57 = vpop.permute.xlu1 %1259  ;;  %v321_v9 = vpop.permute.xlu0 %320 }
 0x16b   :  { %4075 = vset.pattern.permute.xlu1 %v4547_v23 }
 0x16c   :  { %1279 = vperm.xlu1 %4075, %v4699_v31  }
 0x16d   :  { %v4880_v60 = vpop.permute.xlu1 %1696  ;;  %v4932_v15 = vpop.permute.xlu0 %838 }
 0x170   :  { %4076 = vset.pattern.permute.xlu1 %v4548_v26 }
 0x171   :  { %v313_v61 = vpop.permute.xlu1 %312  ;;  %1716 = vperm.xlu1 %4076, %v4699_v31   ;;  %v325_v17 = vpop.permute.xlu0 %324 }
 0x172   :  { %358 = vxpose.xlu0.b32.cont [3/16] (narrow) %v313_v61, 8 }
 0x175   :  { %v4886_v63 = vpop.permute.xlu1 %397  ;;  %330 = vrot.lane.b32.xlu1 %v4702_v32, %s4546_s7  ;;  %v4954_v24 = vpop.permute.xlu0 %421 }
 0x176   :  { %359 = vxpose.xlu0.b32.cont [4/16] (narrow) %v315_v55, 8  ;;  %4077 = vset.pattern.permute.xlu1 %v4545_v19 }
 0x179   :  { %846 = vperm.xlu1 %4077, %v4702_v32   ;;  %v4962_v28 = vpop.permute.xlu0 %433 }
 0x17a   :  { %v4892_v1 = vpop.permute.xlu1 %810  ;;  %360 = vxpose.xlu0.b32.cont [5/16] (narrow) %v317_v0, 8 }
 0x17d   :  { %4078 = vset.pattern.permute.xlu1 %v4547_v23 }
 0x17e   :  { %1291 = vperm.xlu1 %4078, %v4702_v32   ;;  %v4968_v30 = vpop.permute.xlu0 %1728 }
 0x17f   :  { %v4896_v2 = vpop.permute.xlu1 %1255  ;;  %7108 = vst [vmem:[#allocation16_spill] sm:$0xff] %v4968_v30  ;;  %v7017_v30 = vmov -1e+30  }
 0x182   :  { %4080 = vset.pattern.permute.xlu1 %v4544_v3 }
 0x183   :  { %429 = vperm.xlu1 %4080, %v4706_v33  }
 0x184   :  { %v4902_v5 = vpop.permute.xlu1 %1692 }
 0x187   :  { %4081 = vset.pattern.permute.xlu1 %v4545_v19 }
 0x188   :  { %v319_v7 = vpop.permute.xlu1 %318  ;;  %842 = vperm.xlu1 %4081, %v4706_v33  }
 0x189   :  { %361 = vxpose.xlu0.b32.cont [6/16] (narrow) %v319_v7, 8 }
 0x18c   :  { %v4908_v8 = vpop.permute.xlu1 %409  ;;  %4082 = vset.pattern.permute.xlu1 %v4547_v23 }
 0x18d   :  { %1287 = vperm.xlu1 %4082, %v4706_v33   ;;  %362 = vxpose.xlu0.b32.cont [7/16] (narrow) %v321_v9, 8 }
 0x191   :  { %v4912_v10 = vpop.permute.xlu1 %1267  ;;  %4083 = vset.pattern.permute.xlu1 %v4548_v26 }
 0x192   :  { %1724 = vperm.xlu1 %4083, %v4706_v33  }
 0x196   :  { %v4916_v11 = vpop.permute.xlu1 %1704  ;;  %334 = vrot.lane.b32.xlu1 %v4709_v34, %s4546_s7 }
 0x197   :  { %7102 = vst [vmem:[#allocation10_spill] sm:$0xff] %v4916_v11  ;;  %4084 = vset.pattern.permute.xlu1 %v4544_v3 }
 0x19a   :  { %441 = vperm.xlu1 %4084, %v4709_v34  }
 0x19b   :  { %v4922_v12 = vpop.permute.xlu1 %818 }
 0x19e   :  { %4086 = vset.pattern.permute.xlu1 %v4547_v23 }
 0x19f   :  { %1299 = vperm.xlu1 %4086, %v4709_v34  }
 0x1a0   :  { %v4926_v13 = vpop.permute.xlu1 %1263 }
 0x1a3   :  { %4087 = vset.pattern.permute.xlu1 %v4548_v26 }
 0x1a4   :  { %1736 = vperm.xlu1 %4087, %v4709_v34  }
 0x1a5   :  { %v4930_v14 = vpop.permute.xlu1 %1700 }
 0x1a6   :  { %7103 = vst [vmem:[#allocation11_spill] sm:$0xff] %v4930_v14 }
 0x1a8   :  { %4089 = vset.pattern.permute.xlu1 %v4545_v19 }
 0x1a9   :  { %v323_v16 = vpop.permute.xlu1 %322  ;;  %850 = vperm.xlu1 %4089, %v4713_v35  }
 0x1aa   :  { %363 = vxpose.xlu0.b32.cont [8/16] (narrow) %v323_v16, 8 }
 0x1ad   :  { %v4936_v18 = vpop.permute.xlu1 %830  ;;  %4090 = vset.pattern.permute.xlu1 %v4547_v23 }
 0x1ae   :  { %1295 = vperm.xlu1 %4090, %v4713_v35   ;;  %364 = vxpose.xlu0.b32.cont [9/16] (narrow) %v325_v17, 8 }
 0x1b2   :  { %v4940_v20 = vpop.permute.xlu1 %1275  ;;  %4091 = vset.pattern.permute.xlu1 %v4548_v26 }
 0x1b3   :  { %7104 = vst [vmem:[#allocation12_spill] sm:$0xff] %v4940_v20  ;;  %1732 = vperm.xlu1 %4091, %v4713_v35  }
 0x1b7   :  { %v4944_v21 = vpop.permute.xlu1 %1712  ;;  %338 = vrot.lane.b32.xlu1 %v4718_v36, %s4546_s7 }
 0x1b8   :  { %7105 = vst [vmem:[#allocation13_spill] sm:$0xff] %v4944_v21  ;;  %4092 = vset.pattern.permute.xlu1 %v4545_v19 }
 0x1bb   :  { %862 = vperm.xlu1 %4092, %v4718_v36  }
 0x1bc   :  { %v4950_v22 = vpop.permute.xlu1 %413 }
 0x1bf   :  { %4093 = vset.pattern.permute.xlu1 %v4547_v23 }
 0x1c0   :  { %1307 = vperm.xlu1 %4093, %v4718_v36  }
 0x1c1   :  { %v4956_v25 = vpop.permute.xlu1 %826 }
 0x1c4   :  { %4094 = vset.pattern.permute.xlu1 %v4544_v3  ;;  %v329_v3 = vpop.permute.xlu0 %328 }
 0x1c5   :  { %445 = vperm.xlu1 %4094, %v4722_v37  }
 0x1c6   :  { %v4960_v27 = vpop.permute.xlu1 %1271 }
 0x1c7   :  { %7106 = vst [vmem:[#allocation14_spill] sm:$0xff] %v4960_v27 }
 0x1c8   :  { %v4993_v35 = vpop.permute.xlu0 %854 }
 0x1c9   :  { %4095 = vset.pattern.permute.xlu1 %v4545_v19 }
 0x1ca   :  { %858 = vperm.xlu1 %4095, %v4722_v37  }
 0x1cb   :  { %v4966_v29 = vpop.permute.xlu1 %1708 }
 0x1cc   :  { %7107 = vst [vmem:[#allocation15_spill] sm:$0xff] %v4966_v29 }
 0x1ce   :  { %4096 = vset.pattern.permute.xlu1 %v4547_v23 }
 0x1cf   :  { %v327_v31 = vpop.permute.xlu1 %326  ;;  %1303 = vperm.xlu1 %4096, %v4722_v37  }
 0x1d0   :  { %365 = vxpose.xlu0.b32.cont [10/16] (narrow) %v327_v31, 8 }
 0x1d3   :  { %v4972_v32 = vpop.permute.xlu1 %425  ;;  %4097 = vset.pattern.permute.xlu1 %v4548_v26 }
 0x1d4   :  { %1740 = vperm.xlu1 %4097, %v4722_v37   ;;  %366 = vxpose.xlu0.b32.cont [11/16] (narrow) %v329_v3, 8  ;;  %v333_v37 = vpop.permute.xlu0 %332 }
 0x1d8   :  { %v4976_v19 = vpop.permute.xlu1 %1283  ;;  %1744 = vperm.xlu1 %4097, %v4718_v36   ;;  %v5005_v7 = vpop.permute.xlu0 %437 }
 0x1d9   :  { %7109 = vst [vmem:[#allocation17_spill] sm:$0xff] %v4976_v19 }
 0x1dc   :  { %1139 = vrot.lane.b32.xlu1 %v4731_v39, %s4549_s0  ;;  %v5009_v16 = vpop.permute.xlu0 %449 }
 0x1dd   :  { %v4981_v23 = vpop.permute.xlu1 %1720 }
 0x1de   :  { %7110 = vst [vmem:[#allocation18_spill] sm:$0xff] %v4981_v23 }
 0x1e0   :  { %1135 = vrot.lane.b32.xlu1 %v4739_v40, %s4549_s0  ;;  %v337_v31 = vpop.permute.xlu0 %336 }
 0x1e2   :  { %v4985_v33 = vpop.permute.xlu1 %834 }
 0x1e4   :  { %1131 = vrot.lane.b32.xlu1 %v4757_v42, %s4549_s0 }
 0x1e7   :  { %v4989_v26 = vpop.permute.xlu1 %1279 }
 0x1e8   :  { %7111 = vst [vmem:[#allocation19_spill] sm:$0xff] %v4989_v26 }
 0x1ec   :  { %v4991_v34 = vpop.permute.xlu1 %1716 }
 0x1ed   :  { %7112 = vst [vmem:[#allocation20_spill] sm:$0xff] %v4991_v34 }
 0x1f0   :  { %v331_v36 = vpop.permute.xlu1 %330 }
 0x1f1   :  { %367 = vxpose.xlu0.b32.cont [12/16] (narrow) %v331_v36, 8 }
 0x1f4   :  { %v4995_v46 = vpop.permute.xlu1 %846 }
 0x1f5   :  { %368 = vxpose.xlu0.b32.cont [13/16] (narrow) %v333_v37, 8 }
 0x1f9   :  { %v4997_v50 = vpop.permute.xlu1 %1291 }
 0x1fa   :  { %7113 = vst [vmem:[#allocation21_spill] sm:$0xff] %v4997_v50 }
 0x1fe   :  { %v4999_v55 = vpop.permute.xlu1 %429 }
 0x203   :  { %v5001_v61 = vpop.permute.xlu1 %842 }
 0x208   :  { %v5003_v0 = vpop.permute.xlu1 %1287 }
 0x209   :  { %7114 = vst [vmem:[#allocation22_spill] sm:$0xff] %v5003_v0 }
 0x20d   :  { %v5007_v9 = vpop.permute.xlu1 %1724 }
 0x20e   :  { %7115 = vst [vmem:[#allocation23_spill] sm:$0xff] %v5007_v9  ;;  %v452_v9 = vlaneseq }
 0x211   :  { %v335_v17 = vpop.permute.xlu1 %334 }
 0x212   :  { %369 = vxpose.xlu0.b32.cont [14/16] (narrow) %v335_v17, 8 }
 0x215   :  { %v5011_v3 = vpop.permute.xlu1 %441 }
 0x216   :  { %370 = vxpose.xlu0.b32.cont [15/16] (narrow) %v337_v31, 8 }
 0x21a   :  { %v5013_v36 = vpop.permute.xlu1 %1299 }
 0x21b   :  { %7116 = vst [vmem:[#allocation24_spill] sm:$0xff] %v5013_v36 }
 0x21f   :  { %v5015_v37 = vpop.permute.xlu1 %1736 }
 0x220   :  { %7117 = vst [vmem:[#allocation25_spill] sm:$0xff] %v5015_v37 }
 0x224   :  { %v5017_v42 = vpop.permute.xlu1 %850 }
 0x229   :  { %v5019_v41 = vpop.permute.xlu1 %1295 }
 0x22a   :  { %7118 = vst [vmem:[#allocation26_spill] sm:$0xff] %v5019_v41  ;;  %v1138_v41 = vpop.permute.xlu0 %1137 }
 0x22e   :  { %v5021_v40 = vpop.permute.xlu1 %1732 }
 0x22f   :  { %7119 = vst [vmem:[#allocation27_spill] sm:$0xff] %v5021_v40  ;;  %v1134_v40 = vpop.permute.xlu0 %1133 }
 0x232   :  { %v339_v38 = vpop.permute.xlu1 %338 }
 0x233   :  { %371 = vxpose.xlu0.b32.end [16/16] (narrow) %v339_v38, 8 }
 0x236   :  { %v5023_v39 = vpop.permute.xlu1 %862 }
 0x23b   :  { %v5025_v45 = vpop.permute.xlu1 %1307 }
 0x23c   :  { %7120 = vst [vmem:[#allocation28_spill] sm:$0xff] %v5025_v45 }
 0x240   :  { %v5027_v17 = vpop.permute.xlu1 %445 }
 0x245   :  { %v5029_v44 = vpop.permute.xlu1 %858 }
 0x24a   :  { %v5031_v31 = vpop.permute.xlu1 %1303 }
 0x24b   :  { %7121 = vst [vmem:[#allocation29_spill] sm:$0xff] %v5031_v31  ;;  %v5037_v31 = vshrl.u32 %v452_v9, 7 }
 0x24d   :  { %7124 = vst [vmem:[#allocation32_spill] sm:$0xff] %v5037_v31 }
 0x24f   :  { %v5033_v43 = vpop.permute.xlu1 %1740 }
 0x250   :  { %7122 = vst [vmem:[#allocation30_spill] sm:$0xff] %v5033_v43  ;;  %v25_v43 = vld [vmem:[%s6993_s1 + $0x8] sm:$0xff] }
 0x251   :  { %vm41_vm1 = vcmp.gt.f32.partialorder %v25_v43, 0.0  ;;  %v26_v43 = vld [vmem:[%s6993_s1 + $0x10] sm:$0xff] }
 0x252   :  { %v5066_v34 = vsel %vm41_vm1, 0.0, %v7017_v30  ;;  %vm42_vm4 = vcmp.gt.f32.partialorder %v26_v43, 0.0  ;;  %v29_v43 = vld [vmem:[%s6993_s1 + $0x28] sm:$0xff] }
 0x253   :  { %v5035_v37 = vpop.permute.xlu1 %1744  ;;  %7125 = vst [vmem:[#allocation33_spill] sm:$0xff] %v5066_v34  ;;  %v5097_v20 = vsel %vm42_vm4, 0.0, %v7017_v30  ;;  %vm45_vm13 = vcmp.gt.f32.partialorder %v29_v43, 0.0 }
 0x254   :  { %7123 = vst [vmem:[#allocation31_spill] sm:$0xff] %v5035_v37  ;;  %v7015_v37 = vsub.s32 1, %v5037_v31  ;;  %7128 = vst [vmem:[#allocation36_spill] sm:$0xff] %v5097_v20 }
 0x257   :  { %v1140_v36 = vpop.permute.xlu1 %1139 }
 0x258   :  { %3872 = vmatprep.subr.bf16.mxu0 %v1140_v36 }
 0x259   :  { %3873 = vmatpush3.bf16.msra.mxu0 %v1140_v36  ;;  %v7014_v36 = vsub.s32 0, %v5037_v31 }
 0x25a   :  { %3874 = vmatprep.subr.bf16.mxu0 %v1138_v41 }
 0x25b   :  { %v1136_v38 = vpop.permute.xlu1 %1135 }
 0x25d   :  { %3875 = vmatpush3.bf16.msra.mxu0 %v1138_v41  ;;  %v24_v41 = vld [vmem:[%s6993_s1] sm:$0xff] }
 0x25e   :  { %3876 = vmatprep.subr.bf16.mxu0 %v1136_v38  ;;  %vm40_vm2 = vcmp.gt.f32.partialorder %v24_v41, 0.0 }
 0x25f   :  { %v1132_v45 = vpop.permute.xlu1 %1131  ;;  %v5077_v0 = vsel %vm40_vm2, 0.0, %v7017_v30 }
 0x260   :  { %7126 = vst [vmem:[#allocation34_spill] sm:$0xff] %v5077_v0 }
 0x261   :  { %3877 = vmatpush3.bf16.msra.mxu0 %v1136_v38 }
 0x262   :  { %3878 = vmatprep.subr.bf16.mxu0 %v1134_v40 }
 0x265   :  { %3879 = vmatpush3.bf16.msra.mxu0 %v1134_v40  ;;  %v27_v40 = vld [vmem:[%s6993_s1 + $0x18] sm:$0xff] }
 0x266   :  { %3880 = vmatprep.subr.bf16.mxu0 %v1132_v45  ;;  %vm43_vm3 = vcmp.gt.f32.partialorder %v27_v40, 0.0 }
 0x267   :  { %v5085_v21 = vsel %vm43_vm3, 0.0, %v7017_v30 }
 0x268   :  { %7127 = vst [vmem:[#allocation35_spill] sm:$0xff] %v5085_v21 }
 0x269   :  { %3881 = vmatpush3.bf16.msra.mxu0 %v1132_v45 }
 0x273   :  { %v5050_v45 = vpop.trf.xlu0 }
 0x274   :  { %v5055_v9 = vrot.slane %v5050_v45, %v7014_v36  ;;  %v5060_v38 = vrot.slane %v5050_v45, %v7015_v37 }
 0x276   :  { %v457_v23 = vadd.f32 %v5055_v9, %v4840_v47  ;;  %v456_v36 = vadd.f32 %v5055_v9, %v4874_v58  ;;  %v459_v37 = vadd.f32 %v5055_v9, %v4878_v59  ;;  %v458_v41 = vadd.f32 %v5055_v9, %v4886_v63 }
 0x277   :  { %v870_v50 = vadd.f32 %v5060_v38, %v4843_v48  ;;  %v869_v26 = vadd.f32 %v5060_v38, %v4854_v52  ;;  %v872_v48 = vadd.f32 %v5060_v38, %v4868_v56 }
 0x278   :  { %vm473_vm5 = vcmp.gt.f32.partialorder %v457_v23, 0.0  ;;  %v489_v47 = vmul.f32 0.2, %v457_v23  ;;  %vm472_vm6 = vcmp.gt.f32.partialorder %v456_v36, 0.0  ;;  %v488_v58 = vmul.f32 0.2, %v456_v36 }
 0x279   :  { %vm475_vm7 = vcmp.gt.f32.partialorder %v459_v37, 0.0  ;;  %v491_v19 = vmul.f32 0.2, %v459_v37  ;;  %vm474_vm8 = vcmp.gt.f32.partialorder %v458_v41, 0.0  ;;  %v490_v59 = vmul.f32 0.2, %v458_v41 }
 0x27a   :  { %v505_v29 = vsel %vm473_vm5, %v457_v23, %v489_v47  ;;  %v504_v63 = vsel %vm472_vm6, %v456_v36, %v488_v58  ;;  %v902_v27 = vmul.f32 0.2, %v870_v50  ;;  %vm886_vm9 = vcmp.gt.f32.partialorder %v870_v50, 0.0 }
 0x27b   :  { %v5090_v14 = vadd.f32 %v505_v29, %v5066_v34  ;;  %v5093_v52 = vadd.f32 %v504_v63, %v5077_v0  ;;  %v507_v11 = vsel %vm475_vm7, %v459_v37, %v491_v19  ;;  %v506_v23 = vsel %vm474_vm8, %v458_v41, %v490_v59  ;;  %v28_v41 = vld [vmem:[%s6993_s1 + $0x20] sm:$0xff]  ;;  %v31_v59 = vld [vmem:[%s6993_s1 + $0x38] sm:$0xff]  ;;  %v30_v63 = vld [vmem:[%s6993_s1 + $0x30] sm:$0xff] }
 0x27c   :  { %v871_v36 = vadd.f32 %v5060_v38, %v4892_v1  ;;  %vm885_vm10 = vcmp.gt.f32.partialorder %v869_v26, 0.0  ;;  %v901_v56 = vmul.f32 0.2, %v869_v26  ;;  %v5104_v29 = vadd.f32 %v507_v11, %v5085_v21 }
 0x27d   :  { %538 = vmax.xlane.f32.xlu0 %v5090_v14  ;;  %536 = vmax.xlane.f32.xlu1 %v5093_v52  ;;  %v5107_v19 = vadd.f32 %v506_v23, %v5097_v20  ;;  %v918_v37 = vsel %vm886_vm9, %v870_v50, %v902_v27  ;;  %v904_v40 = vmul.f32 0.2, %v872_v48  ;;  %v461_v1 = vadd.f32 %v5055_v9, %v4908_v8 }
 0x27e   :  { %v917_v47 = vsel %vm885_vm10, %v869_v26, %v901_v56  ;;  %vm888_vm11 = vcmp.gt.f32.partialorder %v872_v48, 0.0  ;;  %v903_v11 = vmul.f32 0.2, %v871_v36  ;;  %v460_v58 = vadd.f32 %v5055_v9, %v4899_v4 }
 0x27f   :  { %vm887_vm12 = vcmp.gt.f32.partialorder %v871_v36, 0.0  ;;  %v5122_v27 = vadd.f32 %v918_v37, %v5066_v34  ;;  %vm44_vm14 = vcmp.gt.f32.partialorder %v28_v41, 0.0  ;;  %v5125_v8 = vadd.f32 %v917_v47, %v5077_v0 }
 0x280   :  { %v920_v50 = vsel %vm888_vm11, %v872_v48, %v904_v40  ;;  %v493_v26 = vmul.f32 0.2, %v461_v1  ;;  %v463_v4 = vadd.f32 %v5055_v9, %v4904_v6  ;;  %v919_v23 = vsel %vm887_vm12, %v871_v36, %v903_v11 }
 0x281   :  { %542 = vmax.xlane.f32.xlu0 %v5104_v29  ;;  %540 = vmax.xlane.f32.xlu1 %v5107_v19  ;;  %7129 = vst [vmem:[#allocation37_spill] sm:$0xff] %v5122_v27  ;;  %vm477_vm15 = vcmp.gt.f32.partialorder %v461_v1, 0.0  ;;  %v492_v56 = vmul.f32 0.2, %v460_v58  ;;  %v462_v37 = vadd.f32 %v5055_v9, %v4950_v22  ;;  %v5140_v48 = vsel %vm45_vm13, 0.0, %v7017_v30 }
 0x282   :  { %7130 = vst [vmem:[#allocation38_spill] sm:$0xff] %v5140_v48  ;;  %vm476_vm1 = vcmp.gt.f32.partialorder %v460_v58, 0.0  ;;  %v5143_v6 = vadd.f32 %v920_v50, %v5085_v21  ;;  %v5147_v40 = vsel %vm44_vm14, 0.0, %v7017_v30  ;;  %vm47_vm2 = vcmp.gt.f32.partialorder %v31_v59, 0.0 }
 0x283   :  { %7132 = vst [vmem:[#allocation40_spill] sm:$0xff] %v5147_v40  ;;  %vm46_vm3 = vcmp.gt.f32.partialorder %v30_v63, 0.0  ;;  %v5150_v36 = vadd.f32 %v919_v23, %v5097_v20  ;;  %v509_v22 = vsel %vm477_vm15, %v461_v1, %v493_v26  ;;  %v495_v43 = vmul.f32 0.2, %v463_v4 }
 0x284   :  { %7131 = vst [vmem:[#allocation39_spill] sm:$0xff] %v5143_v6  ;;  %v874_v47 = vadd.f32 %v5060_v38, %v4884_v62  ;;  %v508_v11 = vsel %vm476_vm1, %v460_v58, %v492_v56  ;;  %vm479_vm4 = vcmp.gt.f32.partialorder %v463_v4, 0.0  ;;  %v873_v50 = vadd.f32 %v5060_v38, %v4922_v12 }
 0x285   :  { %951 = vmax.xlane.f32.xlu0 %v5122_v27  ;;  %949 = vmax.xlane.f32.xlu1 %v5125_v8  ;;  %v494_v27 = vmul.f32 0.2, %v462_v37  ;;  %vm478_vm5 = vcmp.gt.f32.partialorder %v462_v37, 0.0  ;;  %v5159_v41 = vadd.f32 %v509_v22, %v5140_v48  ;;  %v5162_v1 = vsel %vm47_vm2, 0.0, %v7017_v30 }
 0x286   :  { %7134 = vst [vmem:[#allocation42_spill] sm:$0xff] %v5162_v1  ;;  %v5165_v26 = vsel %vm46_vm3, 0.0, %v7017_v30  ;;  %v5168_v62 = vadd.f32 %v508_v11, %v5147_v40  ;;  %v511_v58 = vsel %vm479_vm4, %v463_v4, %v495_v43  ;;  %v906_v59 = vmul.f32 0.2, %v874_v47 }
 0x287   :  { %7133 = vst [vmem:[#allocation41_spill] sm:$0xff] %v5159_v41  ;;  %7135 = vst [vmem:[#allocation43_spill] sm:$0xff] %v5165_v26  ;;  %v876_v12 = vadd.f32 %v5060_v38, %v4936_v18  ;;  %v510_v63 = vsel %vm478_vm5, %v462_v37, %v494_v27  ;;  %vm890_vm6 = vcmp.gt.f32.partialorder %v874_v47, 0.0  ;;  %v905_v23 = vmul.f32 0.2, %v873_v50  ;;  %v33_v18 = vld [vmem:[%s6993_s1 + $0x48] sm:$0xff] }
 0x288   :  { %v875_v56 = vadd.f32 %v5060_v38, %v4956_v25  ;;  %vm889_vm7 = vcmp.gt.f32.partialorder %v873_v50, 0.0  ;;  %v5177_v22 = vadd.f32 %v511_v58, %v5162_v1  ;;  %v5180_v4 = vadd.f32 %v510_v63, %v5165_v26  ;;  %v32_v27 = vld [vmem:[%s6993_s1 + $0x40] sm:$0xff] }
 0x289   :  { %955 = vmax.xlane.f32.xlu0 %v5143_v6  ;;  %953 = vmax.xlane.f32.xlu1 %v5150_v36  ;;  %v922_v43 = vsel %vm890_vm6, %v874_v47, %v906_v59  ;;  %v908_v11 = vmul.f32 0.2, %v876_v12  ;;  %v465_v25 = vadd.f32 %v5055_v9, %v4972_v32  ;;  %v921_v37 = vsel %vm889_vm7, %v873_v50, %v905_v23 }
 0x28a   :  { %7136 = vst [vmem:[#allocation44_spill] sm:$0xff] %v5177_v22  ;;  %vm892_vm8 = vcmp.gt.f32.partialorder %v876_v12, 0.0  ;;  %v907_v58 = vmul.f32 0.2, %v875_v56  ;;  %v464_v63 = vadd.f32 %v5055_v9, %v4954_v24  ;;  %vm891_vm9 = vcmp.gt.f32.partialorder %v875_v56, 0.0  ;;  %v35_v24 = vld [vmem:[%s6993_s1 + $0x58] sm:$0xff] }
 0x28b   :  { %vm49_vm10 = vcmp.gt.f32.partialorder %v33_v18, 0.0  ;;  %vm48_vm11 = vcmp.gt.f32.partialorder %v32_v27, 0.0  ;;  %v467_v32 = vadd.f32 %v5055_v9, %v4962_v28  ;;  %v5197_v47 = vadd.f32 %v922_v43, %v5140_v48  ;;  %v34_v18 = vld [vmem:[%s6993_s1 + $0x50] sm:$0xff] }
 0x28c   :  { %v5200_v50 = vadd.f32 %v921_v37, %v5147_v40  ;;  %v924_v59 = vsel %vm892_vm8, %v876_v12, %v908_v11  ;;  %v497_v23 = vmul.f32 0.2, %v465_v25  ;;  %v923_v30 = vsel %vm891_vm9, %v875_v56, %v907_v58 }
 0x28d   :  { %546 = vmax.xlane.f32.xlu0 %v5159_v41  ;;  %544 = vmax.xlane.f32.xlu1 %v5168_v62  ;;  %7137 = vst [vmem:[#allocation45_spill] sm:$0xff] %v5197_v47  ;;  %vm481_vm12 = vcmp.gt.f32.partialorder %v465_v25, 0.0  ;;  %v466_v28 = vadd.f32 %v5055_v9, %v4999_v55  ;;  %v7138_v12 = vmov -1e+30   ;;  %vm480_vm13 = vcmp.gt.f32.partialorder %v464_v63, 0.0 }
 0x28e   :  { %v5213_v43 = vsel %vm49_vm10, 0.0, %v7138_v12  ;;  %v5216_v11 = vadd.f32 %v924_v59, %v5162_v1  ;;  %v5220_v37 = vsel %vm48_vm11, 0.0, %v7138_v12  ;;  %vm51_vm14 = vcmp.gt.f32.partialorder %v35_v24, 0.0 }
 0x28f   :  { %7139 = vst [vmem:[#allocation46_spill] sm:$0xff] %v5213_v43  ;;  %7141 = vst [vmem:[#allocation48_spill] sm:$0xff] %v5220_v37  ;;  %vm50_vm15 = vcmp.gt.f32.partialorder %v34_v18, 0.0  ;;  %v5223_v56 = vadd.f32 %v923_v30, %v5165_v26  ;;  %v513_v55 = vsel %vm481_vm12, %v465_v25, %v497_v23  ;;  %v499_v58 = vmul.f32 0.2, %v467_v32 }
 0x290   :  { %7140 = vst [vmem:[#allocation47_spill] sm:$0xff] %v5216_v11  ;;  %vm483_vm1 = vcmp.gt.f32.partialorder %v467_v32, 0.0  ;;  %v498_v6 = vmul.f32 0.2, %v466_v28  ;;  %v877_v59 = vadd.f32 %v5060_v38, %v4985_v33  ;;  %vm482_vm2 = vcmp.gt.f32.partialorder %v466_v28, 0.0 }
 0x291   :  { %550 = vmax.xlane.f32.xlu0 %v5177_v22  ;;  %548 = vmax.xlane.f32.xlu1 %v5180_v4  ;;  %v496_v22 = vmul.f32 0.2, %v464_v63  ;;  %v5232_v27 = vadd.f32 %v513_v55, %v5213_v43  ;;  %v5235_v30 = vsel %vm51_vm14, 0.0, %v7138_v12  ;;  %v5238_v25 = vsel %vm50_vm15, 0.0, %v7138_v12 }
 0x292   :  { %7143 = vst [vmem:[#allocation50_spill] sm:$0xff] %v5235_v30  ;;  %7144 = vst [vmem:[#allocation51_spill] sm:$0xff] %v5238_v25  ;;  %v880_v33 = vadd.f32 %v5060_v38, %v4995_v46  ;;  %v514_v23 = vsel %vm482_vm2, %v466_v28, %v498_v6  ;;  %v909_v24 = vmul.f32 0.2, %v877_v59  ;;  %v879_v18 = vadd.f32 %v5060_v38, %v5001_v61  ;;  %v37_v46 = vld [vmem:[%s6993_s1 + $0x68] sm:$0xff]  ;;  %v36_v6 = vld [vmem:[%s6993_s1 + $0x60] sm:$0xff] }
 0x293   :  { %v512_v41 = vsel %vm480_vm13, %v464_v63, %v496_v22  ;;  %7142 = vst [vmem:[#allocation49_spill] sm:$0xff] %v5232_v27  ;;  %v515_v22 = vsel %vm483_vm1, %v467_v32, %v499_v58  ;;  %vm893_vm4 = vcmp.gt.f32.partialorder %v877_v59, 0.0  ;;  %v469_v61 = vadd.f32 %v5055_v9, %v5011_v3 }
 0x294   :  { %v5250_v55 = vadd.f32 %v515_v22, %v5235_v30  ;;  %v912_v58 = vmul.f32 0.2, %v880_v33  ;;  %v925_v28 = vsel %vm893_vm4, %v877_v59, %v909_v24  ;;  %vm896_vm5 = vcmp.gt.f32.partialorder %v880_v33, 0.0  ;;  %v38_v24 = vld [vmem:[%s6993_s1 + $0x70] sm:$0xff] }
 0x295   :  { %959 = vmax.xlane.f32.xlu0 %v5197_v47  ;;  %957 = vmax.xlane.f32.xlu1 %v5200_v50  ;;  %v878_v47 = vadd.f32 %v5060_v38, %v4932_v15  ;;  %v5241_v15 = vadd.f32 %v512_v41, %v5220_v37  ;;  %v5253_v41 = vadd.f32 %v514_v23, %v5238_v25  ;;  %v911_v22 = vmul.f32 0.2, %v879_v18 }
 0x296   :  { %7145 = vst [vmem:[#allocation52_spill] sm:$0xff] %v5250_v55  ;;  %v468_v23 = vadd.f32 %v5055_v9, %v5005_v7  ;;  %vm895_vm6 = vcmp.gt.f32.partialorder %v879_v18, 0.0  ;;  %vm53_vm7 = vcmp.gt.f32.partialorder %v37_v46, 0.0  ;;  %vm52_vm8 = vcmp.gt.f32.partialorder %v36_v6, 0.0  ;;  %v39_v7 = vld [vmem:[%s6993_s1 + $0x78] sm:$0xff]  ;;  %s4551_s1 = smov 96  }
 0x297   :  { %v910_v63 = vmul.f32 0.2, %v878_v47  ;;  %vm894_vm3 = vcmp.gt.f32.partialorder %v878_v47, 0.0  ;;  %v5271_v3 = vadd.f32 %v925_v28, %v5220_v37  ;;  %vm485_vm9 = vcmp.gt.f32.partialorder %v469_v61, 0.0 }
 0x298   :  { %v501_v59 = vmul.f32 0.2, %v469_v61  ;;  %v470_v28 = vadd.f32 %v5055_v9, %v5027_v17  ;;  %vm484_vm10 = vcmp.gt.f32.partialorder %v468_v23, 0.0  ;;  %vm55_vm11 = vcmp.gt.f32.partialorder %v39_v7, 0.0 }
 0x299   :  { %963 = vmax.xlane.f32.xlu0 %v5216_v11  ;;  %961 = vmax.xlane.f32.xlu1 %v5223_v56  ;;  %v926_v32 = vsel %vm894_vm3, %v878_v47, %v910_v63  ;;  %v928_v63 = vsel %vm896_vm5, %v880_v33, %v912_v58  ;;  %v1312_v33 = vsub.s32 2, %v5037_v31  ;;  %v5288_v58 = vsel %vm53_vm7, 0.0, %v7138_v12 }
 0x29a   :  { %v5268_v47 = vadd.f32 %v926_v32, %v5213_v43  ;;  %v471_v32 = vadd.f32 %v5055_v9, %v5009_v16  ;;  %7147 = vst [vmem:[#allocation54_spill] sm:$0xff] %v5288_v58  ;;  %vm54_vm12 = vcmp.gt.f32.partialorder %v38_v24, 0.0  ;;  %v5295_v16 = vadd.f32 %v928_v63, %v5235_v30 }
 0x29b   :  { %v517_v9 = vsel %vm485_vm9, %v469_v61, %v501_v59  ;;  %v502_v11 = vmul.f32 0.2, %v470_v28  ;;  %v881_v6 = vadd.f32 %v5060_v38, %v5017_v42  ;;  %vm486_vm14 = vcmp.gt.f32.partialorder %v470_v28, 0.0 }
 0x29c   :  { %7146 = vst [vmem:[#allocation53_spill] sm:$0xff] %v5268_v47  ;;  %7149 = vst [vmem:[#allocation56_spill] sm:$0xff] %v5295_v16  ;;  %vm487_vm13 = vcmp.gt.f32.partialorder %v471_v32, 0.0  ;;  %v5311_v61 = vsel %vm55_vm11, 0.0, %v7138_v12  ;;  %v5319_v42 = vadd.f32 %v517_v9, %v5288_v58  ;;  %v883_v59 = vadd.f32 %v5060_v38, %v5029_v44 }
 0x29d   :  { %554 = vmax.xlane.f32.xlu0 %v5232_v27  ;;  %552 = vmax.xlane.f32.xlu1 %v5241_v15  ;;  %v500_v27 = vmul.f32 0.2, %v468_v23  ;;  %7150 = vst [vmem:[#allocation57_spill] sm:$0xff] %v5311_v61  ;;  %v518_v24 = vsel %vm486_vm14, %v470_v28, %v502_v11  ;;  %vm897_vm1 = vcmp.gt.f32.partialorder %v881_v6, 0.0 }
 0x29e   :  { %v915_v11 = vmul.f32 0.2, %v883_v59  ;;  %vm899_vm3 = vcmp.gt.f32.partialorder %v883_v59, 0.0 }
 0x29f   :  { %v516_v46 = vsel %vm484_vm10, %v468_v23, %v500_v27  ;;  %v884_v27 = vadd.f32 %v5060_v38, %v5023_v39  ;;  %v1749_v39 = vsub.s32 3, %v5037_v31 }
 0x2a1   :  { %558 = vmax.xlane.f32.xlu0 %v5250_v55  ;;  %556 = vmax.xlane.f32.xlu1 %v5253_v41  ;;  %v927_v55 = vsel %vm895_vm6, %v879_v18, %v911_v22  ;;  %v5292_v18 = vsel %vm52_vm8, 0.0, %v7138_v12  ;;  %v882_v22 = vadd.f32 %v5060_v38, %v4993_v35  ;;  %v5314_v35 = vsel %vm54_vm12, 0.0, %v7138_v12 }
 0x2a2   :  { %7148 = vst [vmem:[#allocation55_spill] sm:$0xff] %v5292_v18  ;;  %v5298_v17 = vadd.f32 %v927_v55, %v5238_v25  ;;  %v5308_v55 = vrot.slane %v5050_v45, %v1312_v33  ;;  %7151 = vst [vmem:[#allocation58_spill] sm:$0xff] %v5314_v35  ;;  %v5322_v23 = vadd.f32 %v516_v46, %v5292_v18  ;;  %v913_v33 = vmul.f32 0.2, %v881_v6 }
 0x2a3   :  { %v914_v63 = vmul.f32 0.2, %v882_v22  ;;  %vm898_vm15 = vcmp.gt.f32.partialorder %v882_v22, 0.0  ;;  %v916_v12 = vmul.f32 0.2, %v884_v27  ;;  %v5333_v46 = vadd.f32 %v518_v24, %v5314_v35 }
 0x2a4   :  { %v1315_v44 = vadd.f32 %v5308_v55, %v4846_v49  ;;  %v929_v38 = vsel %vm897_vm1, %v881_v6, %v913_v33  ;;  %vm900_vm2 = vcmp.gt.f32.partialorder %v884_v27, 0.0  ;;  %v1316_v24 = vadd.f32 %v5308_v55, %v4896_v2 }
 0x2a5   :  { %967 = vmax.xlane.f32.xlu0 %v5268_v47  ;;  %965 = vmax.xlane.f32.xlu1 %v5271_v3  ;;  %v503_v47 = vmul.f32 0.2, %v471_v32  ;;  %v932_v49 = vsel %vm900_vm2, %v884_v27, %v916_v12 }
 0x2a6   :  { %v1347_v6 = vmul.f32 0.2, %v1315_v44  ;;  %vm1331_vm4 = vcmp.gt.f32.partialorder %v1315_v44, 0.0  ;;  %vm1332_vm7 = vcmp.gt.f32.partialorder %v1316_v24, 0.0 }
 0x2a7   :  { %v519_v7 = vsel %vm487_vm13, %v471_v32, %v503_v47  ;;  %v1314_v47 = vadd.f32 %v5308_v55, %v4859_v53  ;;  %v5342_v32 = vrot.slane %v5050_v45, %v1749_v39  ;;  %v931_v53 = vsel %vm899_vm3, %v883_v59, %v915_v11 }
 0x2a8   :  { %v5330_v9 = vadd.f32 %v519_v7, %v5311_v61  ;;  %v5357_v45 = vadd.f32 %v932_v49, %v5311_v61  ;;  %v1363_v27 = vsel %vm1331_vm4, %v1315_v44, %v1347_v6  ;;  %v1348_v39 = vmul.f32 0.2, %v1316_v24 }
 0x2a9   :  { %971 = vmax.xlane.f32.xlu0 %v5295_v16  ;;  %969 = vmax.xlane.f32.xlu1 %v5298_v17  ;;  %v930_v16 = vsel %vm898_vm15, %v882_v22, %v914_v63  ;;  %v5348_v22 = vadd.f32 %v929_v38, %v5292_v18  ;;  %v1317_v63 = vadd.f32 %v5308_v55, %v4872_v57  ;;  %v1346_v7 = vmul.f32 0.2, %v1314_v47 }
 0x2aa   :  { %v5345_v28 = vadd.f32 %v930_v16, %v5288_v58  ;;  %vm1330_vm5 = vcmp.gt.f32.partialorder %v1314_v47, 0.0  ;;  %v5360_v16 = vadd.f32 %v931_v53, %v5314_v35  ;;  %v1752_v57 = vadd.f32 %v5342_v32, %v4850_v51 }
 0x2ab   :  { %v1349_v33 = vmul.f32 0.2, %v1317_v63  ;;  %v1362_v59 = vsel %vm1330_vm5, %v1314_v47, %v1346_v7  ;;  %vm1333_vm6 = vcmp.gt.f32.partialorder %v1317_v63, 0.0  ;;  %v1751_v2 = vadd.f32 %v5342_v32, %v4862_v54 }
 0x2ac   :  { %v5369_v12 = vadd.f32 %v1363_v27, %v5066_v34  ;;  %v5372_v44 = vadd.f32 %v1362_v59, %v5077_v0  ;;  %vm1768_vm8 = vcmp.gt.f32.partialorder %v1752_v57, 0.0  ;;  %v1784_v51 = vmul.f32 0.2, %v1752_v57 }
 0x2ad   :  { %562 = vmax.xlane.f32.xlu0 %v5319_v42  ;;  %560 = vmax.xlane.f32.xlu1 %v5322_v23  ;;  %v1365_v38 = vsel %vm1333_vm6, %v1317_v63, %v1349_v33  ;;  %v1364_v11 = vsel %vm1332_vm7, %v1316_v24, %v1348_v39  ;;  %v1783_v47 = vmul.f32 0.2, %v1751_v2  ;;  %v1754_v49 = vadd.f32 %v5342_v32, %v4880_v60  ;;  %v7152_v33 = vld [vmem:[#allocation12_spill] sm:$0xff] }
 0x2ae   :  { %v1753_v54 = vadd.f32 %v5342_v32, %v4902_v5  ;;  %vm1767_vm9 = vcmp.gt.f32.partialorder %v1751_v2, 0.0  ;;  %v5381_v6 = vadd.f32 %v1365_v38, %v5085_v21  ;;  %v5384_v63 = vadd.f32 %v1364_v11, %v5097_v20 }
 0x2af   :  { %v1800_v53 = vsel %vm1768_vm8, %v1752_v57, %v1784_v51  ;;  %v1319_v7 = vadd.f32 %v5308_v55, %v4912_v10  ;;  %v1799_v24 = vsel %vm1767_vm9, %v1751_v2, %v1783_v47  ;;  %v1786_v60 = vmul.f32 0.2, %v1754_v49  ;;  %v7153_v51 = vld [vmem:[#allocation14_spill] sm:$0xff] }
 0x2b0   :  { %v1785_v27 = vmul.f32 0.2, %v1753_v54  ;;  %v1318_v5 = vadd.f32 %v5308_v55, %v4926_v13  ;;  %vm1770_vm10 = vcmp.gt.f32.partialorder %v1754_v49, 0.0  ;;  %vm1769_vm11 = vcmp.gt.f32.partialorder %v1753_v54, 0.0 }
 0x2b1   :  { %566 = vmax.xlane.f32.xlu0 %v5330_v9  ;;  %564 = vmax.xlane.f32.xlu1 %v5333_v46  ;;  %v1321_v59 = vadd.f32 %v5308_v55, %v7152_v33  ;;  %v5395_v57 = vadd.f32 %v1800_v53, %v5066_v34  ;;  %v5398_v10 = vadd.f32 %v1799_v24, %v5077_v0  ;;  %vm1335_vm12 = vcmp.gt.f32.partialorder %v1319_v7, 0.0 }
 0x2b2   :  { %v1351_v39 = vmul.f32 0.2, %v1319_v7  ;;  %v1802_v2 = vsel %vm1770_vm10, %v1754_v49, %v1786_v60  ;;  %v1801_v38 = vsel %vm1769_vm11, %v1753_v54, %v1785_v27  ;;  %v1350_v13 = vmul.f32 0.2, %v1318_v5  ;;  %v7154_v60 = vld [vmem:[#allocation10_spill] sm:$0xff] }
 0x2b3   :  { %v1320_v11 = vadd.f32 %v5308_v55, %v7153_v51  ;;  %vm1334_vm13 = vcmp.gt.f32.partialorder %v1318_v5, 0.0  ;;  %vm1337_vm14 = vcmp.gt.f32.partialorder %v1321_v59, 0.0  ;;  %v5405_v47 = vadd.f32 %v1802_v2, %v5085_v21  ;;  %v7155_v51 = vld [vmem:[#allocation11_spill] sm:$0xff] }
 0x2b4   :  { %v5408_v53 = vadd.f32 %v1801_v38, %v5097_v20  ;;  %v1367_v24 = vsel %vm1335_vm12, %v1319_v7, %v1351_v39  ;;  %v1353_v33 = vmul.f32 0.2, %v1321_v59  ;;  %v1366_v49 = vsel %vm1334_vm13, %v1318_v5, %v1350_v13  ;;  %v7158_v5 = vld [vmem:[#allocation13_spill] sm:$0xff]  ;;  %v7159_v20 = vld [vmem:[#allocation15_spill] sm:$0xff] }
 0x2b5   :  { %975 = vmax.xlane.f32.xlu0 %v5345_v28  ;;  %973 = vmax.xlane.f32.xlu1 %v5348_v22  ;;  %v1352_v54 = vmul.f32 0.2, %v1320_v11  ;;  %v1756_v27 = vadd.f32 %v5342_v32, %v7154_v60  ;;  %v1755_v0 = vadd.f32 %v5342_v32, %v7155_v51  ;;  %vm1336_vm15 = vcmp.gt.f32.partialorder %v1320_v11, 0.0 }
 0x2b6   :  { %v5417_v2 = vadd.f32 %v1367_v24, %v5140_v48  ;;  %v5420_v38 = vadd.f32 %v1366_v49, %v5147_v40  ;;  %v1369_v7 = vsel %vm1337_vm14, %v1321_v59, %v1353_v33  ;;  %v1758_v39 = vadd.f32 %v5342_v32, %v7158_v5  ;;  %v7160_v24 = vld [vmem:[#allocation17_spill] sm:$0xff] }
 0x2b7   :  { %v1368_v13 = vsel %vm1336_vm15, %v1320_v11, %v1352_v54  ;;  %v1788_v60 = vmul.f32 0.2, %v1756_v27  ;;  %v1787_v21 = vmul.f32 0.2, %v1755_v0  ;;  %v1757_v51 = vadd.f32 %v5342_v32, %v7159_v20  ;;  %v7161_v54 = vld [vmem:[#allocation19_spill] sm:$0xff] }
 0x2b8   :  { %7156 = vst [vmem:[#allocation12_spill] sm:$0xff] %v5417_v2  ;;  %7157 = vst [vmem:[#allocation14_spill] sm:$0xff] %v5420_v38  ;;  %vm1772_vm1 = vcmp.gt.f32.partialorder %v1756_v27, 0.0  ;;  %vm1771_vm2 = vcmp.gt.f32.partialorder %v1755_v0, 0.0  ;;  %v1323_v49 = vadd.f32 %v5308_v55, %v7160_v24  ;;  %v5431_v59 = vadd.f32 %v1369_v7, %v5162_v1 }
 0x2b9   :  { %979 = vmax.xlane.f32.xlu0 %v5357_v45  ;;  %977 = vmax.xlane.f32.xlu1 %v5360_v16  ;;  %v5434_v33 = vadd.f32 %v1368_v13, %v5165_v26  ;;  %v1790_v11 = vmul.f32 0.2, %v1758_v39  ;;  %v1322_v5 = vadd.f32 %v5308_v55, %v7161_v54  ;;  %v1804_v20 = vsel %vm1772_vm1, %v1756_v27, %v1788_v60 }
 0x2ba   :  { %v1803_v34 = vsel %vm1771_vm2, %v1755_v0, %v1787_v21  ;;  %vm1774_vm3 = vcmp.gt.f32.partialorder %v1758_v39, 0.0  ;;  %v1789_v31 = vmul.f32 0.2, %v1757_v51  ;;  %vm1773_vm4 = vcmp.gt.f32.partialorder %v1757_v51, 0.0  ;;  %v7163_v0 = vld [vmem:[#allocation22_spill] sm:$0xff] }
 0x2bb   :  { %v1355_v24 = vmul.f32 0.2, %v1323_v49  ;;  %v5441_v7 = vadd.f32 %v1804_v20, %v5140_v48  ;;  %v5444_v13 = vadd.f32 %v1803_v34, %v5147_v40  ;;  %vm1339_vm5 = vcmp.gt.f32.partialorder %v1323_v49, 0.0 }
 0x2bc   :  { %v1805_v27 = vsel %vm1773_vm4, %v1757_v51, %v1789_v31  ;;  %v1354_v21 = vmul.f32 0.2, %v1322_v5  ;;  %v1324_v60 = vadd.f32 %v5308_v55, %v7163_v0  ;;  %vm1338_vm6 = vcmp.gt.f32.partialorder %v1322_v5, 0.0  ;;  %v7166_v0 = vld [vmem:[#allocation20_spill] sm:$0xff] }
 0x2bd   :  { %1396 = vmax.xlane.f32.xlu0 %v5369_v12  ;;  %1394 = vmax.xlane.f32.xlu1 %v5372_v44  ;;  %v5456_v34 = vadd.f32 %v1805_v27, %v5165_v26  ;;  %v1759_v48 = vadd.f32 %v5342_v32, %v7166_v0  ;;  %v7170_v0 = vld [vmem:[#allocation23_spill] sm:$0xff] }
 0x2be   :  { %v1370_v51 = vsel %vm1338_vm6, %v1322_v5, %v1354_v21  ;;  %v1356_v40 = vmul.f32 0.2, %v1324_v60  ;;  %vm1340_vm8 = vcmp.gt.f32.partialorder %v1324_v60, 0.0  ;;  %vm2328_vm6 = vcmask 261120  }
 0x2bf   :  { %7164 = vst [vmem:[#allocation10_spill] sm:$0xff] %v5456_v34  ;;  %v1791_v26 = vmul.f32 0.2, %v1759_v48  ;;  %vm1775_vm10 = vcmp.gt.f32.partialorder %v1759_v48, 0.0 }
 0x2c0   :  { %v1372_v21 = vsel %vm1340_vm8, %v1324_v60, %v1356_v40  ;;  %vm2473_vm8 = vcmask 523264  }
 0x2c1   :  { %1400 = vmax.xlane.f32.xlu0 %v5381_v6  ;;  %1398 = vmax.xlane.f32.xlu1 %v5384_v63  ;;  %v1807_v60 = vsel %vm1775_vm10, %v1759_v48, %v1791_v26 }
 0x2c5   :  { %1833 = vmax.xlane.f32.xlu0 %v5395_v57  ;;  %1831 = vmax.xlane.f32.xlu1 %v5398_v10 }
 0x2c9   :  { %1837 = vmax.xlane.f32.xlu0 %v5405_v47  ;;  %1835 = vmax.xlane.f32.xlu1 %v5408_v53 }
 0x2cd   :  { %1404 = vmax.xlane.f32.xlu0 %v5417_v2  ;;  %1402 = vmax.xlane.f32.xlu1 %v5420_v38  ;;  %v1806_v2 = vsel %vm1774_vm3, %v1758_v39, %v1790_v11  ;;  %v7162_v38 = vld [vmem:[#allocation21_spill] sm:$0xff]  ;;  %v1371_v39 = vsel %vm1339_vm5, %v1323_v49, %v1355_v24  ;;  %v5468_v49 = vadd.f32 %v1370_v51, %v5220_v37 }
 0x2ce   :  { %v1325_v54 = vadd.f32 %v5308_v55, %v7162_v38  ;;  %v5453_v20 = vadd.f32 %v1806_v2, %v5162_v1  ;;  %v7165_v38 = vld [vmem:[#allocation18_spill] sm:$0xff]  ;;  %v5465_v2 = vadd.f32 %v1371_v39, %v5213_v43  ;;  %v1761_v1 = vadd.f32 %v5342_v32, %v7170_v0 }
 0x2cf   :  { %v1760_v31 = vadd.f32 %v5342_v32, %v7165_v38  ;;  %7168 = vst [vmem:[#allocation13_spill] sm:$0xff] %v5468_v49  ;;  %v7169_v38 = vld [vmem:[#allocation16_spill] sm:$0xff]  ;;  %v7173_v0 = vld [vmem:[#allocation26_spill] sm:$0xff] }
 0x2d0   :  { %v1357_v11 = vmul.f32 0.2, %v1325_v54  ;;  %vm1341_vm7 = vcmp.gt.f32.partialorder %v1325_v54, 0.0  ;;  %7167 = vst [vmem:[#allocation11_spill] sm:$0xff] %v5465_v2  ;;  %v1762_v5 = vadd.f32 %v5342_v32, %v7169_v38  ;;  %v7172_v38 = vld [vmem:[#allocation24_spill] sm:$0xff]  ;;  %vm1777_vm12 = vcmp.gt.f32.partialorder %v1761_v1, 0.0 }
 0x2d1   :  { %1408 = vmax.xlane.f32.xlu0 %v5431_v59  ;;  %1406 = vmax.xlane.f32.xlu1 %v5434_v33  ;;  %v1792_v27 = vmul.f32 0.2, %v1760_v31  ;;  %vm1776_vm9 = vcmp.gt.f32.partialorder %v1760_v31, 0.0  ;;  %v1327_v40 = vadd.f32 %v5308_v55, %v7172_v38  ;;  %v7176_v38 = vld [vmem:[#allocation28_spill] sm:$0xff] }
 0x2d2   :  { %v1373_v24 = vsel %vm1341_vm7, %v1325_v54, %v1357_v11  ;;  %v5480_v54 = vadd.f32 %v1372_v21, %v5238_v25  ;;  %v1794_v51 = vmul.f32 0.2, %v1762_v5  ;;  %vm1778_vm11 = vcmp.gt.f32.partialorder %v1762_v5, 0.0 }
 0x2d3   :  { %v5477_v39 = vadd.f32 %v1373_v24, %v5235_v30  ;;  %v1808_v11 = vsel %vm1776_vm9, %v1760_v31, %v1792_v27  ;;  %v5492_v31 = vadd.f32 %v1807_v60, %v5220_v37  ;;  %v1359_v21 = vmul.f32 0.2, %v1327_v40 }
 0x2d4   :  { %v5489_v24 = vadd.f32 %v1808_v11, %v5213_v43  ;;  %v1810_v27 = vsel %vm1778_vm11, %v1762_v5, %v1794_v51  ;;  %v1329_v48 = vadd.f32 %v5308_v55, %v7176_v38  ;;  %vm1343_vm13 = vcmp.gt.f32.partialorder %v1327_v40, 0.0  ;;  %v7180_v38 = vld [vmem:[#allocation25_spill] sm:$0xff] }
 0x2d5   :  { %1841 = vmax.xlane.f32.xlu0 %v5441_v7  ;;  %1839 = vmax.xlane.f32.xlu1 %v5444_v13  ;;  %7171 = vst [vmem:[#allocation15_spill] sm:$0xff] %v5477_v39  ;;  %7175 = vst [vmem:[#allocation19_spill] sm:$0xff] %v5492_v31  ;;  %v5501_v11 = vadd.f32 %v1810_v27, %v5235_v30  ;;  %v1375_v51 = vsel %vm1343_vm13, %v1327_v40, %v1359_v21  ;;  %v7185_v30 = vld [vmem:[#allocation30_spill] sm:$0xff]  ;;  %vm2345_vm7 = vcmask 392192  }
 0x2d6   :  { %7174 = vst [vmem:[#allocation17_spill] sm:$0xff] %v5489_v24  ;;  %v1361_v60 = vmul.f32 0.2, %v1329_v48  ;;  %vm1345_vm15 = vcmp.gt.f32.partialorder %v1329_v48, 0.0  ;;  %v5513_v27 = vadd.f32 %v1375_v51, %v5288_v58 }
 0x2d7   :  { %7178 = vst [vmem:[#allocation21_spill] sm:$0xff] %v5501_v11 }
 0x2d8   :  { %7182 = vst [vmem:[#allocation18_spill] sm:$0xff] %v5513_v27  ;;  %v1377_v21 = vsel %vm1345_vm15, %v1329_v48, %v1361_v60 }
 0x2d9   :  { %1845 = vmax.xlane.f32.xlu0 %v5453_v20  ;;  %1843 = vmax.xlane.f32.xlu1 %v5456_v34  ;;  %v1793_v34 = vmul.f32 0.2, %v1761_v1  ;;  %v5525_v51 = vadd.f32 %v1377_v21, %v5311_v61 }
 0x2db   :  { %v1809_v26 = vsel %vm1777_vm12, %v1761_v1, %v1793_v34  ;;  %v1764_v1 = vadd.f32 %v5342_v32, %v7180_v38  ;;  %7186 = vst [vmem:[#allocation16_spill] sm:$0xff] %v5525_v51 }
 0x2dc   :  { %v5504_v5 = vadd.f32 %v1809_v26, %v5238_v25 }
 0x2dd   :  { %1412 = vmax.xlane.f32.xlu0 %v5465_v2  ;;  %1410 = vmax.xlane.f32.xlu1 %v5468_v49  ;;  %v1326_v2 = vadd.f32 %v5308_v55, %v7173_v0  ;;  %v7177_v0 = vld [vmem:[#allocation29_spill] sm:$0xff]  ;;  %v1796_v26 = vmul.f32 0.2, %v1764_v1  ;;  %vm1780_vm2 = vcmp.gt.f32.partialorder %v1764_v1, 0.0 }
 0x2de   :  { %7179 = vst [vmem:[#allocation22_spill] sm:$0xff] %v5504_v5 }
 0x2df   :  { %v1358_v49 = vmul.f32 0.2, %v1326_v2  ;;  %vm1342_vm14 = vcmp.gt.f32.partialorder %v1326_v2, 0.0 }
 0x2e1   :  { %1416 = vmax.xlane.f32.xlu0 %v5477_v39  ;;  %1414 = vmax.xlane.f32.xlu1 %v5480_v54  ;;  %v1328_v39 = vadd.f32 %v5308_v55, %v7177_v0  ;;  %v1374_v34 = vsel %vm1342_vm14, %v1326_v2, %v1358_v49  ;;  %v7181_v55 = vld [vmem:[#allocation27_spill] sm:$0xff] }
 0x2e2   :  { %v1763_v0 = vadd.f32 %v5342_v32, %v7181_v55  ;;  %v5516_v40 = vadd.f32 %v1374_v34, %v5292_v18  ;;  %v7184_v49 = vld [vmem:[#allocation31_spill] sm:$0xff]  ;;  %v1765_v55 = vadd.f32 %v5342_v32, %v7185_v30 }
 0x2e3   :  { %v1360_v37 = vmul.f32 0.2, %v1328_v39  ;;  %vm1344_vm1 = vcmp.gt.f32.partialorder %v1328_v39, 0.0  ;;  %v1766_v25 = vadd.f32 %v5342_v32, %v7184_v49 }
 0x2e4   :  { %7183 = vst [vmem:[#allocation20_spill] sm:$0xff] %v5516_v40  ;;  %v1795_v2 = vmul.f32 0.2, %v1763_v0  ;;  %vm1779_vm3 = vcmp.gt.f32.partialorder %v1763_v0, 0.0  ;;  %v1797_v34 = vmul.f32 0.2, %v1765_v55 }
 0x2e5   :  { %1849 = vmax.xlane.f32.xlu0 %v5489_v24  ;;  %1847 = vmax.xlane.f32.xlu1 %v5492_v31  ;;  %v1376_v38 = vsel %vm1344_vm1, %v1328_v39, %v1360_v37  ;;  %v1812_v37 = vsel %vm1780_vm2, %v1764_v1, %v1796_v26  ;;  %v1798_v60 = vmul.f32 0.2, %v1766_v25  ;;  %vm1782_vm4 = vcmp.gt.f32.partialorder %v1766_v25, 0.0 }
 0x2e6   :  { %v5528_v48 = vadd.f32 %v1376_v38, %v5314_v35  ;;  %v1811_v39 = vsel %vm1779_vm3, %v1763_v0, %v1795_v2  ;;  %vm1781_vm5 = vcmp.gt.f32.partialorder %v1765_v55, 0.0  ;;  %v5533_v30 = vadd.f32 %v1812_v37, %v5288_v58 }
 0x2e7   :  { %v5536_v32 = vadd.f32 %v1811_v39, %v5292_v18  ;;  %v1814_v21 = vsel %vm1782_vm4, %v1766_v25, %v1798_v60  ;;  %v1813_v49 = vsel %vm1781_vm5, %v1765_v55, %v1797_v34 }
 0x2e8   :  { %7187 = vst [vmem:[#allocation23_spill] sm:$0xff] %v5528_v48  ;;  %7188 = vst [vmem:[#allocation24_spill] sm:$0xff] %v5533_v30  ;;  %v5541_v1 = vadd.f32 %v1814_v21, %v5311_v61  ;;  %v5544_v0 = vadd.f32 %v1813_v49, %v5314_v35  ;;  %v7192_v35 = vld [vmem:[#allocation7_spill] sm:$0xff] }
 0x2e9   :  { %1853 = vmax.xlane.f32.xlu0 %v5501_v11  ;;  %1851 = vmax.xlane.f32.xlu1 %v5504_v5  ;;  %7189 = vst [vmem:[#allocation26_spill] sm:$0xff] %v5536_v32  ;;  %v7211_v11 = vld [vmem:[#allocation8_spill] sm:$0xff] }
 0x2ea   :  { %7190 = vst [vmem:[#allocation28_spill] sm:$0xff] %v5541_v1  ;;  %7191 = vst [vmem:[#allocation29_spill] sm:$0xff] %v5544_v0 }
 0x2ed   :  { %1420 = vmax.xlane.f32.xlu0 %v5513_v27  ;;  %1418 = vmax.xlane.f32.xlu1 %v5516_v40 }
 0x2f1   :  { %1424 = vmax.xlane.f32.xlu0 %v5525_v51  ;;  %1422 = vmax.xlane.f32.xlu1 %v5528_v48 }
 0x2f5   :  { %1857 = vmax.xlane.f32.xlu0 %v5533_v30  ;;  %1855 = vmax.xlane.f32.xlu1 %v5536_v32 }
 0x2f9   :  { %1861 = vmax.xlane.f32.xlu0 %v5541_v1  ;;  %1859 = vmax.xlane.f32.xlu1 %v5544_v0 }
 0x306   :  { %v539_v26 = vpop.xlane.xlu0 %538  ;;  %v537_v38 = vpop.xlane.xlu1 %536 }
 0x307   :  { %v568_v2 = vsub.f32 %v5093_v52, %v537_v38 }
 0x309   :  { %v584_v25 = vmul.f32 1.442695, %v568_v2 }
 0x30a   :  { %v543_v55 = vpop.xlane.xlu0 %542  ;;  %v541_v37 = vpop.xlane.xlu1 %540 }
 0x30b   :  { %v570_v39 = vsub.f32 %v5107_v19, %v541_v37  ;;  %4128 = vpow2.f32 %v584_v25  ;;  %v569_v19 = vsub.f32 %v5090_v14, %v539_v26  ;;  %v7193_v26 = vld [vmem:[#allocation37_spill] sm:$0xff] }
 0x30d   :  { %v588_v60 = vmul.f32 1.442695, %v570_v39 }
 0x30e   :  { %v952_v34 = vpop.xlane.xlu0 %951  ;;  %v950_v21 = vpop.xlane.xlu1 %949 }
 0x30f   :  { %v981_v49 = vsub.f32 %v5125_v8, %v950_v21  ;;  %1129 = vrot.lane.b32.xlu0 %v7192_v35, %s4549_s0  ;;  %4130 = vpow2.f32 %v588_v60  ;;  %v586_v21 = vmul.f32 1.442695, %v569_v19 }
 0x311   :  { %v997_v18 = vmul.f32 1.442695, %v981_v49  ;;  %v571_v49 = vsub.f32 %v5104_v29, %v543_v55 }
 0x312   :  { %v956_v61 = vpop.xlane.xlu0 %955  ;;  %v954_v58 = vpop.xlane.xlu1 %953 }
 0x313   :  { %v983_v52 = vsub.f32 %v5150_v36, %v954_v58  ;;  %4132 = vpow2.f32 %v997_v18 }
 0x315   :  { %v1001_v38 = vmul.f32 1.442695, %v983_v52  ;;  %v982_v52 = vsub.f32 %v7193_v26, %v952_v34 }
 0x316   :  { %v547_v2 = vpop.xlane.xlu0 %546  ;;  %v545_v43 = vpop.xlane.xlu1 %544 }
 0x317   :  { %v572_v25 = vsub.f32 %v5168_v62, %v545_v43  ;;  %4134 = vpow2.f32 %v1001_v38  ;;  %v590_v43 = vmul.f32 1.442695, %v571_v49 }
 0x318   :  { %v5556_v37 = vpop.eup %4128 }
 0x319   :  { %v592_v8 = vmul.f32 1.442695, %v572_v25  ;;  %616 = vadd.xlane.f32.xlu1 %v5556_v37  ;;  %v999_v25 = vmul.f32 1.442695, %v982_v52 }
 0x31a   :  { %v551_v39 = vpop.xlane.xlu0 %550  ;;  %v549_v60 = vpop.xlane.xlu1 %548 }
 0x31b   :  { %v574_v36 = vsub.f32 %v5180_v4, %v549_v60  ;;  %4136 = vpow2.f32 %v592_v8  ;;  %v7194_v8 = vld [vmem:[#allocation39_spill] sm:$0xff] }
 0x31c   :  { %v5561_v58 = vpop.eup %4130  ;;  %4138 = vpow2.f32 %v586_v21  ;;  %v984_v60 = vsub.f32 %v7194_v8, %v956_v61 }
 0x31d   :  { %v596_v18 = vmul.f32 1.442695, %v574_v36  ;;  %620 = vadd.xlane.f32.xlu1 %v5561_v58 }
 0x31e   :  { %v960_v14 = vpop.xlane.xlu0 %959  ;;  %v958_v62 = vpop.xlane.xlu1 %957 }
 0x31f   :  { %v985_v38 = vsub.f32 %v5200_v50, %v958_v62  ;;  %4140 = vpow2.f32 %v596_v18  ;;  %v1003_v18 = vmul.f32 1.442695, %v984_v60  ;;  %v7195_v62 = vld [vmem:[#allocation41_spill] sm:$0xff] }
 0x320   :  { %v5566_v19 = vpop.eup %4132  ;;  %4142 = vpow2.f32 %v590_v43  ;;  %v573_v26 = vsub.f32 %v7195_v62, %v547_v2 }
 0x321   :  { %v1005_v29 = vmul.f32 1.442695, %v985_v38  ;;  %1029 = vadd.xlane.f32.xlu1 %v5566_v19 }
 0x322   :  { %v964_v4 = vpop.xlane.xlu0 %963  ;;  %v962_v55 = vpop.xlane.xlu1 %961 }
 0x323   :  { %v987_v36 = vsub.f32 %v5223_v56, %v962_v55  ;;  %4144 = vpow2.f32 %v1005_v29  ;;  %v594_v29 = vmul.f32 1.442695, %v573_v26  ;;  %v7196_v55 = vld [vmem:[#allocation44_spill] sm:$0xff] }
 0x324   :  { %v5571_v21 = vpop.eup %4134  ;;  %4146 = vpow2.f32 %v999_v25  ;;  %v575_v8 = vsub.f32 %v7196_v55, %v551_v39  ;;  %v7198_v55 = vld [vmem:[#allocation47_spill] sm:$0xff] }
 0x325   :  { %v1009_v34 = vmul.f32 1.442695, %v987_v36  ;;  %1033 = vadd.xlane.f32.xlu1 %v5571_v21 }
 0x326   :  { %v555_v50 = vpop.xlane.xlu0 %554  ;;  %v553_v49 = vpop.xlane.xlu1 %552 }
 0x327   :  { %v576_v38 = vsub.f32 %v5241_v15, %v553_v49  ;;  %4148 = vpow2.f32 %v1009_v34  ;;  %v598_v49 = vmul.f32 1.442695, %v575_v8  ;;  %v988_v8 = vsub.f32 %v7198_v55, %v964_v4 }
 0x328   :  { %v5576_v43 = vpop.eup %4136  ;;  %4150 = vpow2.f32 %v1003_v18  ;;  %v7197_v18 = vld [vmem:[#allocation45_spill] sm:$0xff] }
 0x329   :  { %v600_v61 = vmul.f32 1.442695, %v576_v38  ;;  %624 = vadd.xlane.f32.xlu1 %v5576_v43  ;;  %v5583_v60 = vpop.eup %4138  ;;  %v986_v62 = vsub.f32 %v7197_v18, %v960_v14 }
 0x32a   :  { %v5579_v56 = vpop.xlane.xlu0 %558  ;;  %v557_v52 = vpop.xlane.xlu1 %556 }
 0x32b   :  { %v578_v25 = vsub.f32 %v5253_v41, %v557_v52  ;;  %4152 = vpow2.f32 %v600_v61 }
 0x32c   :  { %v5585_v2 = vpop.eup %4140  ;;  %4154 = vpow2.f32 %v594_v29  ;;  %v1007_v29 = vmul.f32 1.442695, %v986_v62 }
 0x32d   :  { %v604_v15 = vmul.f32 1.442695, %v578_v25  ;;  %628 = vadd.xlane.f32.xlu1 %v5585_v2  ;;  %v5593_v41 = vpop.eup %4142 }
 0x32e   :  { %618 = vadd.xlane.f32.xlu0 %v5583_v60  ;;  %v5589_v36 = vpop.xlane.xlu0 %967  ;;  %v966_v34 = vpop.xlane.xlu1 %965 }
 0x32f   :  { %v989_v39 = vsub.f32 %v5271_v3, %v966_v34  ;;  %4156 = vpow2.f32 %v604_v15 }
 0x330   :  { %v5595_v26 = vpop.eup %4144  ;;  %4158 = vpow2.f32 %v598_v49  ;;  %v7200_v49 = vld [vmem:[#allocation49_spill] sm:$0xff] }
 0x331   :  { %v1013_v38 = vmul.f32 1.442695, %v989_v39  ;;  %1037 = vadd.xlane.f32.xlu1 %v5595_v26  ;;  %v5603_v3 = vpop.eup %4146  ;;  %v1011_v39 = vmul.f32 1.442695, %v988_v8  ;;  %v577_v62 = vsub.f32 %v7200_v49, %v555_v50 }
 0x332   :  { %622 = vadd.xlane.f32.xlu0 %v5593_v41  ;;  %v5599_v61 = vpop.xlane.xlu0 %971  ;;  %v970_v52 = vpop.xlane.xlu1 %969 }
 0x333   :  { %v991_v14 = vsub.f32 %v5298_v17, %v970_v52  ;;  %4160 = vpow2.f32 %v1013_v38  ;;  %v602_v1 = vmul.f32 1.442695, %v577_v62  ;;  %v7202_v62 = vld [vmem:[#allocation53_spill] sm:$0xff] }
 0x334   :  { %v5605_v25 = vpop.eup %4148  ;;  %4162 = vpow2.f32 %v1007_v29  ;;  %v7201_v29 = vld [vmem:[#allocation52_spill] sm:$0xff]  ;;  %v990_v0 = vsub.f32 %v7202_v62, %v5589_v36 }
 0x335   :  { %7199 = vst [vmem:[#allocation25_spill] sm:$0xff] %v5605_v25  ;;  %v1017_v15 = vmul.f32 1.442695, %v991_v14  ;;  %1041 = vadd.xlane.f32.xlu1 %v5605_v25  ;;  %v5611_v55 = vpop.eup %4150  ;;  %v579_v8 = vsub.f32 %v7201_v29, %v5579_v56 }
 0x336   :  { %1031 = vadd.xlane.f32.xlu0 %v5603_v3  ;;  %v563_v34 = vpop.xlane.xlu0 %562  ;;  %v561_v18 = vpop.xlane.xlu1 %560 }
 0x337   :  { %v580_v4 = vsub.f32 %v5322_v23, %v561_v18  ;;  %4164 = vpow2.f32 %v1017_v15 }
 0x338   :  { %v5613_v17 = vpop.eup %4152  ;;  %4166 = vpow2.f32 %v1011_v39  ;;  %v606_v39 = vmul.f32 1.442695, %v579_v8 }
 0x339   :  { %v608_v38 = vmul.f32 1.442695, %v580_v4  ;;  %632 = vadd.xlane.f32.xlu1 %v5613_v17  ;;  %v5620_v23 = vpop.eup %4154 }
 0x33a   :  { %1035 = vadd.xlane.f32.xlu0 %v5611_v55  ;;  %v567_v52 = vpop.xlane.xlu0 %566  ;;  %v565_v14 = vpop.xlane.xlu1 %564 }
 0x33b   :  { %v582_v50 = vsub.f32 %v5333_v46, %v565_v14  ;;  %4168 = vpow2.f32 %v608_v38 }
 0x33c   :  { %v5622_v15 = vpop.eup %4156  ;;  %4170 = vpow2.f32 %v602_v1  ;;  %v1015_v1 = vmul.f32 1.442695, %v990_v0 }
 0x33d   :  { %v612_v18 = vmul.f32 1.442695, %v582_v50  ;;  %636 = vadd.xlane.f32.xlu1 %v5622_v15  ;;  %v5629_v46 = vpop.eup %4158 }
 0x33e   :  { %626 = vadd.xlane.f32.xlu0 %v5620_v23  ;;  %v976_v49 = vpop.xlane.xlu0 %975  ;;  %v974_v4 = vpop.xlane.xlu1 %973 }
 0x33f   :  { %v993_v56 = vsub.f32 %v5348_v22, %v974_v4  ;;  %4172 = vpow2.f32 %v612_v18  ;;  %v7204_v22 = vld [vmem:[#allocation56_spill] sm:$0xff] }
 0x340   :  { %v5631_v38 = vpop.eup %4160  ;;  %4174 = vpow2.f32 %v606_v39  ;;  %v992_v36 = vsub.f32 %v7204_v22, %v5599_v61  ;;  %v581_v39 = vsub.f32 %v5319_v42, %v563_v34 }
 0x341   :  { %7203 = vst [vmem:[#allocation27_spill] sm:$0xff] %v5631_v38  ;;  %v1021_v14 = vmul.f32 1.442695, %v993_v56  ;;  %1045 = vadd.xlane.f32.xlu1 %v5631_v38  ;;  %v5636_v30 = vpop.eup %4162 }
 0x342   :  { %630 = vadd.xlane.f32.xlu0 %v5629_v46  ;;  %v980_v29 = vpop.xlane.xlu0 %979  ;;  %v978_v50 = vpop.xlane.xlu1 %977  ;;  %v610_v22 = vmul.f32 1.442695, %v581_v39 }
 0x343   :  { %v995_v8 = vsub.f32 %v5360_v16, %v978_v50  ;;  %4176 = vpow2.f32 %v1021_v14  ;;  %v1019_v16 = vmul.f32 1.442695, %v992_v36  ;;  %v996_v51 = vsub.f32 %v5357_v45, %v980_v29 }
 0x344   :  { %v5640_v18 = vpop.eup %4164  ;;  %4178 = vpow2.f32 %v1015_v1  ;;  %v583_v1 = vsub.f32 %v5330_v9, %v567_v52 }
 0x345   :  { %7205 = vst [vmem:[#allocation31_spill] sm:$0xff] %v5640_v18  ;;  %v1025_v4 = vmul.f32 1.442695, %v995_v8  ;;  %1049 = vadd.xlane.f32.xlu1 %v5640_v18  ;;  %v5648_v0 = vpop.eup %4166 }
 0x346   :  { %1039 = vadd.xlane.f32.xlu0 %v5636_v30  ;;  %v5644_v62 = vpop.xlane.xlu0 %1396  ;;  %v5646_v56 = vpop.xlane.xlu1 %1394  ;;  %v614_v36 = vmul.f32 1.442695, %v583_v1  ;;  %v1027_v1 = vmul.f32 1.442695, %v996_v51 }
 0x347   :  { %4180 = vpow2.f32 %v1025_v4  ;;  %v994_v4 = vsub.f32 %v5345_v28, %v976_v49 }
 0x348   :  { %v5651_v61 = vpop.eup %4168  ;;  %4182 = vpow2.f32 %v1019_v16 }
 0x349   :  { %640 = vadd.xlane.f32.xlu1 %v5651_v61  ;;  %v5657_v8 = vpop.eup %4170  ;;  %4184 = vpow2.f32 %v610_v22  ;;  %v1023_v39 = vmul.f32 1.442695, %v994_v4 }
 0x34a   :  { %1043 = vadd.xlane.f32.xlu0 %v5648_v0  ;;  %v5655_v14 = vpop.xlane.xlu0 %1400  ;;  %v1399_v50 = vpop.xlane.xlu1 %1398  ;;  %4186 = vpow2.f32 %v614_v36 }
 0x34b   :  { %4188 = vpow2.f32 %v1023_v39  ;;  %v1428_v38 = vsub.f32 %v5384_v63, %v1399_v50  ;;  %v1427_v63 = vsub.f32 %v5369_v12, %v5644_v62  ;;  %v1429_v50 = vsub.f32 %v5381_v6, %v5655_v14 }
 0x34c   :  { %v5660_v32 = vpop.eup %4172  ;;  %4190 = vpow2.f32 %v1027_v1 }
 0x34d   :  { %644 = vadd.xlane.f32.xlu1 %v5660_v32  ;;  %v5666_v34 = vpop.eup %4174 }
 0x34e   :  { %634 = vadd.xlane.f32.xlu0 %v5657_v8  ;;  %v5664_v42 = vpop.xlane.xlu0 %1833  ;;  %v5671_v16 = vpop.xlane.xlu1 %1831 }
 0x34f   :  { %v1864_v62 = vsub.f32 %v5395_v57, %v5664_v42  ;;  %v7225_v57 = vld [vmem:[#allocation3_spill] sm:$0xff] }
 0x350   :  { %v5669_v27 = vpop.eup %4176 }
 0x351   :  { %7206 = vst [vmem:[#allocation30_spill] sm:$0xff] %v5669_v27  ;;  %1053 = vadd.xlane.f32.xlu1 %v5669_v27  ;;  %v5677_v52 = vpop.eup %4178 }
 0x352   :  { %638 = vadd.xlane.f32.xlu0 %v5666_v34  ;;  %v5675_v9 = vpop.xlane.xlu0 %1837  ;;  %v5686_v49 = vpop.xlane.xlu1 %1835 }
 0x353   :  { %v1865_v6 = vsub.f32 %v5408_v53, %v5686_v49 }
 0x354   :  { %v5680_v22 = vpop.eup %4180 }
 0x355   :  { %7207 = vst [vmem:[#allocation37_spill] sm:$0xff] %v5680_v22  ;;  %1057 = vadd.xlane.f32.xlu1 %v5680_v22  ;;  %v5688_v48 = vpop.eup %4182 }
 0x356   :  { %1047 = vadd.xlane.f32.xlu0 %v5677_v52  ;;  %v5684_v28 = vpop.xlane.xlu0 %1404  ;;  %7208 = vst [vmem:[#allocation39_spill] sm:$0xff] %v5688_v48  ;;  %v5693_v45 = vpop.eup %4184 }
 0x357   :  { %v5695_v29 = vpop.xlane.xlu1 %1402  ;;  %v5700_v40 = vpop.eup %4186 }
 0x358   :  { %v5707_v35 = vpop.eup %4188 }
 0x359   :  { %7209 = vst [vmem:[#allocation41_spill] sm:$0xff] %v5707_v35  ;;  %v5714_v5 = vpop.eup %4190 }
 0x35a   :  { %1051 = vadd.xlane.f32.xlu0 %v5688_v48  ;;  %v5691_v36 = vpop.xlane.xlu0 %1408  ;;  %7212 = vst [vmem:[#allocation45_spill] sm:$0xff] %v5714_v5 }
 0x35b   :  { %v5705_v39 = vpop.xlane.xlu1 %1406 }
 0x35e   :  { %642 = vadd.xlane.f32.xlu0 %v5693_v45  ;;  %v5698_v4 = vpop.xlane.xlu0 %1841 }
 0x35f   :  { %v5716_v24 = vpop.xlane.xlu1 %1839 }
 0x362   :  { %646 = vadd.xlane.f32.xlu0 %v5700_v40  ;;  %v5703_v51 = vpop.xlane.xlu0 %1845 }
 0x363   :  { %v5723_v27 = vpop.xlane.xlu1 %1843 }
 0x366   :  { %1055 = vadd.xlane.f32.xlu0 %v5707_v35  ;;  %v5710_v1 = vpop.xlane.xlu0 %1412  ;;  %1127 = vrot.lane.b32.xlu1 %v7211_v11, %s4549_s0 }
 0x367   :  { %7210 = vst [vmem:[#allocation44_spill] sm:$0xff] %v5710_v1  ;;  %v1426_v1 = vsub.f32 %v5372_v44, %v5646_v56  ;;  %v5729_v35 = vpop.xlane.xlu1 %1410 }
 0x369   :  { %v1442_v48 = vmul.f32 1.442695, %v1426_v1 }
 0x36a   :  { %1059 = vadd.xlane.f32.xlu0 %v5714_v5  ;;  %v5719_v31 = vpop.xlane.xlu0 %1416 }
 0x36b   :  { %7213 = vst [vmem:[#allocation47_spill] sm:$0xff] %v5719_v31  ;;  %v5736_v5 = vpop.xlane.xlu1 %1414  ;;  %4192 = vpow2.f32 %v1442_v48 }
 0x36e   :  { %v5721_v22 = vpop.xlane.xlu0 %1849 }
 0x36f   :  { %7214 = vst [vmem:[#allocation49_spill] sm:$0xff] %v5721_v22  ;;  %v1446_v22 = vmul.f32 1.442695, %v1428_v38  ;;  %v5742_v44 = vpop.xlane.xlu1 %1847  ;;  %v1444_v38 = vmul.f32 1.442695, %v1427_v63 }
 0x371   :  { %4194 = vpow2.f32 %v1446_v22 }
 0x372   :  { %v5725_v18 = vpop.xlane.xlu0 %1853  ;;  %4196 = vpow2.f32 %v1444_v38  ;;  %v1866_v38 = vsub.f32 %v5405_v47, %v5675_v9  ;;  %v7228_v9 = vld [vmem:[#allocation2_spill] sm:$0xff] }
 0x373   :  { %7215 = vst [vmem:[#allocation52_spill] sm:$0xff] %v5725_v18  ;;  %v7219_v18 = vld [vmem:[#allocation9_spill] sm:$0xff]  ;;  %v5746_v1 = vpop.xlane.xlu1 %1851 }
 0x374   :  { %v1885_v42 = vmul.f32 1.442695, %v1866_v38 }
 0x376   :  { %v5731_v11 = vpop.xlane.xlu0 %1420 }
 0x377   :  { %7216 = vst [vmem:[#allocation53_spill] sm:$0xff] %v5731_v11  ;;  %v5755_v22 = vpop.xlane.xlu1 %1418 }
 0x378   :  { %v5750_v48 = vpop.eup %4192 }
 0x37a   :  { %v5734_v25 = vpop.xlane.xlu0 %1424 }
 0x37b   :  { %7217 = vst [vmem:[#allocation56_spill] sm:$0xff] %v5734_v25  ;;  %v5762_v12 = vpop.xlane.xlu1 %1422 }
 0x37c   :  { %7222 = vst [vmem:[#allocation62_spill] sm:$0xff] %v5762_v12 }
 0x37e   :  { %v5738_v31 = vpop.xlane.xlu0 %1857 }
 0x37f   :  { %7218 = vst [vmem:[#allocation59_spill] sm:$0xff] %v5738_v31  ;;  %v1881_v31 = vmul.f32 1.442695, %v1864_v62  ;;  %v5768_v14 = vpop.xlane.xlu1 %1855 }
 0x380   :  { %1125 = vrot.lane.b32.xlu0 %v7219_v18, %s4549_s0  ;;  %v5757_v18 = vpop.eup %4194  ;;  %7223 = vst [vmem:[#allocation63_spill] sm:$0xff] %v5768_v14 }
 0x381   :  { %7221 = vst [vmem:[#allocation61_spill] sm:$0xff] %v5757_v18 }
 0x382   :  { %v5744_v56 = vpop.xlane.xlu0 %1861 }
 0x383   :  { %7220 = vst [vmem:[#allocation60_spill] sm:$0xff] %v5744_v56  ;;  %v1448_v56 = vmul.f32 1.442695, %v1429_v50  ;;  %v1883_v50 = vmul.f32 1.442695, %v1865_v6 }
 0x385   :  { %4198 = vpow2.f32 %v1448_v56 }
 0x386   :  { %v1130_v11 = vpop.permute.xlu0 %1129 }
 0x387   :  { %3882 = vmatprep.subr.bf16.mxu0 %v1130_v11 }
 0x388   :  { %3883 = vmatpush3.bf16.msra.mxu0 %v1130_v11  ;;  %v1863_v11 = vsub.f32 %v5398_v10, %v5671_v16  ;;  %v5772_v10 = vpop.eup %4196  ;;  %v5774_v16 = vpop.xlane.xlu1 %1859 }
 0x389   :  { %7224 = vst [vmem:[#allocation64_spill] sm:$0xff] %v5774_v16 }
 0x38a   :  { %1474 = vadd.xlane.f32.xlu1 %v5750_v48  ;;  %v1879_v63 = vmul.f32 1.442695, %v1863_v11 }
 0x38c   :  { %4200 = vpow2.f32 %v1879_v63 }
 0x38d   :  { %4202 = vpow2.f32 %v1881_v31 }
 0x38e   :  { %1478 = vadd.xlane.f32.xlu1 %v5757_v18  ;;  %4204 = vpow2.f32 %v1883_v50 }
 0x38f   :  { %4206 = vpow2.f32 %v1885_v42 }
 0x392   :  { %v5779_v53 = vpop.eup %4198 }
 0x393   :  { %7226 = vst [vmem:[#allocation3_spill] sm:$0xff] %v5779_v53 }
 0x399   :  { %v5784_v47 = vpop.eup %4200 }
 0x39a   :  { %7227 = vst [vmem:[#allocation65_spill] sm:$0xff] %v5784_v47  ;;  %v5789_v56 = vpop.eup %4202 }
 0x39b   :  { %7229 = vst [vmem:[#allocation2_spill] sm:$0xff] %v5789_v56  ;;  %v5792_v62 = vpop.eup %4204 }
 0x39c   :  { %7230 = vst [vmem:[#allocation66_spill] sm:$0xff] %v5792_v62  ;;  %v5797_v6 = vpop.eup %4206 }
 0x39d   :  { %7231 = vst [vmem:[#allocation67_spill] sm:$0xff] %v5797_v6 }
 0x39f   :  { %1476 = vadd.xlane.f32.xlu0 %v5772_v10  ;;  %1576 = vrot.lane.b32.xlu1 %v7225_v57, %s4551_s1 }
 0x3a2   :  { %v617_v49 = vpop.xlane.xlu1 %616 }
 0x3a3   :  { %1480 = vadd.xlane.f32.xlu0 %v5779_v53  ;;  %2013 = vrot.lane.b32.xlu1 %v7225_v57, %s4552_s15  ;;  %v648_v50 = vmax.f32 %v617_v49, 1e-30  ;;  %v7232_v57 = vld [vmem:[#allocation14_spill] sm:$0xff] }
 0x3a4   :  { %v1430_v42 = vsub.f32 %v7232_v57, %v5695_v29  ;;  %v1433_v29 = vsub.f32 %v5431_v59, %v5691_v36 }
 0x3a5   :  { %4208 = vrcp.f32 %v648_v50 }
 0x3a6   :  { %v621_v31 = vpop.xlane.xlu1 %620  ;;  %v1450_v25 = vmul.f32 1.442695, %v1430_v42  ;;  %v1456_v57 = vmul.f32 1.442695, %v1433_v29 }
 0x3a7   :  { %1911 = vadd.xlane.f32.xlu0 %v5784_v47  ;;  %2011 = vrot.lane.b32.xlu1 %v7228_v9, %s4552_s15  ;;  %v650_v14 = vmax.f32 %v621_v31, 1e-30 }
 0x3aa   :  { %v1030_v11 = vpop.xlane.xlu1 %1029 }
 0x3ab   :  { %1913 = vadd.xlane.f32.xlu0 %v5789_v56  ;;  %v1432_v56 = vsub.f32 %v5434_v33, %v5705_v39 }
 0x3ad   :  { %v1454_v49 = vmul.f32 1.442695, %v1432_v56 }
 0x3ae   :  { %v5794_v63 = vpop.xlane.xlu1 %1033 }
 0x3af   :  { %1915 = vadd.xlane.f32.xlu0 %v5792_v62 }
 0x3b2   :  { %v625_v38 = vpop.xlane.xlu1 %624 }
 0x3b3   :  { %1917 = vadd.xlane.f32.xlu0 %v5797_v6  ;;  %v1061_v6 = vmax.f32 %v1030_v11, 1e-30 }
 0x3b6   :  { %v629_v18 = vpop.xlane.xlu1 %628 }
 0x3b7   :  { %v619_v53 = vpop.xlane.xlu0 %618 }
 0x3b8   :  { %v649_v16 = vmax.f32 %v619_v53, 1e-30 }
 0x3ba   :  { %4210 = vrcp.f32 %v649_v16  ;;  %v5804_v62 = vpop.xlane.xlu1 %1037  ;;  %v652_v16 = vmax.f32 %v625_v38, 1e-30 }
 0x3bb   :  { %v623_v47 = vpop.xlane.xlu0 %622  ;;  %4212 = vrcp.f32 %v650_v14  ;;  %v4209_v14 = vpop.eup %4208 }
 0x3bc   :  { %v651_v12 = vmax.f32 %v623_v47, 1e-30  ;;  %4214 = vpow2.f32 %v1450_v25  ;;  %v680_v56 = vmul.f32 %v4209_v14, %v5556_v37 }
 0x3be   :  { %4216 = vrcp.f32 %v651_v12  ;;  %v5808_v53 = vpop.xlane.xlu1 %1041  ;;  %v654_v12 = vmax.f32 %v629_v18, 1e-30 }
 0x3bf   :  { %v1032_v31 = vpop.xlane.xlu0 %1031  ;;  %4218 = vrcp.f32 %v1061_v6 }
 0x3c0   :  { %v1062_v50 = vmax.f32 %v1032_v31, 1e-30  ;;  %4220 = vpow2.f32 %v1454_v49 }
 0x3c2   :  { %4222 = vrcp.f32 %v1062_v50  ;;  %v633_v33 = vpop.xlane.xlu1 %632 }
 0x3c3   :  { %v5810_v39 = vpop.xlane.xlu0 %1035  ;;  %4224 = vpow2.f32 %v1456_v57 }
 0x3c4   :  { %4226 = vrcp.f32 %v652_v16 }
 0x3c6   :  { %v5812_v25 = vpop.xlane.xlu1 %636 }
 0x3c7   :  { %v627_v47 = vpop.xlane.xlu0 %626  ;;  %v4211_v59 = vpop.eup %4210 }
 0x3c8   :  { %v653_v36 = vmax.f32 %v627_v47, 1e-30  ;;  %v681_v11 = vmul.f32 %v4211_v59, %v5583_v60  ;;  %v4213_v6 = vpop.eup %4212 }
 0x3c9   :  { %1574 = vrot.lane.b32.xlu0 %v7228_v9, %s4551_s1  ;;  %v5818_v42 = vpop.eup %4214  ;;  %v682_v18 = vmul.f32 %v4213_v6, %v5561_v58  ;;  %v7233_v58 = vld [vmem:[#allocation12_spill] sm:$0xff] }
 0x3ca   :  { %4228 = vrcp.f32 %v653_v36  ;;  %v5820_v38 = vpop.xlane.xlu1 %1045  ;;  %v696_v49 = vpack.c.bf16 %v681_v11, %v680_v56 }
 0x3cb   :  { %v631_v29 = vpop.xlane.xlu0 %630  ;;  %v4217_v31 = vpop.eup %4216  ;;  %1482 = vadd.xlane.f32.xlu1 %v5818_v42  ;;  %4230 = vrcp.f32 %v654_v12 }
 0x3cc   :  { %v655_v50 = vmax.f32 %v631_v29, 1e-30  ;;  %3856 = vmatprep.mubr.bf16.mxu1 %v696_v49  ;;  %v683_v37 = vmul.f32 %v4217_v31, %v5593_v41  ;;  %v4219_v9 = vpop.eup %4218  ;;  %v1431_v41 = vsub.f32 %v7233_v58, %v5684_v28  ;;  %v656_v29 = vmax.f32 %v633_v33, 1e-30 }
 0x3cd   :  { %v5825_v60 = vpop.eup %4220  ;;  %v1093_v59 = vmul.f32 %v4219_v9, %v5566_v19  ;;  %v1867_v19 = vsub.f32 %v5444_v13, %v5716_v24  ;;  %v1868_v33 = vsub.f32 %v5441_v7, %v5698_v4  ;;  %v1870_v13 = vsub.f32 %v5453_v20, %v5703_v51 }
 0x3ce   :  { %4232 = vrcp.f32 %v655_v50  ;;  %v5827_v57 = vpop.xlane.xlu1 %1049  ;;  %v697_v14 = vpack.c.bf16 %v683_v37, %v682_v18  ;;  %v1452_v31 = vmul.f32 1.442695, %v1431_v41  ;;  %v658_v37 = vmax.f32 %v5812_v25, 1e-30  ;;  %v7234_v25 = vld [vmem:[#allocation10_spill] sm:$0xff] }
 0x3cf   :  { %v5829_v16 = vpop.xlane.xlu0 %1039  ;;  %v4223_v47 = vpop.eup %4222  ;;  %1486 = vadd.xlane.f32.xlu1 %v5825_v60  ;;  %4234 = vrcp.f32 %v656_v29  ;;  %v1889_v4 = vmul.f32 1.442695, %v1868_v33  ;;  %v1893_v29 = vmul.f32 1.442695, %v1870_v13 }
 0x3d0   :  { %3857 = vmatmul.mubr.bf16.vlgmr.msra.gmra.mxu1 %v697_v14  ;;  %v1094_v36 = vmul.f32 %v4223_v47, %v5603_v3  ;;  %v5836_v12 = vpop.eup %4224  ;;  %4236 = vpow2.f32 %v1452_v31 }
 0x3d1   :  { %v4227_v49 = vpop.eup %4226 }
 0x3d2   :  { %v641_v56 = vpop.xlane.xlu1 %640  ;;  %v1109_v6 = vpack.c.bf16 %v1094_v36, %v1093_v59  ;;  %v684_v9 = vmul.f32 %v4227_v49, %v5576_v43  ;;  %v1887_v59 = vmul.f32 1.442695, %v1867_v19  ;;  %v1869_v43 = vsub.f32 %v7234_v25, %v5723_v27 }
 0x3d3   :  { %v5838_v11 = vpop.xlane.xlu0 %1043  ;;  %1488 = vadd.xlane.f32.xlu1 %v5836_v12  ;;  %v1063_v19 = vmax.f32 %v5794_v63, 1e-30  ;;  %v1064_v27 = vmax.f32 %v5810_v39, 1e-30  ;;  %v1067_v25 = vmax.f32 %v5808_v53, 1e-30 }
 0x3d4   :  { %3888 = vmatprep.mubr.bf16.mxu0 %v1109_v6  ;;  %v1891_v31 = vmul.f32 1.442695, %v1869_v43 }
 0x3d6   :  { %v5843_v50 = vpop.xlane.xlu1 %644 }
 0x3d7   :  { %v635_v3 = vpop.xlane.xlu0 %634  ;;  %v4229_v18 = vpop.eup %4228 }
 0x3d8   :  { %v657_v28 = vmax.f32 %v635_v3, 1e-30  ;;  %v685_v14 = vmul.f32 %v4229_v18, %v5620_v23  ;;  %v4231_v47 = vpop.eup %4230  ;;  %v660_v18 = vmax.f32 %v641_v56, 1e-30 }
 0x3d9   :  { %v686_v23 = vmul.f32 %v4231_v47, %v5585_v2  ;;  %v1066_v2 = vmax.f32 %v5829_v16, 1e-30  ;;  %v662_v16 = vmax.f32 %v5843_v50, 1e-30 }
 0x3da   :  { %4238 = vrcp.f32 %v657_v28  ;;  %v5852_v24 = vpop.xlane.xlu1 %1053  ;;  %v698_v58 = vpack.c.bf16 %v685_v14, %v684_v9  ;;  %v1065_v28 = vmax.f32 %v5804_v62, 1e-30  ;;  %v1068_v62 = vmax.f32 %v5838_v11, 1e-30 }
 0x3db   :  { %v639_v36 = vpop.xlane.xlu0 %638  ;;  %v4233_v41 = vpop.eup %4232  ;;  %4240 = vrcp.f32 %v658_v37  ;;  %v7235_v37 = vld [vmem:[#allocation4_spill] sm:$0xff]  ;;  %v1069_v11 = vmax.f32 %v5820_v38, 1e-30 }
 0x3dc   :  { %v659_v6 = vmax.f32 %v639_v36, 1e-30  ;;  %3860 = vmatprep.mubr.bf16.mxu1 %v698_v58  ;;  %v687_v7 = vmul.f32 %v4233_v41, %v5629_v46  ;;  %4242 = vpow2.f32 %v1887_v59  ;;  %v4235_v63 = vpop.eup %4234 }
 0x3dd   :  { %v5866_v9 = vpop.eup %4236  ;;  %v688_v56 = vmul.f32 %v4235_v63, %v5613_v17  ;;  %v7236_v17 = vld [vmem:[#allocation5_spill] sm:$0xff] }
 0x3de   :  { %4244 = vrcp.f32 %v659_v6  ;;  %v5858_v20 = vpop.xlane.xlu1 %1057  ;;  %v699_v49 = vpack.c.bf16 %v687_v7, %v686_v23 }
 0x3df   :  { %v1048_v51 = vpop.xlane.xlu0 %1047  ;;  %4246 = vpow2.f32 %v1889_v4 }
 0x3e0   :  { %3861 = vmatmul.mubr.bf16.gmra.mxu1 %v699_v49  ;;  %4248 = vpow2.f32 %v1893_v29  ;;  %v1070_v36 = vmax.f32 %v1048_v51, 1e-30 }
 0x3e1   :  { %4250 = vpow2.f32 %v1891_v31 }
 0x3e2   :  { %v1128_v3 = vpop.permute.xlu1 %1127  ;;  %4252 = vrcp.f32 %v1063_v19  ;;  %v1071_v19 = vmax.f32 %v5827_v57, 1e-30 }
 0x3e3   :  { %v1052_v46 = vpop.xlane.xlu0 %1051  ;;  %3884 = vmatprep.subr.bf16.mxu0 %v1128_v3  ;;  %4254 = vrcp.f32 %v1064_v27 }
 0x3e4   :  { %1572 = vrot.lane.b32.xlu1 %v7235_v37, %s4551_s1  ;;  %3885 = vmatpush3.bf16.msra.mxu0 %v1128_v3  ;;  %4256 = vrcp.f32 %v1066_v2  ;;  %v1072_v51 = vmax.f32 %v1052_v46, 1e-30  ;;  %v1073_v2 = vmax.f32 %v5852_v24, 1e-30 }
 0x3e5   :  { %4258 = vrcp.f32 %v660_v18 }
 0x3e6   :  { %4260 = vrcp.f32 %v1065_v28 }
 0x3e7   :  { %v643_v39 = vpop.xlane.xlu0 %642  ;;  %v4239_v14 = vpop.eup %4238 }
 0x3e8   :  { %v661_v47 = vmax.f32 %v643_v39, 1e-30  ;;  %1484 = vadd.xlane.f32.xlu0 %v5866_v9  ;;  %2009 = vrot.lane.b32.xlu1 %v7235_v37, %s4552_s15  ;;  %v689_v33 = vmul.f32 %v4239_v14, %v5657_v8  ;;  %v4241_v59 = vpop.eup %4240 }
 0x3e9   :  { %v5875_v13 = vpop.eup %4242  ;;  %v690_v8 = vmul.f32 %v4241_v59, %v5622_v15 }
 0x3ea   :  { %4262 = vrcp.f32 %v661_v47  ;;  %v700_v50 = vpack.c.bf16 %v689_v33, %v688_v56  ;;  %v7237_v56 = vld [vmem:[#allocation13_spill] sm:$0xff] }
 0x3eb   :  { %v647_v58 = vpop.xlane.xlu0 %646  ;;  %v4245_v41 = vpop.eup %4244  ;;  %4264 = vrcp.f32 %v662_v16  ;;  %v1434_v33 = vsub.f32 %v7237_v56, %v5729_v35  ;;  %v1436_v35 = vsub.f32 %v5480_v54, %v5736_v5  ;;  %v7242_v5 = vld [vmem:[#allocation39_spill] sm:$0xff] }
 0x3ec   :  { %v663_v43 = vmax.f32 %v647_v58, 1e-30  ;;  %1919 = vadd.xlane.f32.xlu0 %v5875_v13  ;;  %4266 = vrcp.f32 %v1068_v62  ;;  %2007 = vrot.lane.b32.xlu1 %v7236_v17, %s4552_s15  ;;  %v691_v6 = vmul.f32 %v4245_v41, %v5666_v34  ;;  %v5884_v23 = vpop.eup %4246  ;;  %v7249_v56 = vld [vmem:[#allocation11_spill] sm:$0xff] }
 0x3ed   :  { %3864 = vmatprep.mubr.bf16.mxu1 %v700_v50  ;;  %v5886_v4 = vpop.eup %4248 }
 0x3ee   :  { %4268 = vrcp.f32 %v663_v43  ;;  %v701_v7 = vpack.c.bf16 %v691_v6, %v690_v8  ;;  %v5889_v38 = vpop.eup %4250 }
 0x3ef   :  { %4270 = vrcp.f32 %v1070_v36  ;;  %v1056_v53 = vpop.xlane.xlu0 %1055  ;;  %v4253_v29 = vpop.eup %4252 }
 0x3f0   :  { %4272 = vrcp.f32 %v1067_v25  ;;  %1921 = vadd.xlane.f32.xlu0 %v5884_v23  ;;  %3865 = vmatmul.mubr.bf16.gmra.mxu1 %v701_v7  ;;  %v4255_v15 = vpop.eup %4254  ;;  %v1074_v49 = vmax.f32 %v1056_v53, 1e-30  ;;  %v1095_v39 = vmul.f32 %v4253_v29, %v5571_v21  ;;  %v1458_v25 = vmul.f32 1.442695, %v1434_v33  ;;  %v7240_v53 = vld [vmem:[#allocation47_spill] sm:$0xff] }
 0x3f1   :  { %4274 = vrcp.f32 %v1069_v11  ;;  %v4257_v31 = vpop.eup %4256  ;;  %v1096_v18 = vmul.f32 %v4255_v15, %v5611_v55  ;;  %v7241_v7 = vld [vmem:[#allocation15_spill] sm:$0xff] }
 0x3f2   :  { %v4259_v27 = vpop.eup %4258  ;;  %4276 = vrcp.f32 %v1072_v51  ;;  %v1098_v46 = vmul.f32 %v4257_v31, %v5636_v30  ;;  %v1437_v29 = vsub.f32 %v7241_v7, %v7240_v53  ;;  %v1462_v51 = vmul.f32 1.442695, %v1436_v35  ;;  %v7243_v31 = vld [vmem:[#allocation41_spill] sm:$0xff]  ;;  %v7253_v35 = vld [vmem:[#allocation22_spill] sm:$0xff] }
 0x3f3   :  { %v1060_v34 = vpop.xlane.xlu0 %1059  ;;  %v4261_v3 = vpop.eup %4260  ;;  %4278 = vrcp.f32 %v1074_v49  ;;  %v692_v57 = vmul.f32 %v4259_v27, %v5651_v61  ;;  %v1110_v62 = vpack.c.bf16 %v1096_v18, %v1095_v39  ;;  %v1075_v61 = vmax.f32 %v5858_v20, 1e-30  ;;  %v7238_v20 = vld [vmem:[#allocation25_spill] sm:$0xff]  ;;  %v7244_v27 = vld [vmem:[#allocation31_spill] sm:$0xff] }
 0x3f4   :  { %1923 = vadd.xlane.f32.xlu0 %v5889_v38  ;;  %4280 = vrcp.f32 %v1071_v19  ;;  %v1097_v55 = vmul.f32 %v4261_v3, %v5595_v26  ;;  %v1076_v16 = vmax.f32 %v1060_v34, 1e-30  ;;  %v1464_v34 = vmul.f32 1.442695, %v1437_v29  ;;  %v7245_v3 = vld [vmem:[#allocation30_spill] sm:$0xff] }
 0x3f5   :  { %4282 = vrcp.f32 %v1073_v2  ;;  %v7256_v29 = vld [vmem:[#allocation6_spill] sm:$0xff] }
 0x3f6   :  { %v1111_v59 = vpack.c.bf16 %v1098_v46, %v1097_v55  ;;  %4284 = vrcp.f32 %v1076_v16  ;;  %v7247_v55 = vld [vmem:[#allocation37_spill] sm:$0xff] }
 0x3f7   :  { %v4263_v28 = vpop.eup %4262  ;;  %v1126_v37 = vpop.permute.xlu0 %1125  ;;  %4286 = vrcp.f32 %v1075_v61  ;;  %v7250_v61 = vld [vmem:[#allocation19_spill] sm:$0xff] }
 0x3f8   :  { %1925 = vadd.xlane.f32.xlu0 %v5886_v4  ;;  %3886 = vmatprep.subr.bf16.mxu0 %v1126_v37  ;;  %v693_v63 = vmul.f32 %v4263_v28, %v5693_v45  ;;  %v4265_v24 = vpop.eup %4264  ;;  %4288 = vpow2.f32 %v1458_v25 }
 0x3f9   :  { %3887 = vmatpush3.bf16.msra.mxu0 %v1126_v37  ;;  %v4267_v14 = vpop.eup %4266  ;;  %v694_v21 = vmul.f32 %v4265_v24, %v5660_v32  ;;  %v7239_v32 = vld [vmem:[#allocation27_spill] sm:$0xff]  ;;  %4290 = vpow2.f32 %v1462_v51 }
 0x3fa   :  { %v702_v47 = vpack.c.bf16 %v693_v63, %v692_v57  ;;  %v1100_v41 = vmul.f32 %v4267_v14, %v5648_v0  ;;  %4292 = vpow2.f32 %v1464_v34  ;;  %v7246_v63 = vld [vmem:[#allocation45_spill] sm:$0xff] }
 0x3fb   :  { %v4269_v30 = vpop.eup %4268 }
 0x3fc   :  { %v4271_v36 = vpop.eup %4270  ;;  %3868 = vmatprep.mubr.bf16.mxu1 %v702_v47  ;;  %3889 = vmatmul.mubr.bf16.vlgmr.msra.gmra.mxu0 %v1110_v62  ;;  %v695_v45 = vmul.f32 %v4269_v30, %v5700_v40  ;;  %v7248_v30 = vld [vmem:[#allocation44_spill] sm:$0xff] }
 0x3fd   :  { %v4273_v58 = vpop.eup %4272  ;;  %3892 = vmatprep.mubr.bf16.mxu0 %v1111_v59  ;;  %v1102_v43 = vmul.f32 %v4271_v36, %v5677_v52  ;;  %v1435_v33 = vsub.f32 %v7249_v56, %v7248_v30  ;;  %v7260_v30 = vld [vmem:[#allocation23_spill] sm:$0xff]  ;;  %v7261_v56 = vld [vmem:[#allocation65_spill] sm:$0xff] }
 0x3fe   :  { %v4275_v26 = vpop.eup %4274  ;;  %v703_v50 = vpack.c.bf16 %v695_v45, %v694_v21  ;;  %v1099_v11 = vmul.f32 %v4273_v58, %v7238_v20  ;;  %v1871_v21 = vsub.f32 %v7250_v61, %v5742_v44  ;;  %v7251_v58 = vld [vmem:[#allocation49_spill] sm:$0xff] }
 0x3ff   :  { %v1101_v8 = vmul.f32 %v4275_v26, %v7239_v32  ;;  %v4277_v6 = vpop.eup %4276  ;;  %v1460_v36 = vmul.f32 1.442695, %v1435_v33  ;;  %v7252_v26 = vld [vmem:[#allocation17_spill] sm:$0xff] }
 0x400   :  { %3869 = vmatmul.mubr.bf16.gmra.mxu1 %v703_v50  ;;  %v1112_v40 = vpack.c.bf16 %v1100_v41, %v1099_v11  ;;  %v4279_v15 = vpop.eup %4278  ;;  %v1104_v52 = vmul.f32 %v4277_v6, %v7242_v5  ;;  %v1872_v50 = vsub.f32 %v7252_v26, %v7251_v58  ;;  %v1895_v41 = vmul.f32 1.442695, %v1871_v21  ;;  %v7257_v5 = vld [vmem:[#allocation7_spill] sm:$0xff]  ;;  %v7264_v58 = vld [vmem:[#allocation16_spill] sm:$0xff] }
 0x401   :  { %v1113_v0 = vpack.c.bf16 %v1102_v43, %v1101_v8  ;;  %v4281_v49 = vpop.eup %4280  ;;  %v1106_v19 = vmul.f32 %v4279_v15, %v7243_v31  ;;  %4294 = vpow2.f32 %v1460_v36  ;;  %v1873_v43 = vsub.f32 %v7253_v35, %v5746_v1  ;;  %v7254_v8 = vld [vmem:[#allocation52_spill] sm:$0xff]  ;;  %v7262_v36 = vld [vmem:[#allocation2_spill] sm:$0xff] }
 0x402   :  { %v4283_v54 = vpop.eup %4282  ;;  %v1103_v2 = vmul.f32 %v4281_v49, %v7244_v27  ;;  %v1897_v20 = vmul.f32 1.442695, %v1872_v50  ;;  %4296 = vpow2.f32 %v1895_v41 }
 0x403   :  { %v1105_v18 = vmul.f32 %v4283_v54, %v7245_v3  ;;  %v4285_v37 = vpop.eup %4284  ;;  %v1899_v44 = vmul.f32 1.442695, %v1873_v43 }
 0x404   :  { %3893 = vmatmul.mubr.bf16.gmra.mxu0 %v1112_v40  ;;  %v1114_v28 = vpack.c.bf16 %v1104_v52, %v1103_v2  ;;  %v4287_v57 = vpop.eup %4286  ;;  %v1108_v39 = vmul.f32 %v4285_v37, %v7246_v63  ;;  %4298 = vpow2.f32 %v1897_v20  ;;  %v7255_v40 = vld [vmem:[#allocation21_spill] sm:$0xff]  ;;  %v7258_v63 = vld [vmem:[#allocation20_spill] sm:$0xff] }
 0x405   :  { %3896 = vmatprep.mubr.bf16.mxu0 %v1113_v0  ;;  %v1115_v46 = vpack.c.bf16 %v1106_v19, %v1105_v18  ;;  %v5921_v24 = vpop.eup %4288  ;;  %v1107_v14 = vmul.f32 %v4287_v57, %v7247_v55  ;;  %v1874_v6 = vsub.f32 %v7255_v40, %v7254_v8  ;;  %v7265_v20 = vld [vmem:[#allocation53_spill] sm:$0xff] }
 0x406   :  { %v5925_v47 = vpop.eup %4290 }
 0x407   :  { %v1116_v16 = vpack.c.bf16 %v1108_v39, %v1107_v14  ;;  %v5930_v59 = vpop.eup %4292  ;;  %v1901_v1 = vmul.f32 1.442695, %v1874_v6  ;;  %v1438_v39 = vsub.f32 %v7258_v63, %v5755_v22  ;;  %v7267_v6 = vld [vmem:[#allocation63_spill] sm:$0xff]  ;;  %v7274_v63 = vld [vmem:[#allocation28_spill] sm:$0xff] }
 0x40c   :  { %3897 = vmatmul.mubr.bf16.gmra.mxu0 %v1114_v28 }
 0x40d   :  { %3900 = vmatprep.mubr.bf16.mxu0 %v1115_v46 }
 0x40e   :  { %1570 = vrot.lane.b32.xlu0 %v7236_v17, %s4551_s1  ;;  %v5945_v51 = vpop.eup %4294 }
 0x40f   :  { %v5952_v15 = vpop.eup %4296 }
 0x410   :  { %1490 = vadd.xlane.f32.xlu1 %v5921_v24 }
 0x411   :  { %v5957_v52 = vpop.eup %4298 }
 0x413   :  { %v1475_v62 = vpop.xlane.xlu1 %1474 }
 0x414   :  { %3901 = vmatmul.mubr.bf16.gmra.mxu0 %v1116_v16  ;;  %1494 = vadd.xlane.f32.xlu1 %v5925_v47  ;;  %v1506_v32 = vmax.f32 %v1475_v62, 1e-30  ;;  %v1466_v62 = vmul.f32 1.442695, %v1438_v39 }
 0x416   :  { %4300 = vrcp.f32 %v1506_v32 }
 0x417   :  { %v5932_v17 = vpop.xlane.xlu1 %1478  ;;  %4302 = vpow2.f32 %v1899_v44 }
 0x418   :  { %1496 = vadd.xlane.f32.xlu1 %v5930_v59 }
 0x41b   :  { %v1577_v45 = vpop.permute.xlu1 %1576 }
 0x41c   :  { %3904 = vmatprep.subr.bf16.mxu1 %v1577_v45 }
 0x41d   :  { %3905 = vmatpush3.bf16.msra.mxu1 %v1577_v45  ;;  %v7263_v45 = vld [vmem:[#allocation56_spill] sm:$0xff] }
 0x41e   :  { %v1441_v26 = vsub.f32 %v7264_v58, %v7263_v45 }
 0x41f   :  { %v2014_v25 = vpop.permute.xlu1 %2013 }
 0x420   :  { %3936 = vmatprep.subr.bf16.mxu0 %v2014_v25  ;;  %v1472_v22 = vmul.f32 1.442695, %v1441_v26 }
 0x421   :  { %3937 = vmatpush3.bf16.msra.mxu0 %v2014_v25 }
 0x423   :  { %v2012_v11 = vpop.permute.xlu1 %2011  ;;  %v4301_v19 = vpop.eup %4300 }
 0x424   :  { %3938 = vmatprep.subr.bf16.mxu0 %v2012_v11  ;;  %v5960_v27 = vpop.eup %4302  ;;  %v1538_v18 = vmul.f32 %v4301_v19, %v5750_v48  ;;  %v7259_v48 = vld [vmem:[#allocation62_spill] sm:$0xff]  ;;  %v7271_v19 = vld [vmem:[#allocation64_spill] sm:$0xff] }
 0x425   :  { %3939 = vmatpush3.bf16.msra.mxu0 %v2012_v11  ;;  %v7266_v11 = vld [vmem:[#allocation18_spill] sm:$0xff] }
 0x426   :  { %v1439_v32 = vsub.f32 %v7266_v11, %v7265_v20 }
 0x428   :  { %v1477_v53 = vpop.xlane.xlu0 %1476  ;;  %v1468_v40 = vmul.f32 1.442695, %v1439_v32 }
 0x429   :  { %v1507_v7 = vmax.f32 %v1477_v53, 1e-30  ;;  %1568 = vrot.lane.b32.xlu1 %v7256_v29, %s4551_s1  ;;  %v7268_v53 = vld [vmem:[#allocation26_spill] sm:$0xff] }
 0x42b   :  { %4304 = vrcp.f32 %v1507_v7  ;;  %v1875_v7 = vsub.f32 %v7268_v53, %v7267_v6 }
 0x42c   :  { %v5947_v0 = vpop.xlane.xlu0 %1480  ;;  %4306 = vpow2.f32 %v1901_v1  ;;  %v7269_v1 = vld [vmem:[#allocation59_spill] sm:$0xff] }
 0x42d   :  { %1492 = vadd.xlane.f32.xlu0 %v5945_v51  ;;  %2005 = vrot.lane.b32.xlu1 %v7256_v29, %s4552_s15 }
 0x430   :  { %v1912_v49 = vpop.xlane.xlu0 %1911 }
 0x431   :  { %v1943_v54 = vmax.f32 %v1912_v49, 1e-30  ;;  %1927 = vadd.xlane.f32.xlu0 %v5952_v15  ;;  %2003 = vrot.lane.b32.xlu1 %v7257_v5, %s4552_s15  ;;  %v7270_v49 = vld [vmem:[#allocation24_spill] sm:$0xff] }
 0x433   :  { %4308 = vrcp.f32 %v1943_v54  ;;  %v1876_v54 = vsub.f32 %v7270_v49, %v7269_v1 }
 0x434   :  { %v1914_v34 = vpop.xlane.xlu0 %1913 }
 0x435   :  { %v1944_v31 = vmax.f32 %v1914_v34, 1e-30  ;;  %1929 = vadd.xlane.f32.xlu0 %v5957_v52 }
 0x437   :  { %4310 = vrcp.f32 %v1944_v31  ;;  %v1905_v31 = vmul.f32 1.442695, %v1876_v54 }
 0x438   :  { %v4305_v2 = vpop.eup %4304  ;;  %v5962_v3 = vpop.xlane.xlu0 %1915  ;;  %4312 = vpow2.f32 %v1466_v62 }
 0x439   :  { %1931 = vadd.xlane.f32.xlu0 %v5960_v27  ;;  %v1539_v28 = vmul.f32 %v4305_v2, %v5772_v10  ;;  %v5967_v46 = vpop.eup %4306  ;;  %v1440_v10 = vsub.f32 %v7260_v30, %v7259_v48  ;;  %v7272_v2 = vld [vmem:[#allocation29_spill] sm:$0xff] }
 0x43b   :  { %v1554_v37 = vpack.c.bf16 %v1539_v28, %v1538_v18  ;;  %v1470_v50 = vmul.f32 1.442695, %v1440_v10  ;;  %v1877_v18 = vsub.f32 %v7272_v2, %v7271_v19 }
 0x43c   :  { %v5969_v57 = vpop.xlane.xlu0 %1917 }
 0x43d   :  { %1933 = vadd.xlane.f32.xlu0 %v5967_v46  ;;  %3920 = vmatprep.mubr.bf16.mxu1 %v1554_v37  ;;  %4314 = vpow2.f32 %v1470_v50  ;;  %v7273_v37 = vld [vmem:[#allocation60_spill] sm:$0xff] }
 0x43e   :  { %4316 = vpow2.f32 %v1472_v22  ;;  %v1878_v39 = vsub.f32 %v7274_v63, %v7273_v37 }
 0x43f   :  { %4318 = vpow2.f32 %v1468_v40 }
 0x440   :  { %v1575_v55 = vpop.permute.xlu0 %1574  ;;  %v4309_v14 = vpop.eup %4308 }
 0x441   :  { %3906 = vmatprep.subr.bf16.mxu1 %v1575_v55  ;;  %v1975_v33 = vmul.f32 %v4309_v14, %v7261_v56  ;;  %v7275_v14 = vld [vmem:[#allocation8_spill] sm:$0xff]  ;;  %v7276_v56 = vld [vmem:[#allocation9_spill] sm:$0xff] }
 0x442   :  { %3907 = vmatpush3.bf16.msra.mxu1 %v1575_v55  ;;  %v1907_v55 = vmul.f32 1.442695, %v1877_v18 }
 0x444   :  { %v4311_v16 = vpop.eup %4310 }
 0x445   :  { %v1976_v61 = vmul.f32 %v4311_v16, %v7262_v36  ;;  %v5982_v41 = vpop.eup %4312  ;;  %v1909_v16 = vmul.f32 1.442695, %v1878_v39 }
 0x447   :  { %v1991_v21 = vpack.c.bf16 %v1976_v61, %v1975_v33 }
 0x449   :  { %3952 = vmatprep.mubr.bf16.mxu0 %v1991_v21 }
 0x44a   :  { %v5987_v35 = vpop.eup %4314 }
 0x44b   :  { %v5994_v44 = vpop.eup %4316 }
 0x44c   :  { %v6009_v62 = vpop.eup %4318 }
 0x453   :  { %1566 = vrot.lane.b32.xlu0 %v7257_v5, %s4551_s1  ;;  %v1903_v5 = vmul.f32 1.442695, %v1875_v7 }
 0x454   :  { %v5984_v25 = vpop.xlane.xlu1 %1482 }
 0x455   :  { %1498 = vadd.xlane.f32.xlu1 %v5982_v41  ;;  %4320 = vpow2.f32 %v1903_v5 }
 0x456   :  { %4322 = vpow2.f32 %v1905_v31 }
 0x457   :  { %4324 = vpow2.f32 %v1907_v55 }
 0x458   :  { %v5989_v43 = vpop.xlane.xlu1 %1486  ;;  %4326 = vpow2.f32 %v1909_v16 }
 0x459   :  { %1502 = vadd.xlane.f32.xlu1 %v5987_v35 }
 0x45c   :  { %v5996_v8 = vpop.xlane.xlu1 %1488 }
 0x45d   :  { %1504 = vadd.xlane.f32.xlu1 %v5994_v44 }
 0x460   :  { %v1573_v29 = vpop.permute.xlu1 %1572 }
 0x461   :  { %3908 = vmatprep.subr.bf16.mxu1 %v1573_v29 }
 0x462   :  { %3909 = vmatpush3.bf16.msra.mxu1 %v1573_v29  ;;  %v6016_v30 = vpop.eup %4320 }
 0x463   :  { %v6023_v33 = vpop.eup %4322 }
 0x464   :  { %v2010_v34 = vpop.permute.xlu1 %2009  ;;  %v6028_v61 = vpop.eup %4324 }
 0x465   :  { %3940 = vmatprep.subr.bf16.mxu0 %v2010_v34  ;;  %v6033_v45 = vpop.eup %4326 }
 0x466   :  { %3941 = vmatpush3.bf16.msra.mxu0 %v2010_v34 }
 0x468   :  { %v2008_v28 = vpop.permute.xlu1 %2007 }
 0x469   :  { %3942 = vmatprep.subr.bf16.mxu0 %v2008_v28 }
 0x46a   :  { %3943 = vmatpush3.bf16.msra.mxu0 %v2008_v28 }
 0x46e   :  { %1564 = vrot.lane.b32.xlu1 %v7275_v14, %s4551_s1 }
 0x471   :  { %v6011_v48 = vpop.xlane.xlu0 %1484 }
 0x472   :  { %1500 = vadd.xlane.f32.xlu0 %v6009_v62  ;;  %2001 = vrot.lane.b32.xlu1 %v7275_v14, %s4552_s15 }
 0x475   :  { %v6018_v10 = vpop.xlane.xlu0 %1919 }
 0x476   :  { %1935 = vadd.xlane.f32.xlu0 %v6016_v30  ;;  %1999 = vrot.lane.b32.xlu1 %v7276_v56, %s4552_s15 }
 0x479   :  { %v6025_v36 = vpop.xlane.xlu0 %1921 }
 0x47a   :  { %1937 = vadd.xlane.f32.xlu0 %v6023_v33 }
 0x47d   :  { %v6030_v21 = vpop.xlane.xlu0 %1923 }
 0x47e   :  { %1939 = vadd.xlane.f32.xlu0 %v6028_v61 }
 0x481   :  { %v6035_v58 = vpop.xlane.xlu0 %1925 }
 0x482   :  { %1941 = vadd.xlane.f32.xlu0 %v6033_v45 }
 0x485   :  { %v1571_v26 = vpop.permute.xlu0 %1570 }
 0x486   :  { %3910 = vmatprep.subr.bf16.mxu1 %v1571_v26 }
 0x487   :  { %3911 = vmatpush3.bf16.msra.mxu1 %v1571_v26  ;;  %v1946_v26 = vmax.f32 %v5969_v57, 1e-30 }
 0x489   :  { %4328 = vrcp.f32 %v1946_v26 }
 0x498   :  { %1562 = vrot.lane.b32.xlu0 %v7276_v56, %s4551_s1 }
 0x499   :  { %v6040_v50 = vpop.xlane.xlu1 %1490 }
 0x49d   :  { %v6042_v22 = vpop.xlane.xlu1 %1494 }
 0x4a1   :  { %v6044_v20 = vpop.xlane.xlu1 %1496 }
 0x4a5   :  { %v1569_v11 = vpop.permute.xlu1 %1568 }
 0x4a6   :  { %3912 = vmatprep.subr.bf16.mxu1 %v1569_v11 }
 0x4a7   :  { %3913 = vmatpush3.bf16.msra.mxu1 %v1569_v11 }
 0x4a9   :  { %v2006_v32 = vpop.permute.xlu1 %2005 }
 0x4aa   :  { %3944 = vmatprep.subr.bf16.mxu0 %v2006_v32 }
 0x4ab   :  { %3945 = vmatpush3.bf16.msra.mxu0 %v2006_v32  ;;  %v1948_v32 = vmax.f32 %v6025_v36, 1e-30  ;;  %v1949_v36 = vmax.f32 %v6030_v21, 1e-30  ;;  %v7277_v21 = vld [vmem:[#allocation67_spill] sm:$0xff] }
 0x4ad   :  { %v2004_v40 = vpop.permute.xlu1 %2003  ;;  %4330 = vrcp.f32 %v1948_v32 }
 0x4ae   :  { %3946 = vmatprep.subr.bf16.mxu0 %v2004_v40 }
 0x4af   :  { %3947 = vmatpush3.bf16.msra.mxu0 %v2004_v40 }
 0x4b6   :  { %v6046_v6 = vpop.xlane.xlu0 %1492 }
 0x4ba   :  { %v1928_v53 = vpop.xlane.xlu0 %1927 }
 0x4bc   :  { %v3890_v7 = vpop.f32.mrf.mxu0 }
 0x4bd   :  { %2140 = vrot.lane.b32.xlu0 %v3890_v7, %s4553_s16  ;;  %v1945_v7 = vmax.f32 %v5962_v3, 1e-30 }
 0x4be   :  { %v1930_v29 = vpop.xlane.xlu0 %1929  ;;  %v1183_v1 = vpop.f32.mrf.mxu0 }
 0x4bf   :  { %2136 = vrot.lane.b32.xlu1 %v1183_v1, %s4553_s16  ;;  %v1947_v1 = vmax.f32 %v6018_v10, 1e-30  ;;  %4332 = vrcp.f32 %v1945_v7  ;;  %v1952_v57 = vmax.f32 %v1930_v29, 1e-30  ;;  %v4329_v10 = vpop.eup %4328  ;;  %v1509_v7 = vmax.f32 %v5947_v0, 1e-30 }
 0x4c0   :  { %v3891_v49 = vpop.f32.mrf.mxu0 }
 0x4c1   :  { %4334 = vrcp.f32 %v1947_v1 }
 0x4c2   :  { %v6050_v54 = vpop.xlane.xlu0 %1931  ;;  %v1186_v5 = vpop.f32.mrf.mxu0 }
 0x4c3   :  { %2142 = vrot.lane.b32.xlu1 %v3891_v49, %s4553_s16 }
 0x4c4   :  { %v3894_v34 = vpop.f32.mrf.mxu0 }
 0x4c5   :  { %2148 = vrot.lane.b32.xlu0 %v3894_v34, %s4553_s16 }
 0x4c6   :  { %v1934_v31 = vpop.xlane.xlu0 %1933  ;;  %v1199_v19 = vpop.f32.mrf.mxu0 }
 0x4c7   :  { %2138 = vrot.lane.b32.xlu1 %v1186_v5, %s4553_s16  ;;  %v1950_v5 = vmax.f32 %v6035_v58, 1e-30  ;;  %v1954_v3 = vmax.f32 %v1934_v31, 1e-30 }
 0x4c8   :  { %v3895_v2 = vpop.f32.mrf.mxu0 }
 0x4c9   :  { %2144 = vrot.lane.b32.xlu0 %v1199_v19, %s4553_s16  ;;  %v1951_v19 = vmax.f32 %v1928_v53, 1e-30  ;;  %4336 = vrcp.f32 %v1950_v5  ;;  %v1978_v53 = vmul.f32 %v4329_v10, %v7277_v21 }
 0x4ca   :  { %v1567_v18 = vpop.permute.xlu0 %1566  ;;  %v1202_v28 = vpop.f32.mrf.mxu0  ;;  %4338 = vrcp.f32 %v1952_v57 }
 0x4cb   :  { %2150 = vrot.lane.b32.xlu1 %v3895_v2, %s4553_s16  ;;  %3914 = vmatprep.subr.bf16.mxu1 %v1567_v18  ;;  %4340 = vrcp.f32 %v1949_v36  ;;  %v1508_v36 = vmax.f32 %v5932_v17, 1e-30  ;;  %v1515_v17 = vmax.f32 %v6046_v6, 1e-30 }
 0x4cc   :  { %3915 = vmatpush3.bf16.msra.mxu1 %v1567_v18  ;;  %v3898_v37 = vpop.f32.mrf.mxu0  ;;  %4342 = vrcp.f32 %v1951_v19  ;;  %v1510_v19 = vmax.f32 %v5984_v25, 1e-30 }
 0x4cd   :  { %2156 = vrot.lane.b32.xlu0 %v3898_v37, %s4553_s16  ;;  %v1953_v37 = vmax.f32 %v6050_v54, 1e-30  ;;  %4344 = vrcp.f32 %v1954_v3 }
 0x4ce   :  { %v1215_v63 = vpop.f32.mrf.mxu0 }
 0x4cf   :  { %2146 = vrot.lane.b32.xlu1 %v1202_v28, %s4553_s16  ;;  %v4331_v28 = vpop.eup %4330  ;;  %4346 = vrcp.f32 %v1953_v37 }
 0x4d0   :  { %v3899_v39 = vpop.f32.mrf.mxu0  ;;  %v4333_v58 = vpop.eup %4332  ;;  %4348 = vrcp.f32 %v1509_v7 }
 0x4d1   :  { %2152 = vrot.lane.b32.xlu0 %v1215_v63, %s4553_s16  ;;  %v4335_v29 = vpop.eup %4334 }
 0x4d2   :  { %v1218_v55 = vpop.f32.mrf.mxu0  ;;  %v1979_v31 = vmul.f32 %v4335_v29, %v5875_v13 }
 0x4d3   :  { %2158 = vrot.lane.b32.xlu1 %v3899_v39, %s4553_s16  ;;  %v1980_v39 = vmul.f32 %v4331_v28, %v5884_v23  ;;  %v1511_v23 = vmax.f32 %v6011_v48, 1e-30 }
 0x4d4   :  { %v3902_v14 = vpop.f32.mrf.mxu0 }
 0x4d5   :  { %2164 = vrot.lane.b32.xlu0 %v3902_v14, %s4553_s16  ;;  %v1993_v54 = vpack.c.bf16 %v1980_v39, %v1979_v31  ;;  %4350 = vrcp.f32 %v1511_v23  ;;  %v1516_v39 = vmax.f32 %v6042_v22, 1e-30  ;;  %v7279_v31 = vld [vmem:[#allocation3_spill] sm:$0xff] }
 0x4d6   :  { %v1231_v16 = vpop.f32.mrf.mxu0  ;;  %4352 = vrcp.f32 %v1508_v36 }
 0x4d7   :  { %2154 = vrot.lane.b32.xlu1 %v1218_v55, %s4553_s16  ;;  %v7278_v55 = vld [vmem:[#allocation66_spill] sm:$0xff]  ;;  %4354 = vrcp.f32 %v1510_v19 }
 0x4d8   :  { %v3903_v56 = vpop.f32.mrf.mxu0  ;;  %v1977_v14 = vmul.f32 %v4333_v58, %v7278_v55  ;;  %v1514_v58 = vmax.f32 %v6040_v50, 1e-30 }
 0x4d9   :  { %2160 = vrot.lane.b32.xlu0 %v1231_v16, %s4553_s16 }
 0x4da   :  { %v1234_v11 = vpop.f32.mrf.mxu0  ;;  %v1992_v16 = vpack.c.bf16 %v1978_v53, %v1977_v14 }
 0x4db   :  { %2166 = vrot.lane.b32.xlu1 %v3903_v56, %s4553_s16  ;;  %v4337_v56 = vpop.eup %4336 }
 0x4dc   :  { %v4339_v26 = vpop.eup %4338  ;;  %v1982_v1 = vmul.f32 %v4337_v56, %v5886_v4 }
 0x4dd   :  { %v1984_v57 = vmul.f32 %v4339_v26, %v5957_v52  ;;  %v1513_v52 = vmax.f32 %v5996_v8, 1e-30 }
 0x4de   :  { %v6067_v40 = vpop.xlane.xlu1 %1498 }
 0x4df   :  { %2162 = vrot.lane.b32.xlu1 %v1234_v11, %s4553_s16  ;;  %v4341_v11 = vpop.eup %4340  ;;  %v1518_v50 = vmax.f32 %v6067_v40, 1e-30 }
 0x4e0   :  { %v4343_v32 = vpop.eup %4342  ;;  %v1981_v13 = vmul.f32 %v4341_v11, %v5889_v38 }
 0x4e1   :  { %v4345_v10 = vpop.eup %4344 }
 0x4e2   :  { %v6072_v49 = vpop.xlane.xlu1 %1502  ;;  %v1994_v3 = vpack.c.bf16 %v1982_v1, %v1981_v13  ;;  %v4347_v48 = vpop.eup %4346  ;;  %v1986_v38 = vmul.f32 %v4345_v10, %v5967_v46  ;;  %v1517_v46 = vmax.f32 %v6044_v20, 1e-30 }
 0x4e3   :  { %v1985_v37 = vmul.f32 %v4347_v48, %v5960_v27  ;;  %v4349_v6 = vpop.eup %4348 }
 0x4e5   :  { %v1996_v29 = vpack.c.bf16 %v1986_v38, %v1985_v37 }
 0x4e6   :  { %v6075_v34 = vpop.xlane.xlu1 %1504 }
 0x4e7   :  { %v1521_v40 = vmax.f32 %v6075_v34, 1e-30 }
 0x4ea   :  { %v1565_v2 = vpop.permute.xlu1 %1564 }
 0x4eb   :  { %3916 = vmatprep.subr.bf16.mxu1 %v1565_v2 }
 0x4ec   :  { %3917 = vmatpush3.bf16.msra.mxu1 %v1565_v2  ;;  %v1983_v2 = vmul.f32 %v4343_v32, %v5952_v15  ;;  %v1512_v15 = vmax.f32 %v5989_v43, 1e-30 }
 0x4ee   :  { %v2002_v18 = vpop.permute.xlu1 %2001 }
 0x4ef   :  { %3948 = vmatprep.subr.bf16.mxu0 %v2002_v18 }
 0x4f0   :  { %3949 = vmatpush3.bf16.msra.mxu0 %v2002_v18  ;;  %v1995_v18 = vpack.c.bf16 %v1984_v57, %v1983_v2  ;;  %v1520_v57 = vmax.f32 %v6072_v49, 1e-30 }
 0x4f2   :  { %v2000_v63 = vpop.permute.xlu1 %1999 }
 0x4f3   :  { %3950 = vmatprep.subr.bf16.mxu0 %v2000_v63 }
 0x4f4   :  { %3951 = vmatpush3.bf16.msra.mxu0 %v2000_v63  ;;  %v4351_v63 = vpop.eup %4350 }
 0x4f5   :  { %v4353_v55 = vpop.eup %4352  ;;  %v1543_v20 = vmul.f32 %v4351_v63, %v5866_v9 }
 0x4f6   :  { %v4355_v14 = vpop.eup %4354 }
 0x4f7   :  { %3953 = vmatmul.mubr.bf16.vlgmr.msra.gmra.mxu0 %v1992_v16  ;;  %v1541_v16 = vmul.f32 %v4349_v6, %v7279_v31  ;;  %v1542_v22 = vmul.f32 %v4355_v14, %v5818_v42 }
 0x4f8   :  { %3956 = vmatprep.mubr.bf16.mxu0 %v1993_v54  ;;  %v7280_v54 = vld [vmem:[#allocation61_spill] sm:$0xff] }
 0x4f9   :  { %v1540_v26 = vmul.f32 %v4353_v55, %v7280_v54  ;;  %v1556_v23 = vpack.c.bf16 %v1543_v20, %v1542_v22  ;;  %v2470_v22 = vld [vmem:[%s6994_s4 + $0x28] sm:$0xff] }
 0x4fb   :  { %v1501_v5 = vpop.xlane.xlu0 %1500  ;;  %v1555_v7 = vpack.c.bf16 %v1541_v16, %v1540_v26  ;;  %v2472_v16 = vld [vmem:[%s6994_s4 + $0x38] sm:$0xff] }
 0x4fc   :  { %v1519_v53 = vmax.f32 %v1501_v5, 1e-30 }
 0x4ff   :  { %v1936_v0 = vpop.xlane.xlu0 %1935  ;;  %3957 = vmatmul.mubr.bf16.gmra.mxu0 %v1994_v3 }
 0x500   :  { %v1955_v4 = vmax.f32 %v1936_v0, 1e-30  ;;  %3960 = vmatprep.mubr.bf16.mxu0 %v1995_v18 }
 0x502   :  { %4356 = vrcp.f32 %v1955_v4 }
 0x503   :  { %v1938_v25 = vpop.xlane.xlu0 %1937  ;;  %4358 = vrcp.f32 %v1513_v52 }
 0x504   :  { %v1956_v28 = vmax.f32 %v1938_v25, 1e-30 }
 0x506   :  { %4360 = vrcp.f32 %v1956_v28 }
 0x507   :  { %4362 = vrcp.f32 %v1515_v17  ;;  %v1940_v21 = vpop.xlane.xlu0 %1939  ;;  %3961 = vmatmul.mubr.bf16.gmra.mxu0 %v1996_v29 }
 0x508   :  { %4364 = vrcp.f32 %v1512_v15  ;;  %v1957_v8 = vmax.f32 %v1940_v21, 1e-30 }
 0x509   :  { %4366 = vrcp.f32 %v1514_v58 }
 0x50a   :  { %4368 = vrcp.f32 %v1957_v8 }
 0x50b   :  { %v1942_v43 = vpop.xlane.xlu0 %1941  ;;  %4370 = vrcp.f32 %v1517_v46 }
 0x50c   :  { %v1958_v27 = vmax.f32 %v1942_v43, 1e-30 }
 0x50e   :  { %4372 = vrcp.f32 %v1958_v27 }
 0x50f   :  { %4374 = vrcp.f32 %v1519_v53  ;;  %v1563_v56 = vpop.permute.xlu0 %1562  ;;  %v4357_v11 = vpop.eup %4356 }
 0x510   :  { %4376 = vrcp.f32 %v1516_v39  ;;  %3918 = vmatprep.subr.bf16.mxu1 %v1563_v56  ;;  %v4359_v32 = vpop.eup %4358  ;;  %v1987_v9 = vmul.f32 %v4357_v11, %v6016_v30 }
 0x511   :  { %4378 = vrcp.f32 %v1518_v50  ;;  %3919 = vmatpush3.bf16.msra.mxu1 %v1563_v56  ;;  %v1545_v42 = vmul.f32 %v4359_v32, %v5836_v12  ;;  %v2471_v56 = vld [vmem:[%s6994_s4 + $0x30] sm:$0xff] }
 0x512   :  { %4380 = vrcp.f32 %v1521_v40  ;;  %3968 = vmatprep.subr.mxu1 %v2472_v16 }
 0x513   :  { %v4361_v1 = vpop.eup %4360  ;;  %4382 = vrcp.f32 %v1520_v57 }
 0x514   :  { %v4363_v5 = vpop.eup %4362  ;;  %3921 = vmatmul.mubr.bf16.vlgmr.msra.gmra.mxu1 %v1555_v7  ;;  %v1988_v36 = vmul.f32 %v4361_v1, %v6023_v33 }
 0x515   :  { %v4365_v13 = vpop.eup %4364  ;;  %3924 = vmatprep.mubr.bf16.mxu1 %v1556_v23  ;;  %v1547_v34 = vmul.f32 %v4363_v5, %v5945_v51  ;;  %3969 = vmatpush3.msra.mxu1 %v2472_v16 }
 0x516   :  { %v4367_v19 = vpop.eup %4366  ;;  %v1997_v2 = vpack.c.bf16 %v1988_v36, %v1987_v9  ;;  %v1544_v3 = vmul.f32 %v4365_v13, %v5825_v60  ;;  %3970 = vmatprep.subr.mxu1 %v2471_v56  ;;  %v2469_v36 = vld [vmem:[%s6994_s4 + $0x20] sm:$0xff]  ;;  %v2468_v13 = vld [vmem:[%s6994_s4 + $0x18] sm:$0xff] }
 0x517   :  { %v4369_v10 = vpop.eup %4368  ;;  %v1546_v49 = vmul.f32 %v4367_v19, %v5921_v24  ;;  %3971 = vmatpush3.msra.mxu1 %v2471_v56 }
 0x518   :  { %3964 = vmatprep.mubr.bf16.mxu0 %v1997_v2  ;;  %v4371_v0 = vpop.eup %4370  ;;  %v1557_v30 = vpack.c.bf16 %v1545_v42, %v1544_v3  ;;  %v1989_v48 = vmul.f32 %v4369_v10, %v6028_v61  ;;  %3972 = vmatprep.subr.mxu1 %v2470_v22  ;;  %v2467_v42 = vld [vmem:[%s6994_s4 + $0x10] sm:$0xff] }
 0x519   :  { %v1558_v33 = vpack.c.bf16 %v1547_v34, %v1546_v49  ;;  %v1549_v17 = vmul.f32 %v4371_v0, %v5930_v59  ;;  %v6120_v59 = vpop.f32.mrf.mxu1  ;;  %3973 = vmatpush3.msra.mxu1 %v2470_v22  ;;  %v2466_v34 = vld [vmem:[%s6994_s4 + $0x8] sm:$0xff]  ;;  %v2465_v49 = vld [vmem:[%s6994_s4] sm:$0xff] }
 0x51a   :  { %3974 = vmatprep.subr.mxu1 %v2469_v36 }
 0x51b   :  { %v4373_v18 = vpop.eup %4372  ;;  %3975 = vmatpush3.msra.mxu1 %v2469_v36  ;;  %v6236_v36 = vld [vmem:[%s6995_s3] ss:$0 sm:$0xff]  ;;  %s4558_s3 = smov 120  }
 0x51c   :  { %v4375_v4 = vpop.eup %4374  ;;  %3925 = vmatmul.mubr.bf16.gmra.mxu1 %v1557_v30  ;;  %v1990_v52 = vmul.f32 %v4373_v18, %v6033_v45  ;;  %3976 = vmatprep.subr.mxu1 %v2468_v13 }
 0x51d   :  { %v4377_v12 = vpop.eup %4376  ;;  %3928 = vmatprep.mubr.bf16.mxu1 %v1558_v33  ;;  %v1551_v60 = vmul.f32 %v4375_v4, %v6009_v62  ;;  %v6122_v62 = vpop.f32.mrf.mxu1  ;;  %3977 = vmatpush3.msra.mxu1 %v2468_v13 }
 0x51e   :  { %v4379_v51 = vpop.eup %4378  ;;  %v1998_v38 = vpack.c.bf16 %v1990_v52, %v1989_v48  ;;  %v1548_v24 = vmul.f32 %v4377_v12, %v5925_v47  ;;  %3978 = vmatprep.subr.mxu1 %v2467_v42 }
 0x51f   :  { %v1550_v25 = vmul.f32 %v4379_v51, %v5982_v41  ;;  %v4381_v28 = vpop.eup %4380  ;;  %v6124_v21 = vpop.f32.mrf.mxu1  ;;  %3979 = vmatpush3.msra.mxu1 %v2467_v42 }
 0x520   :  { %3965 = vmatmul.mubr.bf16.gmra.mxu0 %v1998_v38  ;;  %v1559_v15 = vpack.c.bf16 %v1549_v17, %v1548_v24  ;;  %v4383_v61 = vpop.eup %4382  ;;  %v1553_v45 = vmul.f32 %v4381_v28, %v5994_v44  ;;  %3980 = vmatprep.subr.mxu1 %v2466_v34 }
 0x521   :  { %v1560_v37 = vpack.c.bf16 %v1551_v60, %v1550_v25  ;;  %v1552_v58 = vmul.f32 %v4383_v61, %v5987_v35  ;;  %v6126_v47 = vpop.f32.mrf.mxu1  ;;  %3981 = vmatpush3.msra.mxu1 %v2466_v34  ;;  %v4556_v61 = vmov 18  }
 0x522   :  { %3982 = vmatprep.subr.mxu1 %v2465_v49  ;;  %4099 = vset.pattern.permute.xlu0 %v4556_v61 }
 0x523   :  { %v1561_v29 = vpack.c.bf16 %v1553_v45, %v1552_v58  ;;  %v6128_v41 = vpop.f32.mrf.mxu1  ;;  %3983 = vmatpush3.msra.mxu1 %v2465_v49 }
 0x524   :  { %3929 = vmatmul.mubr.bf16.gmra.mxu1 %v1559_v15 }
 0x525   :  { %3932 = vmatprep.mubr.bf16.mxu1 %v1560_v37  ;;  %v6130_v8 = vpop.f32.mrf.mxu1 }
 0x527   :  { %v6132_v46 = vpop.f32.mrf.mxu1 }
 0x529   :  { %v6134_v6 = vpop.f32.mrf.mxu1 }
 0x52b   :  { %v6136_v44 = vpop.f32.mrf.mxu1 }
 0x52c   :  { %3933 = vmatmul.mubr.bf16.gmra.mxu1 %v1561_v29 }
 0x52d   :  { %v6138_v35 = vpop.f32.mrf.mxu1 }
 0x52f   :  { %v6140_v53 = vpop.f32.mrf.mxu1  ;;  %v2141_v28 = vpop.permute.xlu0 %2140 }
 0x531   :  { %v6142_v43 = vpop.f32.mrf.mxu1  ;;  %v2137_v25 = vpop.permute.xlu1 %2136 }
 0x533   :  { %v6144_v63 = vpop.f32.mrf.mxu1 }
 0x535   :  { %v6146_v39 = vpop.f32.mrf.mxu1  ;;  %v2143_v15 = vpop.permute.xlu1 %2142 }
 0x537   :  { %v6148_v27 = vpop.f32.mrf.mxu1  ;;  %v2149_v45 = vpop.permute.xlu0 %2148 }
 0x539   :  { %v6150_v55 = vpop.f32.mrf.mxu1  ;;  %v2139_v37 = vpop.permute.xlu1 %2138 }
 0x53b   :  { %v2145_v29 = vpop.permute.xlu0 %2144 }
 0x53d   :  { %v2151_v58 = vpop.permute.xlu1 %2150 }
 0x5b7   :  { %v3954_v50 = vpop.f32.mrf.mxu0 }
 0x5b9   :  { %v2057_v20 = vpop.f32.mrf.mxu0 }
 0x5bb   :  { %v3955_v26 = vpop.f32.mrf.mxu0 }
 0x5bd   :  { %v2060_v32 = vpop.f32.mrf.mxu0 }
 0x5bf   :  { %v3958_v7 = vpop.f32.mrf.mxu0 }
 0x5c1   :  { %v2073_v23 = vpop.f32.mrf.mxu0 }
 0x5c3   :  { %v3959_v57 = vpop.f32.mrf.mxu0 }
 0x5c5   :  { %v2076_v19 = vpop.f32.mrf.mxu0 }
 0x5c7   :  { %v3962_v3 = vpop.f32.mrf.mxu0 }
 0x5c9   :  { %v2089_v30 = vpop.f32.mrf.mxu0 }
 0x5cb   :  { %v3963_v33 = vpop.f32.mrf.mxu0 }
 0x5cd   :  { %v2092_v48 = vpop.f32.mrf.mxu0 }
 0x5d4   :  { %v3922_v14 = vpop.f32.mrf.mxu1 }
 0x5d5   :  { %2204 = vrot.lane.b32.xlu0 %v3922_v14, %s4554_s17  ;;  %v6211_v14 = vpop.permute.xlu0 %2156 }
 0x5d6   :  { %v1620_v31 = vpop.f32.mrf.mxu1 }
 0x5d7   :  { %2200 = vrot.lane.b32.xlu1 %v1620_v31, %s4554_s17 }
 0x5d8   :  { %v3923_v54 = vpop.f32.mrf.mxu1 }
 0x5d9   :  { %2268 = vrot.lane.b32.xlu0 %v3954_v50, %s4555_s22  ;;  %v6209_v50 = vpop.permute.xlu1 %2146  ;;  %v6215_v16 = vpop.permute.xlu0 %2152 }
 0x5da   :  { %v1623_v11 = vpop.f32.mrf.mxu1 }
 0x5db   :  { %2206 = vrot.lane.b32.xlu1 %v3923_v54, %s4554_s17 }
 0x5dc   :  { %v3926_v40 = vpop.f32.mrf.mxu1 }
 0x5dd   :  { %2264 = vrot.lane.b32.xlu0 %v2057_v20, %s4555_s22  ;;  %v6213_v31 = vpop.permute.xlu1 %2158  ;;  %v6219_v20 = vpop.permute.xlu0 %2164 }
 0x5de   :  { %v1636_v1 = vpop.f32.mrf.mxu1 }
 0x5df   :  { %2270 = vrot.lane.b32.xlu1 %v3955_v26, %s4555_s22 }
 0x5e0   :  { %v3927_v5 = vpop.f32.mrf.mxu1  ;;  %v3966_v52 = vpop.f32.mrf.mxu0 }
 0x5e1   :  { %2212 = vrot.lane.b32.xlu0 %v3926_v40, %s4554_s17  ;;  %v6217_v56 = vpop.permute.xlu1 %2154  ;;  %v6223_v26 = vpop.permute.xlu0 %2160 }
 0x5e2   :  { %v1639_v9 = vpop.f32.mrf.mxu1  ;;  %v2105_v51 = vpop.f32.mrf.mxu0 }
 0x5e3   :  { %2202 = vrot.lane.b32.xlu1 %v1623_v11, %s4554_s17 }
 0x5e4   :  { %v3930_v2 = vpop.f32.mrf.mxu1  ;;  %v3967_v17 = vpop.f32.mrf.mxu0 }
 0x5e5   :  { %2276 = vrot.lane.b32.xlu0 %v3958_v7, %s4555_s22  ;;  %v6221_v54 = vpop.permute.xlu1 %2166 }
 0x5e6   :  { %v1652_v10 = vpop.f32.mrf.mxu1  ;;  %v2108_v24 = vpop.f32.mrf.mxu0 }
 0x5e7   :  { %2266 = vrot.lane.b32.xlu1 %v2060_v32, %s4555_s22 }
 0x5e8   :  { %v3931_v0 = vpop.f32.mrf.mxu1 }
 0x5e9   :  { %2208 = vrot.lane.b32.xlu0 %v1636_v1, %s4554_s17  ;;  %v6225_v11 = vpop.permute.xlu1 %2162  ;;  %v2312_v1 = vsel %vm90_vm0, %v6122_v62, %v2137_v25 }
 0x5ea   :  { %v1655_v18 = vpop.f32.mrf.mxu1 }
 0x5eb   :  { %2214 = vrot.lane.b32.xlu1 %v3927_v5, %s4554_s17 }
 0x5ec   :  { %v3934_v4 = vpop.f32.mrf.mxu1 }
 0x5ed   :  { %2272 = vrot.lane.b32.xlu0 %v2073_v23, %s4555_s22  ;;  %v2314_v23 = vsel %vm90_vm0, %v6120_v59, %v2141_v28 }
 0x5ee   :  { %v1668_v12 = vpop.f32.mrf.mxu1 }
 0x5ef   :  { %2278 = vrot.lane.b32.xlu1 %v3959_v57, %s4555_s22 }
 0x5f0   :  { %v3935_v38 = vpop.f32.mrf.mxu1 }
 0x5f1   :  { %2220 = vrot.lane.b32.xlu0 %v3930_v2, %s4554_s17 }
 0x5f2   :  { %v1671_v60 = vpop.f32.mrf.mxu1 }
 0x5f3   :  { %2210 = vrot.lane.b32.xlu1 %v1639_v9, %s4554_s17 }
 0x5f5   :  { %2284 = vrot.lane.b32.xlu0 %v3962_v3, %s4555_s22 }
 0x5f7   :  { %2274 = vrot.lane.b32.xlu1 %v2076_v19, %s4555_s22  ;;  %v2315_v19 = vsel %vm90_vm0, %v6124_v21, %v2143_v15 }
 0x5f9   :  { %2216 = vrot.lane.b32.xlu0 %v1652_v10, %s4554_s17 }
 0x5fb   :  { %2222 = vrot.lane.b32.xlu1 %v3931_v0, %s4554_s17 }
 0x5fd   :  { %2280 = vrot.lane.b32.xlu0 %v2089_v30, %s4555_s22 }
 0x5ff   :  { %2286 = vrot.lane.b32.xlu1 %v3963_v33, %s4555_s22 }
 0x601   :  { %2228 = vrot.lane.b32.xlu0 %v3934_v4, %s4554_s17 }
 0x603   :  { %2218 = vrot.lane.b32.xlu1 %v1655_v18, %s4554_s17  ;;  %v2313_v18 = vsel %vm90_vm0, %v6126_v47, %v2139_v37  ;;  %v2318_v47 = vsel %vm90_vm0, %v6128_v41, %v2149_v45 }
 0x605   :  { %2224 = vrot.lane.b32.xlu0 %v1668_v12, %s4554_s17 }
 0x607   :  { %2282 = vrot.lane.b32.xlu1 %v2092_v48, %s4555_s22 }
 0x609   :  { %2288 = vrot.lane.b32.xlu0 %v2105_v51, %s4555_s22 }
 0x60b   :  { %2230 = vrot.lane.b32.xlu1 %v3935_v38, %s4554_s17 }
 0x60d   :  { %2292 = vrot.lane.b32.xlu0 %v3966_v52, %s4555_s22 }
 0x60f   :  { %2226 = vrot.lane.b32.xlu1 %v1671_v60, %s4554_s17 }
 0x613   :  { %2290 = vrot.lane.b32.xlu1 %v2108_v24, %s4555_s22  ;;  %v2316_v24 = vsel %vm90_vm0, %v6130_v8, %v2145_v29 }
 0x617   :  { %2294 = vrot.lane.b32.xlu1 %v3967_v17, %s4555_s22 }
 0x647   :  { %v2205_v22 = vpop.permute.xlu0 %2204 }
 0x648   :  { %v2331_v9 = vsel %vm2328_vm6, %v2314_v23, %v2205_v22  ;;  %v2319_v22 = vsel %vm90_vm0, %v6132_v46, %v2151_v58 }
 0x649   :  { %v2201_v32 = vpop.permute.xlu1 %2200 }
 0x64a   :  { %v2329_v5 = vsel %vm2328_vm6, %v2312_v1, %v2201_v32 }
 0x64b   :  { %v2269_v40 = vpop.permute.xlu0 %2268 }
 0x64c   :  { %v2348_v62 = vsel %vm2345_vm7, %v2331_v9, %v2269_v40 }
 0x64d   :  { %v2207_v7 = vpop.permute.xlu1 %2206  ;;  %v6246_v49 = vadd.f32 %v6236_v36, %v2348_v62 }
 0x64e   :  { %v2332_v42 = vsel %vm2328_vm6, %v2315_v19, %v2207_v7 }
 0x64f   :  { %v2265_v57 = vpop.permute.xlu0 %2264  ;;  %v2405_v33 = vmul.f32 1.442695, %v6246_v49  ;;  %vm2387_vm11 = vcmp.gt.f32.partialorder %v6246_v49, 0.0 }
 0x650   :  { %v2346_v13 = vsel %vm2345_vm7, %v2329_v5, %v2265_v57 }
 0x651   :  { %v2369_v2 = vadd.f32 %v6236_v36, %v2346_v13  ;;  %v2271_v59 = vpop.permute.xlu1 %2270  ;;  %v2317_v13 = vsel %vm90_vm0, %v6134_v6, %v6209_v50  ;;  %v2322_v6 = vsel %vm90_vm0, %v6136_v44, %v6211_v14 }
 0x652   :  { %v2349_v3 = vsel %vm2345_vm7, %v2332_v42, %v2271_v59 }
 0x653   :  { %v2401_v34 = vmul.f32 1.442695, %v2369_v2  ;;  %v2213_v10 = vpop.permute.xlu0 %2212  ;;  %v6249_v30 = vadd.f32 %v6236_v36, %v2349_v3  ;;  %vm2385_vm9 = vcmp.gt.f32.partialorder %v2369_v2, 0.0 }
 0x654   :  { %v2335_v28 = vsel %vm2328_vm6, %v2318_v47, %v2213_v10 }
 0x655   :  { %4384 = vpow2.f32 %v2401_v34  ;;  %v2203_v0 = vpop.permute.xlu1 %2202  ;;  %v2407_v52 = vmul.f32 1.442695, %v6249_v30  ;;  %vm2388_vm12 = vcmp.gt.f32.partialorder %v6249_v30, 0.0 }
 0x656   :  { %v2330_v4 = vsel %vm2328_vm6, %v2313_v18, %v2203_v0  ;;  %4386 = vpow2.f32 %v2405_v33 }
 0x657   :  { %v2277_v21 = vpop.permute.xlu0 %2276  ;;  %4388 = vpow2.f32 %v2407_v52 }
 0x658   :  { %v2352_v32 = vsel %vm2345_vm7, %v2335_v28, %v2277_v21 }
 0x659   :  { %v2267_v48 = vpop.permute.xlu1 %2266  ;;  %v6275_v5 = vadd.f32 %v6236_v36, %v2352_v32 }
 0x65a   :  { %v2347_v12 = vsel %vm2345_vm7, %v2330_v4, %v2267_v48  ;;  %v2320_v48 = vsel %vm90_vm0, %v6138_v35, %v6215_v16  ;;  %v2323_v35 = vsel %vm90_vm0, %v6140_v53, %v6213_v31 }
 0x65b   :  { %v2370_v51 = vadd.f32 %v6236_v36, %v2347_v12  ;;  %v2209_v38 = vpop.permute.xlu0 %2208  ;;  %v2413_v19 = vmul.f32 1.442695, %v6275_v5  ;;  %vm2391_vm15 = vcmp.gt.f32.partialorder %v6275_v5, 0.0 }
 0x65c   :  { %v2333_v25 = vsel %vm2328_vm6, %v2316_v24, %v2209_v38 }
 0x65d   :  { %v2403_v17 = vmul.f32 1.442695, %v2370_v51  ;;  %v2215_v60 = vpop.permute.xlu1 %2214  ;;  %vm2386_vm10 = vcmp.gt.f32.partialorder %v2370_v51, 0.0 }
 0x65e   :  { %v2336_v41 = vsel %vm2328_vm6, %v2319_v22, %v2215_v60 }
 0x65f   :  { %4390 = vpow2.f32 %v2403_v17  ;;  %v2273_v15 = vpop.permute.xlu0 %2272 }
 0x660   :  { %v2350_v37 = vsel %vm2345_vm7, %v2333_v25, %v2273_v15 }
 0x661   :  { %v6269_v40 = vadd.f32 %v6236_v36, %v2350_v37  ;;  %v2279_v8 = vpop.permute.xlu1 %2278 }
 0x662   :  { %v4385_v29 = vpop.eup %4384  ;;  %v2353_v7 = vsel %vm2345_vm7, %v2336_v41, %v2279_v8 }
 0x663   :  { %v2409_v45 = vmul.f32 1.442695, %v6269_v40  ;;  %v2221_v1 = vpop.permute.xlu0 %2220  ;;  %v3609_v23 = vadd.f32 -1.0, %v4385_v29  ;;  %v6278_v57 = vadd.f32 %v6236_v36, %v2353_v7  ;;  %v4387_v62 = vpop.eup %4386  ;;  %vm2389_vm13 = vcmp.gt.f32.partialorder %v6269_v40, 0.0 }
 0x664   :  { %v4389_v3 = vpop.eup %4388  ;;  %v3611_v18 = vadd.f32 -1.0, %v4387_v62  ;;  %v2339_v44 = vsel %vm2328_vm6, %v2322_v6, %v2221_v1 }
 0x665   :  { %4392 = vpow2.f32 %v2409_v45  ;;  %v2211_v46 = vpop.permute.xlu1 %2210  ;;  %v2449_v58 = vsel %vm2385_vm9, %v2369_v2, %v3609_v23  ;;  %v2415_v34 = vmul.f32 1.442695, %v6278_v57  ;;  %v3612_v17 = vadd.f32 -1.0, %v4389_v3 }
 0x666   :  { %3984 = vmatprep.mubr.msk.f32.mxu1 %vm2473_vm8, %v2449_v58  ;;  %v2334_v59 = vsel %vm2328_vm6, %v2317_v13, %v2211_v46  ;;  %4394 = vpow2.f32 %v2413_v19  ;;  %v2451_v60 = vsel %vm2387_vm11, %v6246_v49, %v3611_v18  ;;  %vm2392_vm1 = vcmp.gt.f32.partialorder %v6278_v57, 0.0 }
 0x667   :  { %v2285_v9 = vpop.permute.xlu0 %2284  ;;  %4396 = vpow2.f32 %v2415_v34  ;;  %v2452_v53 = vsel %vm2388_vm12, %v6249_v30, %v3612_v17  ;;  %v2321_v30 = vsel %vm90_vm0, %v6142_v43, %v6217_v56 }
 0x668   :  { %v2356_v16 = vsel %vm2345_vm7, %v2339_v44, %v2285_v9 }
 0x669   :  { %v2275_v42 = vpop.permute.xlu1 %2274  ;;  %v6318_v37 = vadd.f32 %v6236_v36, %v2356_v16 }
 0x66a   :  { %v2351_v2 = vsel %vm2345_vm7, %v2334_v59, %v2275_v42  ;;  %v2326_v59 = vsel %vm90_vm0, %v6144_v63, %v6219_v20 }
 0x66b   :  { %v6289_v10 = vadd.f32 %v6236_v36, %v2351_v2  ;;  %v2217_v0 = vpop.permute.xlu0 %2216  ;;  %v2421_v41 = vmul.f32 1.442695, %v6318_v37 }
 0x66c   :  { %v4391_v21 = vpop.eup %4390  ;;  %v2337_v12 = vsel %vm2328_vm6, %v2320_v48, %v2217_v0 }
 0x66d   :  { %v3610_v50 = vadd.f32 -1.0, %v4391_v21  ;;  %v2411_v33 = vmul.f32 1.442695, %v6289_v10  ;;  %v2223_v4 = vpop.permute.xlu1 %2222  ;;  %vm2390_vm14 = vcmp.gt.f32.partialorder %v6289_v10, 0.0 }
 0x66e   :  { %v2340_v25 = vsel %vm2328_vm6, %v2323_v35, %v2223_v4 }
 0x66f   :  { %v2450_v52 = vsel %vm2386_vm10, %v2370_v51, %v3610_v50  ;;  %4398 = vpow2.f32 %v2411_v33  ;;  %v2281_v38 = vpop.permute.xlu0 %2280 }
 0x670   :  { %v2354_v14 = vsel %vm2345_vm7, %v2337_v12, %v2281_v38  ;;  %3985 = vmatmul.mubr.msk.f32.vlgmr.msra.gmra.mxu1 %vm2473_vm8, %v2450_v52 }
 0x671   :  { %v6309_v51 = vadd.f32 %v6236_v36, %v2354_v14  ;;  %3987 = vmatprep.mubr.msk.f32.mxu1 %vm2473_vm8, %v2451_v60  ;;  %v2287_v24 = vpop.permute.xlu1 %2286 }
 0x672   :  { %v4393_v47 = vpop.eup %4392  ;;  %v2357_v49 = vsel %vm2345_vm7, %v2340_v25, %v2287_v24 }
 0x673   :  { %v2417_v15 = vmul.f32 1.442695, %v6309_v51  ;;  %v2229_v28 = vpop.permute.xlu0 %2228  ;;  %v3613_v31 = vadd.f32 -1.0, %v4393_v47  ;;  %v6324_v8 = vadd.f32 %v6236_v36, %v2357_v49  ;;  %v4395_v45 = vpop.eup %4394  ;;  %vm2393_vm2 = vcmp.gt.f32.partialorder %v6309_v51, 0.0 }
 0x674   :  { %3988 = vmatmul.mubr.msk.f32.gmra.mxu1 %vm2473_vm8, %v2452_v53  ;;  %v4397_v58 = vpop.eup %4396  ;;  %v3615_v62 = vadd.f32 -1.0, %v4395_v45  ;;  %v2343_v2 = vsel %vm2328_vm6, %v2326_v59, %v2229_v28 }
 0x675   :  { %4400 = vpow2.f32 %v2417_v15  ;;  %v2219_v22 = vpop.permute.xlu1 %2218  ;;  %v2453_v32 = vsel %vm2389_vm13, %v6269_v40, %v3613_v31  ;;  %v2324_v40 = vsel %vm90_vm0, %v6146_v39, %v6223_v26  ;;  %v2423_v23 = vmul.f32 1.442695, %v6324_v8 }
 0x676   :  { %3990 = vmatprep.mubr.msk.f32.mxu1 %vm2473_vm8, %v2453_v32  ;;  %v2338_v7 = vsel %vm2328_vm6, %v2321_v30, %v2219_v22  ;;  %4402 = vpow2.f32 %v2421_v41  ;;  %v3616_v18 = vadd.f32 -1.0, %v4397_v58  ;;  %v2455_v20 = vsel %vm2391_vm15, %v6275_v5, %v3615_v62 }
 0x677   :  { %v2225_v29 = vpop.permute.xlu0 %2224  ;;  %4404 = vpow2.f32 %v2423_v23  ;;  %vm2396_vm4 = vcmp.gt.f32.partialorder %v6324_v8, 0.0 }
 0x678   :  { %v2341_v9 = vsel %vm2328_vm6, %v2324_v40, %v2225_v29  ;;  %v2456_v4 = vsel %vm2392_vm1, %v6278_v57, %v3616_v18 }
 0x679   :  { %v2283_v1 = vpop.permute.xlu1 %2282 }
 0x67a   :  { %v2355_v46 = vsel %vm2345_vm7, %v2338_v7, %v2283_v1  ;;  %v4557_v1 = vmov 19  }
 0x67b   :  { %v2378_v13 = vadd.f32 %v6236_v36, %v2355_v46  ;;  %v2289_v43 = vpop.permute.xlu0 %2288  ;;  %4098 = vset.pattern.permute.xlu1 %v4557_v1 }
 0x67c   :  { %v4399_v56 = vpop.eup %4398  ;;  %v2358_v19 = vsel %vm2345_vm7, %v2341_v9, %v2289_v43 }
 0x67d   :  { %v2419_v39 = vmul.f32 1.442695, %v2378_v13  ;;  %v2381_v26 = vadd.f32 %v6236_v36, %v2358_v19  ;;  %v2231_v42 = vpop.permute.xlu1 %2230  ;;  %v3614_v34 = vadd.f32 -1.0, %v4399_v56  ;;  %vm2394_vm3 = vcmp.gt.f32.partialorder %v2378_v13, 0.0 }
 0x67f   :  { %4406 = vpow2.f32 %v2419_v39  ;;  %v2425_v3 = vmul.f32 1.442695, %v2381_v26  ;;  %v2293_v0 = vpop.permute.xlu0 %2292  ;;  %v2454_v21 = vsel %vm2390_vm14, %v6289_v10, %v3614_v34  ;;  %v2325_v10 = vsel %vm90_vm0, %v6150_v55, %v6225_v11 }
 0x680   :  { %v2360_v63 = vsel %vm2345_vm7, %v2343_v2, %v2293_v0  ;;  %3991 = vmatmul.mubr.msk.f32.gmra.mxu1 %vm2473_vm8, %v2454_v21  ;;  %v2327_v55 = vsel %vm90_vm0, %v6148_v27, %v6221_v54  ;;  %vm2395_vm0 = vcmp.gt.f32.partialorder %v6318_v37, 0.0  ;;  %vm2397_vm5 = vcmp.gt.f32.partialorder %v2381_v26, 0.0 }
 0x681   :  { %4408 = vpow2.f32 %v2425_v3  ;;  %v2383_v6 = vadd.f32 %v6236_v36, %v2360_v63  ;;  %3993 = vmatprep.mubr.msk.f32.mxu1 %vm2473_vm8, %v2455_v20  ;;  %v2227_v50 = vpop.permute.xlu1 %2226  ;;  %v2344_v44 = vsel %vm2328_vm6, %v2327_v55, %v2231_v42 }
 0x682   :  { %v4401_v33 = vpop.eup %4400  ;;  %v2342_v5 = vsel %vm2328_vm6, %v2325_v10, %v2227_v50 }
 0x683   :  { %v3617_v48 = vadd.f32 -1.0, %v4401_v33  ;;  %v2429_v52 = vmul.f32 1.442695, %v2383_v6  ;;  %v4403_v11 = vpop.eup %4402 }
 0x684   :  { %3994 = vmatmul.mubr.msk.f32.gmra.mxu1 %vm2473_vm8, %v2456_v4  ;;  %v4405_v16 = vpop.eup %4404  ;;  %v3619_v47 = vadd.f32 -1.0, %v4403_v11 }
 0x685   :  { %v2291_v12 = vpop.permute.xlu1 %2290  ;;  %v2457_v38 = vsel %vm2393_vm2, %v6309_v51, %v3617_v48  ;;  %4410 = vpow2.f32 %v2429_v52  ;;  %v3620_v54 = vadd.f32 -1.0, %v4405_v16 }
 0x686   :  { %v2359_v17 = vsel %vm2345_vm7, %v2342_v5, %v2291_v12  ;;  %3996 = vmatprep.mubr.msk.f32.mxu1 %vm2473_vm8, %v2457_v38  ;;  %v2459_v28 = vsel %vm2395_vm0, %v6318_v37, %v3619_v47 }
 0x687   :  { %v2382_v57 = vadd.f32 %v6236_v36, %v2359_v17 }
 0x689   :  { %v2427_v14 = vmul.f32 1.442695, %v2382_v57  ;;  %v2295_v60 = vpop.permute.xlu1 %2294  ;;  %vm2398_vm6 = vcmp.gt.f32.partialorder %v2382_v57, 0.0 }
 0x68a   :  { %v2361_v35 = vsel %vm2345_vm7, %v2344_v44, %v2295_v60  ;;  %vm2399_vm7 = vcmp.gt.f32.partialorder %v2383_v6, 0.0 }
 0x68b   :  { %4412 = vpow2.f32 %v2427_v14  ;;  %v2384_v51 = vadd.f32 %v6236_v36, %v2361_v35  ;;  %v2460_v36 = vsel %vm2396_vm4, %v6324_v8, %v3620_v54 }
 0x68c   :  { %v4407_v24 = vpop.eup %4406 }
 0x68d   :  { %v2431_v25 = vmul.f32 1.442695, %v2384_v51  ;;  %v3618_v15 = vadd.f32 -1.0, %v4407_v24  ;;  %vm2400_vm9 = vcmp.gt.f32.partialorder %v2384_v51, 0.0 }
 0x68e   :  { %v4409_v49 = vpop.eup %4408 }
 0x68f   :  { %4414 = vpow2.f32 %v2431_v25  ;;  %v2458_v27 = vsel %vm2394_vm3, %v2378_v13, %v3618_v15  ;;  %v3621_v53 = vadd.f32 -1.0, %v4409_v49 }
 0x690   :  { %3997 = vmatmul.mubr.msk.f32.gmra.mxu1 %vm2473_vm8, %v2458_v27 }
 0x691   :  { %3999 = vmatprep.mubr.msk.f32.mxu1 %vm2473_vm8, %v2459_v28  ;;  %v2461_v31 = vsel %vm2397_vm5, %v2381_v26, %v3621_v53 }
 0x692   :  { %v4411_v22 = vpop.eup %4410 }
 0x693   :  { %v3623_v29 = vadd.f32 -1.0, %v4411_v22 }
 0x694   :  { %4000 = vmatmul.mubr.msk.f32.gmra.mxu1 %vm2473_vm8, %v2460_v36 }
 0x695   :  { %4002 = vmatprep.mubr.msk.f32.mxu1 %vm2473_vm8, %v2461_v31  ;;  %v2463_v45 = vsel %vm2399_vm7, %v2383_v6, %v3623_v29 }
 0x698   :  { %v4413_v32 = vpop.eup %4412 }
 0x699   :  { %v3622_v30 = vadd.f32 -1.0, %v4413_v32 }
 0x69b   :  { %v2462_v41 = vsel %vm2398_vm6, %v2382_v57, %v3622_v30 }
 0x69c   :  { %v4415_v37 = vpop.eup %4414  ;;  %4003 = vmatmul.mubr.msk.f32.gmra.mxu1 %vm2473_vm8, %v2462_v41 }
 0x69d   :  { %4005 = vmatprep.mubr.msk.f32.mxu1 %vm2473_vm8, %v2463_v45  ;;  %v3624_v8 = vadd.f32 -1.0, %v4415_v37 }
 0x69f   :  { %v2464_v7 = vsel %vm2400_vm9, %v2384_v51, %v3624_v8 }
 0x6a0   :  { %4006 = vmatmul.mubr.msk.f32.gmra.mxu1 %vm2473_vm8, %v2464_v7 }
 0x730   :  { %v3986_v40 = vpop.f32.mrf.mxu1 }
 0x731   :  { %2776 = vperm.xlu0 %4099, %v3986_v40   ;;  %2693 = vrot.lane.b32.xlu1 %v3986_v40, %s4549_s0 }
 0x732   :  { %v2588_v23 = vpop.f32.mrf.mxu1 }
 0x733   :  { %v6384_v46 = vpack.c.bf16 %v3986_v40, %v2588_v23 }
 0x734   :  { %v3989_v58 = vpop.f32.mrf.mxu1 }
 0x735   :  { %3092 = vperm.xlu1 %4098, %v3986_v40   ;;  %2691 = vrot.lane.b32.xlu0 %v2588_v23, %s4549_s0 }
 0x736   :  { %v2598_v9 = vpop.f32.mrf.mxu1  ;;  %4100 = vset.pattern.permute.xlu0 %v4557_v1 }
 0x737   :  { %v6388_v13 = vpack.c.bf16 %v3989_v58, %v2598_v9 }
 0x739   :  { %4101 = vset.pattern.permute.xlu1 %v4556_v61  ;;  %3088 = vperm.xlu0 %4100, %v2588_v23  }
 0x73a   :  { %2772 = vperm.xlu1 %4101, %v2588_v23  }
 0x73d   :  { %2695 = vrot.lane.b32.xlu0 %v2598_v9, %s4549_s0 }
 0x73e   :  { %2697 = vrot.lane.b32.xlu1 %v3989_v58, %s4549_s0  ;;  %4105 = vset.pattern.permute.xlu0 %v4556_v61 }
 0x73f   :  { %4102 = vset.pattern.permute.xlu1 %v4557_v1 }
 0x740   :  { %v3992_v43 = vpop.f32.mrf.mxu1 }
 0x741   :  { %2780 = vperm.xlu0 %4105, %v2598_v9  }
 0x742   :  { %3100 = vperm.xlu1 %4102, %v3989_v58   ;;  %v2608_v56 = vpop.f32.mrf.mxu1 }
 0x743   :  { %v6415_v21 = vpack.c.bf16 %v3992_v43, %v2608_v56 }
 0x744   :  { %v3995_v19 = vpop.f32.mrf.mxu1 }
 0x745   :  { %2792 = vperm.xlu0 %4105, %v3992_v43  }
 0x746   :  { %4103 = vset.pattern.permute.xlu1 %v4556_v61  ;;  %v2618_v62 = vpop.f32.mrf.mxu1 }
 0x747   :  { %v6396_v59 = vpack.c.bf16 %v3995_v19, %v2618_v62  ;;  %2784 = vperm.xlu1 %4103, %v3989_v58  }
 0x749   :  { %2699 = vrot.lane.b32.xlu0 %v2608_v56, %s4549_s0 }
 0x74a   :  { %4106 = vset.pattern.permute.xlu0 %v4557_v1 }
 0x74b   :  { %4104 = vset.pattern.permute.xlu1 %v4557_v1 }
 0x74c   :  { %3096 = vperm.xlu1 %4104, %v2598_v9  }
 0x74d   :  { %3104 = vperm.xlu0 %4106, %v2608_v56  }
 0x750   :  { %2701 = vrot.lane.b32.xlu1 %v3992_v43, %s4549_s0  ;;  %v3998_v39 = vpop.f32.mrf.mxu1 }
 0x751   :  { %2703 = vrot.lane.b32.xlu0 %v2618_v62, %s4549_s0 }
 0x752   :  { %4111 = vset.pattern.permute.xlu0 %v4556_v61  ;;  %v2628_v26 = vpop.f32.mrf.mxu1 }
 0x753   :  { %v6406_v34 = vpack.c.bf16 %v3998_v39, %v2628_v26 }
 0x754   :  { %3108 = vperm.xlu1 %4104, %v3992_v43   ;;  %v4001_v42 = vpop.f32.mrf.mxu1 }
 0x755   :  { %2796 = vperm.xlu0 %4111, %v2618_v62  }
 0x756   :  { %v2638_v2 = vpop.f32.mrf.mxu1 }
 0x757   :  { %v6442_v6 = vpack.c.bf16 %v4001_v42, %v2638_v2 }
 0x758   :  { %4107 = vset.pattern.permute.xlu1 %v4556_v61 }
 0x759   :  { %2788 = vperm.xlu1 %4107, %v2608_v56   ;;  %2707 = vrot.lane.b32.xlu0 %v2628_v26, %s4549_s0 }
 0x75c   :  { %v4004_v3 = vpop.f32.mrf.mxu1 }
 0x75d   :  { %2705 = vrot.lane.b32.xlu1 %v3995_v19, %s4549_s0  ;;  %3419 = vrot.lane.b32.xlu0 %v6406_v34, %s4558_s3 }
 0x75e   :  { %4108 = vset.pattern.permute.xlu1 %v4557_v1  ;;  %v2648_v0 = vpop.f32.mrf.mxu1 }
 0x75f   :  { %v6420_v18 = vpack.c.bf16 %v4004_v3, %v2648_v0 }
 0x760   :  { %v6422_v63 = vpop.f32.mrf.mxu1 }
 0x761   :  { %3116 = vperm.xlu1 %4108, %v3995_v19   ;;  %2711 = vrot.lane.b32.xlu0 %v2638_v2, %s4549_s0 }
 0x762   :  { %v6427_v20 = vpop.f32.mrf.mxu1 }
 0x763   :  { %v2674_v51 = vpack.c.bf16 %v6422_v63, %v6427_v20 }
 0x765   :  { %4109 = vset.pattern.permute.xlu1 %v4556_v61  ;;  %2715 = vrot.lane.b32.xlu0 %v2648_v0, %s4549_s0 }
 0x766   :  { %2800 = vperm.xlu1 %4109, %v3995_v19  }
 0x769   :  { %3415 = vrot.lane.b32.xlu0 %v6415_v21, %s4558_s3 }
 0x76a   :  { %4110 = vset.pattern.permute.xlu1 %v4557_v1 }
 0x76b   :  { %3112 = vperm.xlu1 %4110, %v2618_v62  }
 0x76d   :  { %3423 = vrot.lane.b32.xlu0 %v6420_v18, %s4558_s3 }
 0x76f   :  { %2709 = vrot.lane.b32.xlu1 %v3998_v39, %s4549_s0 }
 0x771   :  { %2719 = vrot.lane.b32.xlu0 %v6427_v20, %s4549_s0 }
 0x773   :  { %3124 = vperm.xlu1 %4110, %v3998_v39  }
 0x777   :  { %4112 = vset.pattern.permute.xlu1 %v4556_v61 }
 0x778   :  { %2808 = vperm.xlu1 %4112, %v3998_v39  }
 0x77c   :  { %4113 = vset.pattern.permute.xlu1 %v4557_v1 }
 0x77d   :  { %3120 = vperm.xlu1 %4113, %v2628_v26  }
 0x781   :  { %4114 = vset.pattern.permute.xlu1 %v4556_v61 }
 0x782   :  { %2804 = vperm.xlu1 %4114, %v2628_v26  }
 0x786   :  { %2713 = vrot.lane.b32.xlu1 %v4001_v42, %s4549_s0 }
 0x787   :  { %4115 = vset.pattern.permute.xlu1 %v4557_v1 }
 0x78a   :  { %3132 = vperm.xlu1 %4115, %v4001_v42  }
 0x78e   :  { %4116 = vset.pattern.permute.xlu1 %v4556_v61 }
 0x78f   :  { %2816 = vperm.xlu1 %4116, %v4001_v42  }
 0x793   :  { %4117 = vset.pattern.permute.xlu1 %v4557_v1 }
 0x794   :  { %3128 = vperm.xlu1 %4117, %v2638_v2  }
 0x798   :  { %4118 = vset.pattern.permute.xlu1 %v4556_v61 }
 0x799   :  { %2812 = vperm.xlu1 %4118, %v2638_v2  }
 0x79d   :  { %2717 = vrot.lane.b32.xlu1 %v4004_v3, %s4549_s0 }
 0x79e   :  { %4119 = vset.pattern.permute.xlu1 %v4557_v1 }
 0x7a1   :  { %3140 = vperm.xlu1 %4119, %v4004_v3  }
 0x7a3   :  { %v2694_v50 = vpop.permute.xlu1 %2693 }
 0x7a5   :  { %4120 = vset.pattern.permute.xlu1 %v4556_v61 }
 0x7a6   :  { %2824 = vperm.xlu1 %4120, %v4004_v3  }
 0x7aa   :  { %3421 = vrot.lane.b32.xlu1 %v6442_v6, %s4558_s3 }
 0x7ab   :  { %4121 = vset.pattern.permute.xlu1 %v4557_v1 }
 0x7ac   :  { %v6447_v33 = vpop.permute.xlu0 %2776 }
 0x7ae   :  { %3136 = vperm.xlu1 %4121, %v2648_v0  }
 0x7b0   :  { %v6449_v4 = vpop.permute.xlu1 %3092  ;;  %v2692_v48 = vpop.permute.xlu0 %2691 }
 0x7b1   :  { %2739 = vxpose.xlu0.b32.start [1/16] (narrow) %v2692_v48, 8 }
 0x7b2   :  { %4122 = vset.pattern.permute.xlu1 %v4556_v61 }
 0x7b3   :  { %2820 = vperm.xlu1 %4122, %v2648_v0  }
 0x7b4   :  { %v6452_v10 = vpop.permute.xlu0 %3088 }
 0x7b5   :  { %v6454_v52 = vpop.permute.xlu1 %2772  ;;  %2740 = vxpose.xlu0.b32.cont [2/16] (narrow) %v2694_v50, 8 }
 0x7b7   :  { %2721 = vrot.lane.b32.xlu1 %v6422_v63, %s4549_s0 }
 0x7b8   :  { %v2696_v5 = vpop.permute.xlu0 %2695  ;;  %4123 = vset.pattern.permute.xlu1 %v4557_v1 }
 0x7b9   :  { %v2698_v12 = vpop.permute.xlu1 %2697  ;;  %2741 = vxpose.xlu0.b32.cont [3/16] (narrow) %v2696_v5, 8 }
 0x7bb   :  { %3417 = vrot.lane.b32.xlu1 %v6396_v59, %s4558_s3 }
 0x7bc   :  { %v6461_v38 = vpop.permute.xlu0 %2780 }
 0x7bd   :  { %v6463_v17 = vpop.permute.xlu1 %3100  ;;  %2742 = vxpose.xlu0.b32.cont [4/16] (narrow) %v2698_v12, 8 }
 0x7bf   :  { %3148 = vperm.xlu1 %4123, %v6422_v63  }
 0x7c0   :  { %v6466_v57 = vpop.permute.xlu0 %2792 }
 0x7c2   :  { %v6468_v55 = vpop.permute.xlu1 %2784 }
 0x7c3   :  { %4124 = vset.pattern.permute.xlu1 %v4556_v61 }
 0x7c4   :  { %v2700_v11 = vpop.permute.xlu0 %2699  ;;  %2832 = vperm.xlu1 %4124, %v6422_v63  }
 0x7c5   :  { %2743 = vxpose.xlu0.b32.cont [5/16] (narrow) %v2700_v11, 8 }
 0x7c7   :  { %v6472_v44 = vpop.permute.xlu1 %3096 }
 0x7c8   :  { %4125 = vset.pattern.permute.xlu1 %v4557_v1  ;;  %v6475_v14 = vpop.permute.xlu0 %3104 }
 0x7c9   :  { %3144 = vperm.xlu1 %4125, %v6427_v20  }
 0x7cb   :  { %v2702_v60 = vpop.permute.xlu1 %2701 }
 0x7cc   :  { %2744 = vxpose.xlu0.b32.cont [6/16] (narrow) %v2702_v60, 8  ;;  %v2704_v35 = vpop.permute.xlu0 %2703 }
 0x7cd   :  { %4126 = vset.pattern.permute.xlu1 %v4556_v61 }
 0x7ce   :  { %2828 = vperm.xlu1 %4126, %v6427_v20   ;;  %v7281_v20 = vld [vmem:[#allocation32_spill] sm:$0xff] }
 0x7cf   :  { %v6480_v16 = vpop.permute.xlu1 %3108 }
 0x7d0   :  { %2745 = vxpose.xlu0.b32.cont [7/16] (narrow) %v2704_v35, 8  ;;  %v6487_v47 = vpop.permute.xlu0 %2796 }
 0x7d2   :  { %3425 = vrot.lane.b32.xlu1 %v2674_v51, %s4558_s3 }
 0x7d4   :  { %v6485_v24 = vpop.permute.xlu1 %2788  ;;  %v2708_v15 = vpop.permute.xlu0 %2707 }
 0x7d8   :  { %v2706_v25 = vpop.permute.xlu1 %2705  ;;  %v3420_v54 = vpop.permute.xlu0 %3419 }
 0x7d9   :  { %2746 = vxpose.xlu0.b32.cont [8/16] (narrow) %v2706_v25, 8 }
 0x7dc   :  { %v6489_v49 = vpop.permute.xlu1 %3116  ;;  %v2712_v53 = vpop.permute.xlu0 %2711 }
 0x7dd   :  { %2747 = vxpose.xlu0.b32.cont [9/16] (narrow) %v2708_v15, 8 }
 0x7e0   :  { %v2716_v30 = vpop.permute.xlu0 %2715 }
 0x7e1   :  { %v6491_v61 = vpop.permute.xlu1 %2800 }
 0x7e4   :  { %v3416_v8 = vpop.permute.xlu0 %3415 }
 0x7e6   :  { %v6493_v27 = vpop.permute.xlu1 %3112 }
 0x7e8   :  { %v3424_v40 = vpop.permute.xlu0 %3423 }
 0x7ea   :  { %v2710_v28 = vpop.permute.xlu1 %2709 }
 0x7eb   :  { %2748 = vxpose.xlu0.b32.cont [10/16] (narrow) %v2710_v28, 8 }
 0x7ec   :  { %v2720_v58 = vpop.permute.xlu0 %2719 }
 0x7ee   :  { %v6495_v36 = vpop.permute.xlu1 %3124 }
 0x7ef   :  { %2749 = vxpose.xlu0.b32.cont [11/16] (narrow) %v2712_v53, 8 }
 0x7f3   :  { %v6497_v31 = vpop.permute.xlu1 %2808 }
 0x7f8   :  { %v6499_v22 = vpop.permute.xlu1 %3120 }
 0x7fd   :  { %v6501_v32 = vpop.permute.xlu1 %2804 }
 0x801   :  { %v2714_v29 = vpop.permute.xlu1 %2713 }
 0x802   :  { %2750 = vxpose.xlu0.b32.cont [12/16] (narrow) %v2714_v29, 8 }
 0x805   :  { %v6503_v41 = vpop.permute.xlu1 %3132 }
 0x806   :  { %2751 = vxpose.xlu0.b32.cont [13/16] (narrow) %v2716_v30, 8 }
 0x80a   :  { %v6505_v37 = vpop.permute.xlu1 %2816 }
 0x80f   :  { %v6507_v45 = vpop.permute.xlu1 %3128 }
 0x814   :  { %v6509_v7 = vpop.permute.xlu1 %2812 }
 0x818   :  { %v2718_v23 = vpop.permute.xlu1 %2717 }
 0x819   :  { %2752 = vxpose.xlu0.b32.cont [14/16] (narrow) %v2718_v23, 8 }
 0x81c   :  { %v6511_v9 = vpop.permute.xlu1 %3140 }
 0x81d   :  { %2753 = vxpose.xlu0.b32.cont [15/16] (narrow) %v2720_v58, 8 }
 0x821   :  { %v6513_v43 = vpop.permute.xlu1 %2824 }
 0x825   :  { %v3422_v56 = vpop.permute.xlu1 %3421 }
 0x829   :  { %v6515_v19 = vpop.permute.xlu1 %3136 }
 0x82e   :  { %v6517_v62 = vpop.permute.xlu1 %2820 }
 0x832   :  { %v2722_v39 = vpop.permute.xlu1 %2721 }
 0x833   :  { %2754 = vxpose.xlu0.b32.end [16/16] (narrow) %v2722_v39, 8 }
 0x836   :  { %v3418_v26 = vpop.permute.xlu1 %3417 }
 0x83a   :  { %v6519_v42 = vpop.permute.xlu1 %3148 }
 0x83f   :  { %v6521_v2 = vpop.permute.xlu1 %2832 }
 0x844   :  { %v6523_v3 = vpop.permute.xlu1 %3144 }
 0x849   :  { %v6525_v0 = vpop.permute.xlu1 %2828 }
 0x84d   :  { %v3426_v63 = vpop.permute.xlu1 %3425 }
 0x84e   :  { %3748 = vmatprep.subr.bf16.mxu0 %v3426_v63  ;;  %4008 = vmatprep.subr.bf16.mxu1 %v3426_v63  ;;  %v7287_v63 = vld [vmem:[#allocation42_spill] sm:$0xff] }
 0x84f   :  { %3749 = vmatpush3.bf16.msra.mxu0 %v2674_v51  ;;  %4016 = vmatpush3.bf16.msra.mxu1 %v2674_v51 }
 0x850   :  { %3750 = vmatprep.subr.bf16.mxu0 %v3424_v40  ;;  %4009 = vmatprep.subr.bf16.mxu1 %v3424_v40 }
 0x853   :  { %3751 = vmatpush3.bf16.msra.mxu0 %v6420_v18  ;;  %4017 = vmatpush3.bf16.msra.mxu1 %v6420_v18 }
 0x854   :  { %3752 = vmatprep.subr.bf16.mxu0 %v3422_v56  ;;  %4010 = vmatprep.subr.bf16.mxu1 %v3422_v56 }
 0x857   :  { %3753 = vmatpush3.bf16.msra.mxu0 %v6442_v6  ;;  %4018 = vmatpush3.bf16.msra.mxu1 %v6442_v6  ;;  %v7282_v6 = vsub.s32 0, %v7281_v20 }
 0x858   :  { %3754 = vmatprep.subr.bf16.mxu0 %v3420_v54  ;;  %4011 = vmatprep.subr.bf16.mxu1 %v3420_v54 }
 0x85b   :  { %3755 = vmatpush3.bf16.msra.mxu0 %v6406_v34  ;;  %4019 = vmatpush3.bf16.msra.mxu1 %v6406_v34  ;;  %v7283_v34 = vsub.s32 1, %v7281_v20 }
 0x85c   :  { %3756 = vmatprep.subr.bf16.mxu0 %v3418_v26  ;;  %4012 = vmatprep.subr.bf16.mxu1 %v3418_v26 }
 0x85d   :  { %4127 = vset.pattern.permute.xlu0 %v4557_v1 }
 0x85f   :  { %3757 = vmatpush3.bf16.msra.mxu0 %v6396_v59  ;;  %4020 = vmatpush3.bf16.msra.mxu1 %v6396_v59 }
 0x860   :  { %3758 = vmatprep.subr.bf16.mxu0 %v3416_v8  ;;  %4013 = vmatprep.subr.bf16.mxu1 %v3416_v8 }
 0x863   :  { %3759 = vmatpush3.bf16.msra.mxu0 %v6415_v21  ;;  %4021 = vmatpush3.bf16.msra.mxu1 %v6415_v21 }
 0x873   :  { %v2755_v18 = vpop.trf.xlu0 }
 0x874   :  { %v6540_v50 = vrot.slane %v2755_v18, %v7282_v6  ;;  %v6544_v48 = vrot.slane %v2755_v18, %v7283_v34 }
 0x876   :  { %v3156_v1 = vadd.f32 %v6544_v48, %v6449_v4  ;;  %v3155_v59 = vadd.f32 %v6544_v48, %v6452_v10  ;;  %v2844_v5 = vadd.f32 %v6540_v50, %v6466_v57  ;;  %v2839_v21 = vadd.f32 %v6540_v50, %v6454_v52  ;;  %v7284_v52 = vld [vmem:[#allocation33_spill] sm:$0xff] }
 0x877   :  { %v3162_v12 = vadd.f32 %v6544_v48, %v6489_v49  ;;  %v2840_v11 = vadd.f32 %v6540_v50, %v6447_v33  ;;  %v2846_v57 = vadd.f32 %v6540_v50, %v6491_v61  ;;  %v7285_v49 = vld [vmem:[#allocation34_spill] sm:$0xff]  ;;  %v3157_v29 = vadd.f32 %v6544_v48, %v6472_v44 }
 0x878   :  { %vm3172_vm8 = vcmp.gt.f32.partialorder %v3156_v1, 0.0  ;;  %v3188_v60 = vmul.f32 0.2, %v3156_v1  ;;  %vm3171_vm10 = vcmp.gt.f32.partialorder %v3155_v59, 0.0  ;;  %v3187_v35 = vmul.f32 0.2, %v3155_v59 }
 0x879   :  { %vm2860_vm11 = vcmp.gt.f32.partialorder %v2844_v5, 0.0  ;;  %v2876_v4 = vmul.f32 0.2, %v2844_v5  ;;  %vm2855_vm12 = vcmp.gt.f32.partialorder %v2839_v21, 0.0  ;;  %v2871_v10 = vmul.f32 0.2, %v2839_v21 }
 0x87a   :  { %v3204_v51 = vsel %vm3172_vm8, %v3156_v1, %v3188_v60  ;;  %v3203_v25 = vsel %vm3171_vm10, %v3155_v59, %v3187_v35  ;;  %v3194_v28 = vmul.f32 0.2, %v3162_v12  ;;  %vm3178_vm13 = vcmp.gt.f32.partialorder %v3162_v12, 0.0  ;;  %v7286_v61 = vld [vmem:[#allocation38_spill] sm:$0xff] }
 0x87b   :  { %v6561_v15 = vadd.f32 %v3204_v51, %v7284_v52  ;;  %v6564_v54 = vadd.f32 %v3203_v25, %v7285_v49  ;;  %v2892_v33 = vsel %vm2860_vm11, %v2844_v5, %v2876_v4  ;;  %v2887_v53 = vsel %vm2855_vm12, %v2839_v21, %v2871_v10  ;;  %v7288_v21 = vld [vmem:[#allocation36_spill] sm:$0xff]  ;;  %v7289_v10 = vld [vmem:[#allocation46_spill] sm:$0xff]  ;;  %v7290_v25 = vld [vmem:[#allocation35_spill] sm:$0xff] }
 0x87c   :  { %vm2856_vm14 = vcmp.gt.f32.partialorder %v2840_v11, 0.0  ;;  %v2872_v30 = vmul.f32 0.2, %v2840_v11  ;;  %v6571_v8 = vadd.f32 %v2892_v33, %v7286_v61  ;;  %v6574_v40 = vadd.f32 %v2887_v53, %v7285_v49  ;;  %v7291_v53 = vld [vmem:[#allocation54_spill] sm:$0xff] }
 0x87d   :  { %3237 = vmax.xlane.f32.xlu0 %v6561_v15  ;;  %3235 = vmax.xlane.f32.xlu1 %v6564_v54  ;;  %v3210_v23 = vsel %vm3178_vm13, %v3162_v12, %v3194_v28  ;;  %v2878_v58 = vmul.f32 0.2, %v2846_v57  ;;  %v3164_v56 = vadd.f32 %v6544_v48, %v6495_v36  ;;  %vm2862_vm15 = vcmp.gt.f32.partialorder %v2846_v57, 0.0 }
 0x87e   :  { %v2888_v39 = vsel %vm2856_vm14, %v2840_v11, %v2872_v30  ;;  %v3189_v44 = vmul.f32 0.2, %v3157_v29  ;;  %v3158_v26 = vadd.f32 %v6544_v48, %v6463_v17  ;;  %vm3173_vm1 = vcmp.gt.f32.partialorder %v3157_v29, 0.0 }
 0x87f   :  { %v6583_v18 = vadd.f32 %v3210_v23, %v7287_v63  ;;  %v6586_v20 = vadd.f32 %v2888_v39, %v7284_v52  ;;  %v2894_v6 = vsel %vm2862_vm15, %v2846_v57, %v2878_v58  ;;  %v3196_v34 = vmul.f32 0.2, %v3164_v56 }
 0x880   :  { %v3168_v36 = vadd.f32 %v6544_v48, %v6511_v9  ;;  %v3205_v1 = vsel %vm3173_vm1, %v3157_v29, %v3189_v44  ;;  %vm3180_vm2 = vcmp.gt.f32.partialorder %v3164_v56, 0.0  ;;  %v3190_v59 = vmul.f32 0.2, %v3158_v26 }
 0x881   :  { %2929 = vmax.xlane.f32.xlu0 %v6571_v8  ;;  %2919 = vmax.xlane.f32.xlu1 %v6574_v40  ;;  %v2841_v17 = vadd.f32 %v6540_v50, %v6461_v38  ;;  %vm3174_vm3 = vcmp.gt.f32.partialorder %v3158_v26, 0.0  ;;  %v6595_v5 = vadd.f32 %v2894_v6, %v7287_v63  ;;  %v6598_v12 = vadd.f32 %v3205_v1, %v7288_v21  ;;  %v7292_v1 = vld [vmem:[#allocation40_spill] sm:$0xff] }
 0x882   :  { %v3212_v11 = vsel %vm3180_vm2, %v3164_v56, %v3196_v34  ;;  %v3200_v60 = vmul.f32 0.2, %v3168_v36  ;;  %v2848_v9 = vadd.f32 %v6540_v50, %v6497_v31  ;;  %v3206_v35 = vsel %vm3174_vm3, %v3158_v26, %v3190_v59 }
 0x883   :  { %vm3184_vm0 = vcmp.gt.f32.partialorder %v3168_v36, 0.0  ;;  %v2873_v4 = vmul.f32 0.2, %v2841_v17  ;;  %v2842_v38 = vadd.f32 %v6540_v50, %v6468_v55  ;;  %vm2857_vm4 = vcmp.gt.f32.partialorder %v2841_v17, 0.0 }
 0x884   :  { %v6607_v51 = vadd.f32 %v3212_v11, %v7289_v10  ;;  %v6610_v57 = vadd.f32 %v3206_v35, %v7290_v25  ;;  %v3216_v52 = vsel %vm3184_vm0, %v3168_v36, %v3200_v60  ;;  %v2880_v49 = vmul.f32 0.2, %v2848_v9  ;;  %v7293_v35 = vld [vmem:[#allocation50_spill] sm:$0xff] }
 0x885   :  { %3249 = vmax.xlane.f32.xlu0 %v6583_v18  ;;  %2921 = vmax.xlane.f32.xlu1 %v6586_v20  ;;  %v2852_v31 = vadd.f32 %v6540_v50, %v6513_v43  ;;  %v2889_v33 = vsel %vm2857_vm4, %v2841_v17, %v2873_v4  ;;  %vm2864_vm5 = vcmp.gt.f32.partialorder %v2848_v9, 0.0  ;;  %v2874_v28 = vmul.f32 0.2, %v2842_v38 }
 0x886   :  { %v3159_v55 = vadd.f32 %v6544_v48, %v6475_v14  ;;  %vm2858_vm6 = vcmp.gt.f32.partialorder %v2842_v38, 0.0  ;;  %v6619_v29 = vadd.f32 %v3216_v52, %v7291_v53  ;;  %v6622_v30 = vadd.f32 %v2889_v33, %v7288_v21 }
 0x887   :  { %v2896_v23 = vsel %vm2864_vm5, %v2848_v9, %v2880_v49  ;;  %v2884_v58 = vmul.f32 0.2, %v2852_v31  ;;  %v3166_v43 = vadd.f32 %v6544_v48, %v6503_v41  ;;  %v2890_v56 = vsel %vm2858_vm6, %v2842_v38, %v2874_v28 }
 0x888   :  { %vm2868_vm7 = vcmp.gt.f32.partialorder %v2852_v31, 0.0  ;;  %v3191_v39 = vmul.f32 0.2, %v3159_v55  ;;  %v3160_v14 = vadd.f32 %v6544_v48, %v6480_v16  ;;  %vm3175_vm9 = vcmp.gt.f32.partialorder %v3159_v55, 0.0 }
 0x889   :  { %2933 = vmax.xlane.f32.xlu0 %v6595_v5  ;;  %3239 = vmax.xlane.f32.xlu1 %v6598_v12  ;;  %v3170_v44 = vadd.f32 %v6544_v48, %v6519_v42  ;;  %v6633_v26 = vadd.f32 %v2896_v23, %v7289_v10  ;;  %v6636_v63 = vadd.f32 %v2890_v56, %v7290_v25  ;;  %v3198_v6 = vmul.f32 0.2, %v3166_v43 }
 0x88a   :  { %v2900_v41 = vsel %vm2868_vm7, %v2852_v31, %v2884_v58  ;;  %v3207_v34 = vsel %vm3175_vm9, %v3159_v55, %v3191_v39  ;;  %vm3182_vm8 = vcmp.gt.f32.partialorder %v3166_v43, 0.0  ;;  %v3192_v36 = vmul.f32 0.2, %v3160_v14  ;;  %v7294_v31 = vld [vmem:[#allocation57_spill] sm:$0xff]  ;;  %v7295_v58 = vld [vmem:[#allocation43_spill] sm:$0xff] }
 0x88b   :  { %v2843_v16 = vadd.f32 %v6540_v50, %v6485_v24  ;;  %vm3176_vm10 = vcmp.gt.f32.partialorder %v3160_v14, 0.0  ;;  %v6643_v42 = vadd.f32 %v2900_v41, %v7291_v53  ;;  %v6646_v59 = vadd.f32 %v3207_v34, %v7292_v1 }
 0x88c   :  { %v3214_v17 = vsel %vm3182_vm8, %v3166_v43, %v3198_v6  ;;  %vm3186_vm11 = vcmp.gt.f32.partialorder %v3170_v44, 0.0  ;;  %v3202_v21 = vmul.f32 0.2, %v3170_v44  ;;  %v3208_v11 = vsel %vm3176_vm10, %v3160_v14, %v3192_v36 }
 0x88d   :  { %3253 = vmax.xlane.f32.xlu0 %v6607_v51  ;;  %3241 = vmax.xlane.f32.xlu1 %v6610_v57  ;;  %v2875_v60 = vmul.f32 0.2, %v2843_v16  ;;  %v2850_v9 = vadd.f32 %v6540_v50, %v6505_v37  ;;  %v3161_v24 = vadd.f32 %v6544_v48, %v6493_v27  ;;  %vm2859_vm12 = vcmp.gt.f32.partialorder %v2843_v16, 0.0 }
 0x88e   :  { %v6655_v4 = vadd.f32 %v3214_v17, %v7293_v35  ;;  %v6658_v38 = vadd.f32 %v3208_v11, %v7286_v61  ;;  %v3218_v10 = vsel %vm3186_vm11, %v3170_v44, %v3202_v21  ;;  %v2854_v25 = vadd.f32 %v6540_v50, %v6521_v2  ;;  %v7297_v11 = vld [vmem:[#allocation55_spill] sm:$0xff] }
 0x88f   :  { %v2891_v52 = vsel %vm2859_vm12, %v2843_v16, %v2875_v60  ;;  %v2882_v37 = vmul.f32 0.2, %v2850_v9  ;;  %v3193_v49 = vmul.f32 0.2, %v3161_v24  ;;  %v2845_v27 = vadd.f32 %v6540_v50, %v6487_v47 }
 0x890   :  { %vm2866_vm13 = vcmp.gt.f32.partialorder %v2850_v9, 0.0  ;;  %vm3177_vm14 = vcmp.gt.f32.partialorder %v3161_v24, 0.0  ;;  %v6667_v33 = vadd.f32 %v3218_v10, %v7294_v31  ;;  %v6670_v61 = vadd.f32 %v2891_v52, %v7292_v1 }
 0x891   :  { %3261 = vmax.xlane.f32.xlu0 %v6619_v29  ;;  %2923 = vmax.xlane.f32.xlu1 %v6622_v30  ;;  %v3163_v2 = vadd.f32 %v6544_v48, %v6499_v22  ;;  %v2898_v28 = vsel %vm2866_vm13, %v2850_v9, %v2882_v37  ;;  %v3209_v55 = vsel %vm3177_vm14, %v3161_v24, %v3193_v49  ;;  %v2886_v53 = vmul.f32 0.2, %v2854_v25 }
 0x892   :  { %v2877_v23 = vmul.f32 0.2, %v2845_v27  ;;  %vm2870_vm15 = vcmp.gt.f32.partialorder %v2854_v25, 0.0  ;;  %vm2861_vm1 = vcmp.gt.f32.partialorder %v2845_v27, 0.0  ;;  %v6677_v47 = vadd.f32 %v2898_v28, %v7293_v35 }
 0x893   :  { %v6680_v43 = vadd.f32 %v3209_v55, %v7295_v58  ;;  %v2902_v56 = vsel %vm2870_vm15, %v2854_v25, %v2886_v53  ;;  %v3195_v14 = vmul.f32 0.2, %v3163_v2  ;;  %v3167_v22 = vadd.f32 %v6544_v48, %v6515_v19  ;;  %v7296_v19 = vld [vmem:[#allocation48_spill] sm:$0xff] }
 0x894   :  { %v2893_v39 = vsel %vm2861_vm1, %v2845_v27, %v2877_v23  ;;  %vm3179_vm2 = vcmp.gt.f32.partialorder %v3163_v2, 0.0  ;;  %v6687_v44 = vadd.f32 %v2902_v56, %v7294_v31  ;;  %v2847_v36 = vadd.f32 %v6540_v50, %v6501_v32  ;;  %v7298_v27 = vld [vmem:[#allocation51_spill] sm:$0xff] }
 0x895   :  { %2937 = vmax.xlane.f32.xlu0 %v6633_v26  ;;  %2925 = vmax.xlane.f32.xlu1 %v6636_v63  ;;  %v6690_v41 = vadd.f32 %v2893_v39, %v7295_v58  ;;  %v3211_v6 = vsel %vm3179_vm2, %v3163_v2, %v3195_v14  ;;  %v3199_v34 = vmul.f32 0.2, %v3167_v22  ;;  %vm3183_vm3 = vcmp.gt.f32.partialorder %v3167_v22, 0.0 }
 0x896   :  { %v6697_v16 = vadd.f32 %v3211_v6, %v7296_v19  ;;  %v2879_v17 = vmul.f32 0.2, %v2847_v36  ;;  %v2851_v21 = vadd.f32 %v6540_v50, %v6517_v62  ;;  %vm2863_vm0 = vcmp.gt.f32.partialorder %v2847_v36, 0.0 }
 0x897   :  { %v3215_v1 = vsel %vm3183_vm3, %v3167_v22, %v3199_v34  ;;  %v3165_v24 = vadd.f32 %v6544_v48, %v6507_v45  ;;  %v3169_v62 = vadd.f32 %v6544_v48, %v6523_v3  ;;  %v2849_v45 = vadd.f32 %v6540_v50, %v6509_v7  ;;  %v7299_v48 = vld [vmem:[#allocation58_spill] sm:$0xff] }
 0x898   :  { %v6703_v60 = vadd.f32 %v3215_v1, %v7297_v11  ;;  %v2895_v32 = vsel %vm2863_vm0, %v2847_v36, %v2879_v17  ;;  %v2883_v9 = vmul.f32 0.2, %v2851_v21  ;;  %vm2867_vm4 = vcmp.gt.f32.partialorder %v2851_v21, 0.0 }
 0x899   :  { %2945 = vmax.xlane.f32.xlu0 %v6643_v42  ;;  %3243 = vmax.xlane.f32.xlu1 %v6646_v59  ;;  %v6709_v35 = vadd.f32 %v2895_v32, %v7296_v19  ;;  %v3197_v25 = vmul.f32 0.2, %v3165_v24  ;;  %vm3181_vm5 = vcmp.gt.f32.partialorder %v3165_v24, 0.0  ;;  %v3201_v49 = vmul.f32 0.2, %v3169_v62 }
 0x89a   :  { %v2899_v10 = vsel %vm2867_vm4, %v2851_v21, %v2883_v9  ;;  %vm3185_vm6 = vcmp.gt.f32.partialorder %v3169_v62, 0.0  ;;  %v2881_v28 = vmul.f32 0.2, %v2849_v45  ;;  %v2853_v3 = vadd.f32 %v6540_v50, %v6525_v0 }
 0x89b   :  { %v6715_v52 = vadd.f32 %v2899_v10, %v7297_v11  ;;  %v3213_v37 = vsel %vm3181_vm5, %v3165_v24, %v3197_v25  ;;  %v3217_v2 = vsel %vm3185_vm6, %v3169_v62, %v3201_v49  ;;  %vm2865_vm7 = vcmp.gt.f32.partialorder %v2849_v45, 0.0 }
 0x89c   :  { %v6721_v31 = vadd.f32 %v3213_v37, %v7298_v27  ;;  %v6729_v55 = vadd.f32 %v3217_v2, %v7299_v48  ;;  %v2897_v7 = vsel %vm2865_vm7, %v2849_v45, %v2881_v28  ;;  %v2885_v53 = vmul.f32 0.2, %v2853_v3 }
 0x89d   :  { %3257 = vmax.xlane.f32.xlu0 %v6655_v4  ;;  %3245 = vmax.xlane.f32.xlu1 %v6658_v38  ;;  %vm2869_vm9 = vcmp.gt.f32.partialorder %v2853_v3, 0.0  ;;  %v6733_v23 = vadd.f32 %v2897_v7, %v7298_v27  ;;  %vm3571_vm8 = vcmask 64512  }
 0x89e   :  { %v2901_v58 = vsel %vm2869_vm9, %v2853_v3, %v2885_v53 }
 0x89f   :  { %v6737_v0 = vadd.f32 %v2901_v58, %v7299_v48 }
 0x8a1   :  { %3265 = vmax.xlane.f32.xlu0 %v6667_v33  ;;  %2927 = vmax.xlane.f32.xlu1 %v6670_v61 }
 0x8a5   :  { %2941 = vmax.xlane.f32.xlu0 %v6677_v47  ;;  %3247 = vmax.xlane.f32.xlu1 %v6680_v43 }
 0x8a9   :  { %2949 = vmax.xlane.f32.xlu0 %v6687_v44  ;;  %2931 = vmax.xlane.f32.xlu1 %v6690_v41 }
 0x8ad   :  { %3251 = vmax.xlane.f32.xlu1 %v6697_v16 }
 0x8b1   :  { %3259 = vmax.xlane.f32.xlu1 %v6703_v60 }
 0x8b5   :  { %2935 = vmax.xlane.f32.xlu1 %v6709_v35 }
 0x8b9   :  { %2943 = vmax.xlane.f32.xlu1 %v6715_v52 }
 0x8bd   :  { %3255 = vmax.xlane.f32.xlu1 %v6721_v31 }
 0x8bf   :  { %3411 = vrot.lane.b32.xlu0 %v6384_v46, %s4558_s3 }
 0x8c1   :  { %3263 = vmax.xlane.f32.xlu1 %v6729_v55 }
 0x8c5   :  { %2939 = vmax.xlane.f32.xlu1 %v6733_v23 }
 0x8c9   :  { %2947 = vmax.xlane.f32.xlu1 %v6737_v0 }
 0x8da   :  { %3413 = vrot.lane.b32.xlu1 %v6388_v13, %s4558_s3 }
 0x906   :  { %v3238_v50 = vpop.xlane.xlu0 %3237  ;;  %v3236_v56 = vpop.xlane.xlu1 %3235 }
 0x907   :  { %v3268_v39 = vsub.f32 %v6561_v15, %v3238_v50  ;;  %v3267_v14 = vsub.f32 %v6564_v54, %v3236_v56 }
 0x909   :  { %v3285_v22 = vmul.f32 1.442695, %v3268_v39  ;;  %v3283_v6 = vmul.f32 1.442695, %v3267_v14 }
 0x90a   :  { %v2920_v34 = vpop.xlane.xlu1 %2919  ;;  %v2930_v21 = vpop.xlane.xlu0 %2929 }
 0x90b   :  { %4416 = vpow2.f32 %v3285_v22  ;;  %v2951_v36 = vsub.f32 %v6574_v40, %v2920_v34  ;;  %v2956_v50 = vsub.f32 %v6571_v8, %v2930_v21 }
 0x90c   :  { %4418 = vpow2.f32 %v3283_v6 }
 0x90d   :  { %v2967_v19 = vmul.f32 1.442695, %v2951_v36 }
 0x90e   :  { %v2922_v1 = vpop.xlane.xlu1 %2921  ;;  %v3250_v24 = vpop.xlane.xlu0 %3249 }
 0x90f   :  { %v2952_v17 = vsub.f32 %v6586_v20, %v2922_v1  ;;  %4420 = vpow2.f32 %v2967_v19  ;;  %v3274_v6 = vsub.f32 %v6583_v18, %v3250_v24 }
 0x911   :  { %v2969_v11 = vmul.f32 1.442695, %v2952_v17 }
 0x912   :  { %v3240_v32 = vpop.xlane.xlu1 %3239  ;;  %v2934_v49 = vpop.xlane.xlu0 %2933 }
 0x913   :  { %v3269_v9 = vsub.f32 %v6598_v12, %v3240_v32  ;;  %4422 = vpow2.f32 %v2969_v11  ;;  %v2958_v1 = vsub.f32 %v6595_v5, %v2934_v49 }
 0x915   :  { %v3287_v15 = vmul.f32 1.442695, %v3269_v9  ;;  %v2981_v32 = vmul.f32 1.442695, %v2958_v1 }
 0x916   :  { %v3242_v54 = vpop.xlane.xlu1 %3241  ;;  %v3254_v48 = vpop.xlane.xlu0 %3253 }
 0x917   :  { %v3270_v10 = vsub.f32 %v6610_v57, %v3242_v54  ;;  %4424 = vpow2.f32 %v3287_v15  ;;  %v3276_v15 = vsub.f32 %v6607_v51, %v3254_v48 }
 0x918   :  { %v6748_v25 = vpop.eup %4416 }
 0x919   :  { %v6750_v40 = vpop.eup %4418  ;;  %v3289_v62 = vmul.f32 1.442695, %v3270_v10  ;;  %3317 = vadd.xlane.f32.xlu0 %v6748_v25 }
 0x91a   :  { %3315 = vadd.xlane.f32.xlu1 %v6750_v40  ;;  %v2924_v20 = vpop.xlane.xlu1 %2923  ;;  %v3262_v39 = vpop.xlane.xlu0 %3261 }
 0x91b   :  { %v2953_v37 = vsub.f32 %v6622_v30, %v2924_v20  ;;  %4426 = vpow2.f32 %v3289_v62  ;;  %v3301_v62 = vmul.f32 1.442695, %v3276_v15  ;;  %v3280_v20 = vsub.f32 %v6619_v29, %v3262_v39 }
 0x91c   :  { %v6755_v12 = vpop.eup %4420 }
 0x91d   :  { %v2971_v45 = vmul.f32 1.442695, %v2953_v37 }
 0x91e   :  { %2999 = vadd.xlane.f32.xlu1 %v6755_v12  ;;  %v2926_v57 = vpop.xlane.xlu1 %2925  ;;  %v2938_v17 = vpop.xlane.xlu0 %2937 }
 0x91f   :  { %v2954_v27 = vsub.f32 %v6636_v63, %v2926_v57  ;;  %4428 = vpow2.f32 %v2971_v45 }
 0x920   :  { %v6759_v2 = vpop.eup %4422 }
 0x921   :  { %v2973_v28 = vmul.f32 1.442695, %v2954_v27  ;;  %3001 = vadd.xlane.f32.xlu0 %v6759_v2  ;;  %v3309_v27 = vmul.f32 1.442695, %v3280_v20 }
 0x922   :  { %v3244_v3 = vpop.xlane.xlu1 %3243  ;;  %v2946_v5 = vpop.xlane.xlu0 %2945 }
 0x923   :  { %v3271_v30 = vsub.f32 %v6646_v59, %v3244_v3  ;;  %4430 = vpow2.f32 %v2973_v28  ;;  %v2977_v59 = vmul.f32 1.442695, %v2956_v50 }
 0x924   :  { %v6763_v7 = vpop.eup %4424 }
 0x925   :  { %v3291_v53 = vmul.f32 1.442695, %v3271_v30  ;;  %3319 = vadd.xlane.f32.xlu1 %v6763_v7 }
 0x926   :  { %v3246_v58 = vpop.xlane.xlu1 %3245  ;;  %v3258_v49 = vpop.xlane.xlu0 %3257 }
 0x927   :  { %v3272_v63 = vsub.f32 %v6658_v38, %v3246_v58  ;;  %4432 = vpow2.f32 %v3291_v53  ;;  %v3297_v38 = vmul.f32 1.442695, %v3274_v6  ;;  %v2964_v53 = vsub.f32 %v6643_v42, %v2946_v5 }
 0x928   :  { %v6768_v56 = vpop.eup %4426 }
 0x929   :  { %v3293_v14 = vmul.f32 1.442695, %v3272_v63  ;;  %3321 = vadd.xlane.f32.xlu0 %v6768_v56 }
 0x92a   :  { %v2928_v22 = vpop.xlane.xlu1 %2927 }
 0x92b   :  { %v2955_v34 = vsub.f32 %v6670_v61, %v2928_v22  ;;  %4434 = vpow2.f32 %v3293_v14  ;;  %v3278_v22 = vsub.f32 %v6655_v4, %v3258_v49 }
 0x92c   :  { %v6773_v36 = vpop.eup %4428  ;;  %4436 = vpow2.f32 %v2977_v59 }
 0x92d   :  { %v2975_v19 = vmul.f32 1.442695, %v2955_v34  ;;  %3003 = vadd.xlane.f32.xlu1 %v6773_v36 }
 0x92e   :  { %v3248_v8 = vpop.xlane.xlu1 %3247 }
 0x92f   :  { %v3273_v21 = vsub.f32 %v6680_v43, %v3248_v8  ;;  %4438 = vpow2.f32 %v2975_v19 }
 0x930   :  { %v6778_v11 = vpop.eup %4430  ;;  %4440 = vpow2.f32 %v3297_v38 }
 0x931   :  { %v3295_v18 = vmul.f32 1.442695, %v3273_v21  ;;  %3005 = vadd.xlane.f32.xlu0 %v6778_v11 }
 0x932   :  { %v2932_v61 = vpop.xlane.xlu1 %2931 }
 0x933   :  { %v2957_v9 = vsub.f32 %v6690_v41, %v2932_v61  ;;  %4442 = vpow2.f32 %v3295_v18 }
 0x934   :  { %v6783_v54 = vpop.eup %4432  ;;  %4444 = vpow2.f32 %v2981_v32 }
 0x935   :  { %v2979_v24 = vmul.f32 1.442695, %v2957_v9  ;;  %3323 = vadd.xlane.f32.xlu1 %v6783_v54 }
 0x936   :  { %v3252_v43 = vpop.xlane.xlu1 %3251 }
 0x937   :  { %v3275_v10 = vsub.f32 %v6697_v16, %v3252_v43  ;;  %4446 = vpow2.f32 %v2979_v24  ;;  %v2960_v16 = vsub.f32 %v6633_v26, %v2938_v17  ;;  %v3266_v26 = vpop.xlane.xlu0 %3265 }
 0x938   :  { %v6788_v37 = vpop.eup %4434  ;;  %v3282_v38 = vsub.f32 %v6667_v33, %v3266_v26 }
 0x939   :  { %v3299_v41 = vmul.f32 1.442695, %v3275_v10  ;;  %3325 = vadd.xlane.f32.xlu0 %v6788_v37  ;;  %v6792_v57 = vpop.eup %4436 }
 0x93a   :  { %v3260_v51 = vpop.xlane.xlu1 %3259 }
 0x93b   :  { %4448 = vpow2.f32 %v3299_v41  ;;  %v3279_v45 = vsub.f32 %v6703_v60, %v3260_v51  ;;  %v2985_v60 = vmul.f32 1.442695, %v2960_v16  ;;  %v2942_v34 = vpop.xlane.xlu0 %2941 }
 0x93c   :  { %4450 = vpow2.f32 %v3301_v62  ;;  %v6795_v28 = vpop.eup %4438  ;;  %v2962_v61 = vsub.f32 %v6677_v47, %v2942_v34 }
 0x93d   :  { %v3307_v29 = vmul.f32 1.442695, %v3279_v45  ;;  %3009 = vadd.xlane.f32.xlu0 %v6792_v57  ;;  %3007 = vadd.xlane.f32.xlu1 %v6795_v28  ;;  %v6800_v30 = vpop.eup %4440 }
 0x93e   :  { %v2936_v3 = vpop.xlane.xlu1 %2935 }
 0x93f   :  { %4452 = vpow2.f32 %v3307_v29  ;;  %v2959_v48 = vsub.f32 %v6709_v35, %v2936_v3  ;;  %v2993_v35 = vmul.f32 1.442695, %v2964_v53  ;;  %v2950_v33 = vpop.xlane.xlu0 %2949 }
 0x940   :  { %4454 = vpow2.f32 %v3309_v27  ;;  %v6803_v58 = vpop.eup %4442  ;;  %v2966_v43 = vsub.f32 %v6687_v44, %v2950_v33 }
 0x941   :  { %v2983_v50 = vmul.f32 1.442695, %v2959_v48  ;;  %3329 = vadd.xlane.f32.xlu0 %v6800_v30  ;;  %3327 = vadd.xlane.f32.xlu1 %v6803_v58  ;;  %v6808_v14 = vpop.eup %4444 }
 0x942   :  { %v2944_v63 = vpop.xlane.xlu1 %2943 }
 0x943   :  { %4456 = vpow2.f32 %v2983_v50  ;;  %v2963_v39 = vsub.f32 %v6715_v52, %v2944_v63  ;;  %v3305_v52 = vmul.f32 1.442695, %v3278_v22  ;;  %v3412_v27 = vpop.permute.xlu0 %3411 }
 0x944   :  { %4458 = vpow2.f32 %v2985_v60  ;;  %v6811_v59 = vpop.eup %4446 }
 0x945   :  { %v2991_v42 = vmul.f32 1.442695, %v2963_v39  ;;  %3013 = vadd.xlane.f32.xlu0 %v6808_v14  ;;  %3011 = vadd.xlane.f32.xlu1 %v6811_v59 }
 0x946   :  { %v3256_v6 = vpop.xlane.xlu1 %3255 }
 0x947   :  { %4460 = vpow2.f32 %v2991_v42  ;;  %v3277_v19 = vsub.f32 %v6721_v31, %v3256_v6  ;;  %v3313_v31 = vmul.f32 1.442695, %v3282_v38 }
 0x948   :  { %v6816_v8 = vpop.eup %4448  ;;  %4462 = vpow2.f32 %v2993_v35 }
 0x949   :  { %v6819_v1 = vpop.eup %4450  ;;  %v3303_v4 = vmul.f32 1.442695, %v3277_v19  ;;  %3331 = vadd.xlane.f32.xlu1 %v6816_v8 }
 0x94a   :  { %3333 = vadd.xlane.f32.xlu0 %v6819_v1  ;;  %v3264_v17 = vpop.xlane.xlu1 %3263 }
 0x94b   :  { %4464 = vpow2.f32 %v3303_v4  ;;  %v3281_v21 = vsub.f32 %v6729_v55, %v3264_v17  ;;  %v2989_v55 = vmul.f32 1.442695, %v2962_v61 }
 0x94c   :  { %v6824_v18 = vpop.eup %4452  ;;  %4466 = vpow2.f32 %v3305_v52 }
 0x94d   :  { %v6827_v32 = vpop.eup %4454  ;;  %v3311_v9 = vmul.f32 1.442695, %v3281_v21  ;;  %3339 = vadd.xlane.f32.xlu1 %v6824_v18 }
 0x94e   :  { %3341 = vadd.xlane.f32.xlu0 %v6827_v32  ;;  %v2940_v15 = vpop.xlane.xlu1 %2939 }
 0x94f   :  { %4468 = vpow2.f32 %v3311_v9  ;;  %v2961_v5 = vsub.f32 %v6733_v23, %v2940_v15  ;;  %v2997_v23 = vmul.f32 1.442695, %v2966_v43 }
 0x950   :  { %v6832_v24 = vpop.eup %4456  ;;  %4470 = vpow2.f32 %v3313_v31 }
 0x951   :  { %v6835_v10 = vpop.eup %4458  ;;  %v2987_v47 = vmul.f32 1.442695, %v2961_v5  ;;  %3015 = vadd.xlane.f32.xlu1 %v6832_v24 }
 0x952   :  { %3017 = vadd.xlane.f32.xlu0 %v6835_v10  ;;  %v2948_v62 = vpop.xlane.xlu1 %2947 }
 0x953   :  { %4472 = vpow2.f32 %v2987_v47  ;;  %v2965_v20 = vsub.f32 %v6737_v0, %v2948_v62 }
 0x954   :  { %v6840_v41 = vpop.eup %4460  ;;  %4474 = vpow2.f32 %v2989_v55 }
 0x955   :  { %v6842_v51 = vpop.eup %4462  ;;  %v2995_v49 = vmul.f32 1.442695, %v2965_v20  ;;  %3023 = vadd.xlane.f32.xlu1 %v6840_v41 }
 0x956   :  { %3025 = vadd.xlane.f32.xlu0 %v6842_v51  ;;  %v3414_v44 = vpop.permute.xlu1 %3413 }
 0x957   :  { %4476 = vpow2.f32 %v2995_v49  ;;  %3760 = vmatprep.subr.bf16.mxu0 %v3414_v44  ;;  %4014 = vmatprep.subr.bf16.mxu1 %v3414_v44 }
 0x958   :  { %v6846_v45 = vpop.eup %4464  ;;  %4478 = vpow2.f32 %v2997_v23  ;;  %3761 = vmatpush3.bf16.msra.mxu0 %v6388_v13  ;;  %4022 = vmatpush3.bf16.msra.mxu1 %v6388_v13 }
 0x959   :  { %v6850_v0 = vpop.eup %4466  ;;  %3762 = vmatprep.subr.bf16.mxu0 %v3412_v27  ;;  %4015 = vmatprep.subr.bf16.mxu1 %v3412_v27 }
 0x95a   :  { %3337 = vadd.xlane.f32.xlu0 %v6850_v0  ;;  %3335 = vadd.xlane.f32.xlu1 %v6846_v45 }
 0x95c   :  { %v6854_v16 = vpop.eup %4468  ;;  %3763 = vmatpush3.bf16.msra.mxu0 %v6384_v46  ;;  %4023 = vmatpush3.bf16.msra.mxu1 %v6384_v46 }
 0x95d   :  { %v6858_v29 = vpop.eup %4470 }
 0x95e   :  { %3345 = vadd.xlane.f32.xlu0 %v6858_v29  ;;  %3343 = vadd.xlane.f32.xlu1 %v6854_v16 }
 0x960   :  { %v6862_v13 = vpop.eup %4472 }
 0x961   :  { %v6864_v3 = vpop.eup %4474 }
 0x962   :  { %3021 = vadd.xlane.f32.xlu0 %v6864_v3  ;;  %3019 = vadd.xlane.f32.xlu1 %v6862_v13 }
 0x964   :  { %v6868_v48 = vpop.eup %4476 }
 0x965   :  { %v6870_v60 = vpop.eup %4478 }
 0x966   :  { %3029 = vadd.xlane.f32.xlu0 %v6870_v60  ;;  %3027 = vadd.xlane.f32.xlu1 %v6868_v48 }
 0x9a2   :  { %v3318_v46 = vpop.xlane.xlu0 %3317 }
 0x9a3   :  { %v3348_v53 = vmax.f32 %v3318_v46, 1e-30  ;;  %v3316_v26 = vpop.xlane.xlu1 %3315 }
 0x9a4   :  { %v3347_v50 = vmax.f32 %v3316_v26, 1e-30 }
 0x9a5   :  { %4480 = vrcp.f32 %v3348_v53 }
 0x9a6   :  { %4482 = vrcp.f32 %v3347_v50 }
 0x9a7   :  { %v3000_v63 = vpop.xlane.xlu1 %2999 }
 0x9a8   :  { %v3031_v39 = vmax.f32 %v3000_v63, 1e-30 }
 0x9aa   :  { %v3002_v35 = vpop.xlane.xlu0 %3001  ;;  %4484 = vrcp.f32 %v3031_v39 }
 0x9ab   :  { %v3032_v22 = vmax.f32 %v3002_v35, 1e-30 }
 0x9ad   :  { %4486 = vrcp.f32 %v3032_v22 }
 0x9ae   :  { %v3320_v42 = vpop.xlane.xlu1 %3319 }
 0x9af   :  { %v3349_v6 = vmax.f32 %v3320_v42, 1e-30 }
 0x9b1   :  { %4488 = vrcp.f32 %v3349_v6 }
 0x9b2   :  { %v4481_v34 = vpop.eup %4480  ;;  %v3322_v52 = vpop.xlane.xlu0 %3321 }
 0x9b3   :  { %v4483_v19 = vpop.eup %4482  ;;  %v3380_v38 = vmul.f32 %v4481_v34, %v6748_v25  ;;  %v3350_v4 = vmax.f32 %v3322_v52, 1e-30 }
 0x9b4   :  { %v3379_v17 = vmul.f32 %v4483_v19, %v6750_v40 }
 0x9b5   :  { %4490 = vrcp.f32 %v3350_v4 }
 0x9b6   :  { %v3395_v21 = vpack.c.bf16 %v3380_v38, %v3379_v17  ;;  %v3004_v31 = vpop.xlane.xlu1 %3003 }
 0x9b7   :  { %v3033_v61 = vmax.f32 %v3004_v31, 1e-30  ;;  %v4485_v33 = vpop.eup %4484 }
 0x9b8   :  { %3467 = vmatprep.mubr.bf16.mxu0 %v3395_v21  ;;  %v3063_v55 = vmul.f32 %v4485_v33, %v6755_v12 }
 0x9b9   :  { %4492 = vrcp.f32 %v3033_v61 }
 0x9ba   :  { %v4487_v9 = vpop.eup %4486  ;;  %v3006_v15 = vpop.xlane.xlu0 %3005 }
 0x9bb   :  { %v3034_v5 = vmax.f32 %v3006_v15, 1e-30  ;;  %v3064_v43 = vmul.f32 %v4487_v9, %v6759_v2 }
 0x9bd   :  { %4494 = vrcp.f32 %v3034_v5  ;;  %v3079_v25 = vpack.c.bf16 %v3064_v43, %v3063_v55 }
 0x9be   :  { %v3324_v47 = vpop.xlane.xlu1 %3323  ;;  %v4489_v40 = vpop.eup %4488 }
 0x9bf   :  { %v3351_v62 = vmax.f32 %v3324_v47, 1e-30  ;;  %3468 = vmatmul.mubr.bf16.vlgmr.msra.gmra.mxu0 %v3079_v25  ;;  %v3381_v44 = vmul.f32 %v4489_v40, %v6763_v7 }
 0x9c1   :  { %4496 = vrcp.f32 %v3351_v62 }
 0x9c2   :  { %v4491_v20 = vpop.eup %4490  ;;  %v3326_v23 = vpop.xlane.xlu0 %3325 }
 0x9c3   :  { %v3352_v49 = vmax.f32 %v3326_v23, 1e-30  ;;  %v3382_v27 = vmul.f32 %v4491_v20, %v6768_v56 }
 0x9c5   :  { %4498 = vrcp.f32 %v3352_v49  ;;  %v3396_v46 = vpack.c.bf16 %v3382_v27, %v3381_v44 }
 0x9c6   :  { %v3010_v53 = vpop.xlane.xlu0 %3009  ;;  %v3008_v12 = vpop.xlane.xlu1 %3007 }
 0x9c7   :  { %v3036_v26 = vmax.f32 %v3010_v53, 1e-30  ;;  %v3035_v2 = vmax.f32 %v3008_v12, 1e-30  ;;  %3475 = vmatprep.mubr.bf16.mxu0 %v3396_v46  ;;  %v4493_v50 = vpop.eup %4492 }
 0x9c8   :  { %v3065_v6 = vmul.f32 %v4493_v50, %v6773_v36 }
 0x9c9   :  { %4500 = vrcp.f32 %v3036_v26 }
 0x9ca   :  { %v4495_v63 = vpop.eup %4494  ;;  %4502 = vrcp.f32 %v3035_v2  ;;  %v3330_v39 = vpop.xlane.xlu0 %3329 }
 0x9cb   :  { %v3328_v35 = vpop.xlane.xlu1 %3327  ;;  %v3354_v22 = vmax.f32 %v3330_v39, 1e-30  ;;  %v3066_v7 = vmul.f32 %v4495_v63, %v6778_v11 }
 0x9cc   :  { %v3353_v42 = vmax.f32 %v3328_v35, 1e-30 }
 0x9cd   :  { %4504 = vrcp.f32 %v3354_v22  ;;  %v3080_v56 = vpack.c.bf16 %v3066_v7, %v3065_v6 }
 0x9ce   :  { %4506 = vrcp.f32 %v3353_v42  ;;  %v3014_v34 = vpop.xlane.xlu0 %3013  ;;  %v4497_v4 = vpop.eup %4496 }
 0x9cf   :  { %v3012_v19 = vpop.xlane.xlu1 %3011  ;;  %v3038_v52 = vmax.f32 %v3014_v34, 1e-30  ;;  %3476 = vmatmul.mubr.bf16.gmra.mxu0 %v3080_v56  ;;  %v3383_v36 = vmul.f32 %v4497_v4, %v6783_v54 }
 0x9d0   :  { %v3037_v38 = vmax.f32 %v3012_v19, 1e-30 }
 0x9d1   :  { %4508 = vrcp.f32 %v3038_v52 }
 0x9d2   :  { %v4499_v17 = vpop.eup %4498  ;;  %4510 = vrcp.f32 %v3037_v38 }
 0x9d3   :  { %v3334_v21 = vpop.xlane.xlu0 %3333  ;;  %v3332_v31 = vpop.xlane.xlu1 %3331  ;;  %v3384_v11 = vmul.f32 %v4499_v17, %v6788_v37 }
 0x9d4   :  { %v3356_v61 = vmax.f32 %v3334_v21, 1e-30  ;;  %v3355_v33 = vmax.f32 %v3332_v31, 1e-30 }
 0x9d5   :  { %v3397_v9 = vpack.c.bf16 %v3384_v11, %v3383_v36 }
 0x9d6   :  { %4512 = vrcp.f32 %v3356_v61  ;;  %v4501_v15 = vpop.eup %4500 }
 0x9d7   :  { %4514 = vrcp.f32 %v3355_v33  ;;  %v3342_v5 = vpop.xlane.xlu0 %3341  ;;  %v3340_v55 = vpop.xlane.xlu1 %3339  ;;  %3483 = vmatprep.mubr.bf16.mxu0 %v3397_v9  ;;  %v3068_v62 = vmul.f32 %v4501_v15, %v6792_v57 }
 0x9d8   :  { %v4503_v43 = vpop.eup %4502  ;;  %v3360_v25 = vmax.f32 %v3342_v5, 1e-30  ;;  %v3359_v47 = vmax.f32 %v3340_v55, 1e-30 }
 0x9d9   :  { %v3067_v40 = vmul.f32 %v4503_v43, %v6795_v28 }
 0x9da   :  { %4516 = vrcp.f32 %v3360_v25  ;;  %v4505_v20 = vpop.eup %4504 }
 0x9db   :  { %4518 = vrcp.f32 %v3359_v47  ;;  %v3018_v54 = vpop.xlane.xlu0 %3017  ;;  %v3016_v23 = vpop.xlane.xlu1 %3015  ;;  %v3081_v37 = vpack.c.bf16 %v3068_v62, %v3067_v40  ;;  %v3386_v46 = vmul.f32 %v4505_v20, %v6800_v30 }
 0x9dc   :  { %v4507_v49 = vpop.eup %4506  ;;  %v3040_v44 = vmax.f32 %v3018_v54, 1e-30  ;;  %v3039_v27 = vmax.f32 %v3016_v23, 1e-30 }
 0x9dd   :  { %3484 = vmatmul.mubr.bf16.gmra.mxu0 %v3081_v37  ;;  %v3385_v53 = vmul.f32 %v4507_v49, %v6803_v58 }
 0x9de   :  { %4520 = vrcp.f32 %v3040_v44  ;;  %v4509_v12 = vpop.eup %4508 }
 0x9df   :  { %4522 = vrcp.f32 %v3039_v27  ;;  %v3026_v57 = vpop.xlane.xlu0 %3025  ;;  %v3024_v26 = vpop.xlane.xlu1 %3023  ;;  %v3398_v28 = vpack.c.bf16 %v3386_v46, %v3385_v53  ;;  %v3070_v39 = vmul.f32 %v4509_v12, %v6808_v14 }
 0x9e0   :  { %v4511_v2 = vpop.eup %4510  ;;  %v3044_v50 = vmax.f32 %v3026_v57, 1e-30  ;;  %v3043_v63 = vmax.f32 %v3024_v26, 1e-30 }
 0x9e1   :  { %3491 = vmatprep.mubr.bf16.mxu0 %v3398_v28  ;;  %v3069_v35 = vmul.f32 %v4511_v2, %v6811_v59 }
 0x9e2   :  { %4524 = vrcp.f32 %v3044_v50 }
 0x9e3   :  { %v4513_v22 = vpop.eup %4512  ;;  %4526 = vrcp.f32 %v3043_v63  ;;  %v3338_v30 = vpop.xlane.xlu0 %3337  ;;  %v3082_v58 = vpack.c.bf16 %v3070_v39, %v3069_v35 }
 0x9e4   :  { %v3336_v42 = vpop.xlane.xlu1 %3335  ;;  %v4515_v6 = vpop.eup %4514  ;;  %v3358_v7 = vmax.f32 %v3338_v30, 1e-30  ;;  %v3388_v34 = vmul.f32 %v4513_v22, %v6819_v1 }
 0x9e5   :  { %v3357_v56 = vmax.f32 %v3336_v42, 1e-30  ;;  %3492 = vmatmul.mubr.bf16.gmra.mxu0 %v3082_v58  ;;  %v3387_v19 = vmul.f32 %v4515_v6, %v6816_v8 }
 0x9e6   :  { %4528 = vrcp.f32 %v3358_v7 }
 0x9e7   :  { %v4517_v52 = vpop.eup %4516  ;;  %4530 = vrcp.f32 %v3357_v56  ;;  %v3346_v14 = vpop.xlane.xlu0 %3345  ;;  %v3399_v59 = vpack.c.bf16 %v3388_v34, %v3387_v19 }
 0x9e8   :  { %v3344_v38 = vpop.xlane.xlu1 %3343  ;;  %v4519_v4 = vpop.eup %4518  ;;  %v3362_v17 = vmax.f32 %v3346_v14, 1e-30  ;;  %v3392_v31 = vmul.f32 %v4517_v52, %v6827_v32 }
 0x9e9   :  { %v3361_v21 = vmax.f32 %v3344_v38, 1e-30  ;;  %3499 = vmatprep.mubr.bf16.mxu0 %v3399_v59  ;;  %v3391_v61 = vmul.f32 %v4519_v4, %v6824_v18 }
 0x9ea   :  { %4532 = vrcp.f32 %v3362_v17 }
 0x9eb   :  { %v4521_v33 = vpop.eup %4520  ;;  %4534 = vrcp.f32 %v3361_v21  ;;  %v3022_v1 = vpop.xlane.xlu0 %3021  ;;  %v3401_v8 = vpack.c.bf16 %v3392_v31, %v3391_v61 }
 0x9ec   :  { %v3020_v36 = vpop.xlane.xlu1 %3019  ;;  %v4523_v11 = vpop.eup %4522  ;;  %v3042_v9 = vmax.f32 %v3022_v1, 1e-30  ;;  %v3072_v5 = vmul.f32 %v4521_v33, %v6835_v10 }
 0x9ed   :  { %v3041_v15 = vmax.f32 %v3020_v36, 1e-30  ;;  %3515 = vmatprep.mubr.bf16.mxu1 %v3401_v8  ;;  %v3071_v55 = vmul.f32 %v4523_v11, %v6832_v24 }
 0x9ee   :  { %4536 = vrcp.f32 %v3042_v9 }
 0x9ef   :  { %v4525_v43 = vpop.eup %4524  ;;  %4538 = vrcp.f32 %v3041_v15  ;;  %v3030_v32 = vpop.xlane.xlu0 %3029  ;;  %v3083_v18 = vpack.c.bf16 %v3072_v5, %v3071_v55 }
 0x9f0   :  { %v3028_v25 = vpop.xlane.xlu1 %3027  ;;  %v4527_v47 = vpop.eup %4526  ;;  %v3046_v62 = vmax.f32 %v3030_v32, 1e-30  ;;  %v3076_v20 = vmul.f32 %v4525_v43, %v6842_v51 }
 0x9f1   :  { %v3045_v40 = vmax.f32 %v3028_v25, 1e-30  ;;  %3500 = vmatmul.mubr.bf16.gmra.mxu0 %v3083_v18  ;;  %v3075_v54 = vmul.f32 %v4527_v47, %v6840_v41 }
 0x9f2   :  { %4540 = vrcp.f32 %v3046_v62 }
 0x9f3   :  { %v4529_v23 = vpop.eup %4528  ;;  %4542 = vrcp.f32 %v3045_v40  ;;  %v3085_v10 = vpack.c.bf16 %v3076_v20, %v3075_v54 }
 0x9f4   :  { %v4531_v37 = vpop.eup %4530  ;;  %v3390_v24 = vmul.f32 %v4529_v23, %v6850_v0 }
 0x9f5   :  { %3516 = vmatmul.mubr.bf16.vlgmr.msra.gmra.mxu1 %v3085_v10  ;;  %v3389_v49 = vmul.f32 %v4531_v37, %v6846_v45 }
 0x9f7   :  { %v4533_v44 = vpop.eup %4532  ;;  %v3400_v27 = vpack.c.bf16 %v3390_v24, %v3389_v49 }
 0x9f8   :  { %v4535_v46 = vpop.eup %4534  ;;  %v3394_v53 = vmul.f32 %v4533_v44, %v6858_v29 }
 0x9f9   :  { %3507 = vmatprep.mubr.bf16.mxu0 %v3400_v27  ;;  %v3393_v51 = vmul.f32 %v4535_v46, %v6854_v16 }
 0x9fb   :  { %v4537_v12 = vpop.eup %4536  ;;  %v3402_v41 = vpack.c.bf16 %v3394_v53, %v3393_v51 }
 0x9fc   :  { %v4539_v57 = vpop.eup %4538  ;;  %v3074_v26 = vmul.f32 %v4537_v12, %v6864_v3  ;;  %v6909_v3 = vld [vmem:[%s6996_s5] ss:$0 sm:$0xff] }
 0x9fd   :  { %3523 = vmatprep.mubr.bf16.mxu1 %v3402_v41  ;;  %v3073_v28 = vmul.f32 %v4539_v57, %v6862_v13 }
 0x9ff   :  { %v4541_v0 = vpop.eup %4540  ;;  %v3084_v2 = vpack.c.bf16 %v3074_v26, %v3073_v28 }
 0xa00   :  { %v4543_v50 = vpop.eup %4542  ;;  %v3078_v45 = vmul.f32 %v4541_v0, %v6870_v60 }
 0xa01   :  { %3508 = vmatmul.mubr.bf16.gmra.mxu0 %v3084_v2  ;;  %v3077_v63 = vmul.f32 %v4543_v50, %v6868_v48 }
 0xa03   :  { %v3086_v29 = vpack.c.bf16 %v3078_v45, %v3077_v63 }
 0xa05   :  { %3524 = vmatmul.mubr.bf16.gmra.mxu1 %v3086_v29 }
 0xa7f   :  { %v3764_v39 = vpop.f32.mrf.mxu0 }
 0xa81   :  { %v3765_v16 = vpop.f32.mrf.mxu0 }
 0xa82   :  { %v3766_v35 = vadd.f32 %v3765_v16, %v3764_v39 }
 0xa83   :  { %v3767_v22 = vpop.f32.mrf.mxu0 }
 0xa84   :  { %v3532_v13 = vmul.f32 0.5, %v3766_v35 }
 0xa85   :  { %v3768_v30 = vpop.f32.mrf.mxu0 }
 0xa86   :  { %v3555_v42 = vadd.f32 %v6909_v3, %v3532_v13  ;;  %v3769_v60 = vadd.f32 %v3768_v30, %v3767_v22 }
 0xa88   :  { %3572 = vst.msk [vmem:[%s6997_s6] sm:$0xff] %vm3571_vm8, %v3555_v42  ;;  %v3533_v48 = vmul.f32 0.5, %v3769_v60 }
 0xa8a   :  { %v3556_v58 = vadd.f32 %v6909_v3, %v3533_v48 }
 0xa8c   :  { %3573 = vst.msk [vmem:[%s6997_s6 + $0x8] sm:$0xff] %vm3571_vm8, %v3556_v58 }
 0xa8f   :  { %v3770_v6 = vpop.f32.mrf.mxu0 }
 0xa91   :  { %v3771_v7 = vpop.f32.mrf.mxu0 }
 0xa92   :  { %v3772_v56 = vadd.f32 %v3771_v7, %v3770_v6 }
 0xa93   :  { %v3773_v34 = vpop.f32.mrf.mxu0 }
 0xa94   :  { %v3534_v19 = vmul.f32 0.5, %v3772_v56 }
 0xa95   :  { %v3774_v52 = vpop.f32.mrf.mxu0 }
 0xa96   :  { %v3557_v14 = vadd.f32 %v6909_v3, %v3534_v19  ;;  %v3775_v38 = vadd.f32 %v3774_v52, %v3773_v34 }
 0xa98   :  { %3574 = vst.msk [vmem:[%s6997_s6 + $0x10] sm:$0xff] %vm3571_vm8, %v3557_v14  ;;  %v3535_v59 = vmul.f32 0.5, %v3775_v38 }
 0xa9a   :  { %v3558_v4 = vadd.f32 %v6909_v3, %v3535_v59 }
 0xa9c   :  { %3575 = vst.msk [vmem:[%s6997_s6 + $0x18] sm:$0xff] %vm3571_vm8, %v3558_v4 }
 0xa9d   :  { %v3776_v17 = vpop.f32.mrf.mxu0 }
 0xa9f   :  { %v3777_v21 = vpop.f32.mrf.mxu0 }
 0xaa0   :  { %v3778_v31 = vadd.f32 %v3777_v21, %v3776_v17 }
 0xaa1   :  { %v3779_v61 = vpop.f32.mrf.mxu0 }
 0xaa2   :  { %v3536_v33 = vmul.f32 0.5, %v3778_v31 }
 0xaa3   :  { %v3780_v1 = vpop.f32.mrf.mxu0 }
 0xaa4   :  { %v3559_v36 = vadd.f32 %v6909_v3, %v3536_v33  ;;  %v3781_v8 = vadd.f32 %v3780_v1, %v3779_v61 }
 0xaa5   :  { %v3782_v11 = vpop.f32.mrf.mxu0 }
 0xaa6   :  { %3576 = vst.msk [vmem:[%s6997_s6 + $0x20] sm:$0xff] %vm3571_vm8, %v3559_v36  ;;  %v3537_v9 = vmul.f32 0.5, %v3781_v8 }
 0xaa7   :  { %v3783_v15 = vpop.f32.mrf.mxu0 }
 0xaa8   :  { %v3560_v5 = vadd.f32 %v6909_v3, %v3537_v9  ;;  %v3784_v55 = vadd.f32 %v3783_v15, %v3782_v11 }
 0xaa9   :  { %v3785_v43 = vpop.f32.mrf.mxu0 }
 0xaaa   :  { %3577 = vst.msk [vmem:[%s6997_s6 + $0x28] sm:$0xff] %vm3571_vm8, %v3560_v5  ;;  %v3538_v32 = vmul.f32 0.5, %v3784_v55 }
 0xaab   :  { %v3786_v25 = vpop.f32.mrf.mxu0 }
 0xaac   :  { %v3561_v18 = vadd.f32 %v6909_v3, %v3538_v32  ;;  %v3787_v47 = vadd.f32 %v3786_v25, %v3785_v43 }
 0xaae   :  { %3578 = vst.msk [vmem:[%s6997_s6 + $0x30] sm:$0xff] %vm3571_vm8, %v3561_v18  ;;  %v3539_v62 = vmul.f32 0.5, %v3787_v47 }
 0xab0   :  { %v3562_v40 = vadd.f32 %v6909_v3, %v3539_v62 }
 0xab1   :  { %v3788_v20 = vpop.f32.mrf.mxu0 }
 0xab2   :  { %3579 = vst.msk [vmem:[%s6997_s6 + $0x38] sm:$0xff] %vm3571_vm8, %v3562_v40 }
 0xab3   :  { %v3789_v54 = vpop.f32.mrf.mxu0 }
 0xab4   :  { %v3790_v23 = vadd.f32 %v3789_v54, %v3788_v20 }
 0xab5   :  { %v3791_v10 = vpop.f32.mrf.mxu0  ;;  %v3800_v37 = vpop.f32.mrf.mxu1 }
 0xab6   :  { %v3540_v24 = vmul.f32 0.5, %v3790_v23 }
 0xab7   :  { %v3792_v49 = vpop.f32.mrf.mxu0  ;;  %v3801_v44 = vpop.f32.mrf.mxu1 }
 0xab8   :  { %v3563_v27 = vadd.f32 %v6909_v3, %v3540_v24  ;;  %v3793_v46 = vadd.f32 %v3792_v49, %v3791_v10  ;;  %v3802_v53 = vadd.f32 %v3801_v44, %v3800_v37 }
 0xab9   :  { %v3803_v51 = vpop.f32.mrf.mxu1 }
 0xaba   :  { %3580 = vst.msk [vmem:[%s6997_s6 + $0x40] sm:$0xff] %vm3571_vm8, %v3563_v27  ;;  %v3541_v12 = vmul.f32 0.5, %v3793_v46  ;;  %v3544_v41 = vmul.f32 0.5, %v3802_v53 }
 0xabb   :  { %v3804_v57 = vpop.f32.mrf.mxu1 }
 0xabc   :  { %v3564_v26 = vadd.f32 %v6909_v3, %v3541_v12  ;;  %v3567_v28 = vadd.f32 %v6909_v3, %v3544_v41  ;;  %v3805_v0 = vadd.f32 %v3804_v57, %v3803_v51 }
 0xabe   :  { %3581 = vst.msk [vmem:[%s6997_s6 + $0x48] sm:$0xff] %vm3571_vm8, %v3564_v26  ;;  %3584 = vst.msk [vmem:[%s6997_s6 + $0x60] sm:$0xff] %vm3571_vm8, %v3567_v28  ;;  %v3545_v2 = vmul.f32 0.5, %v3805_v0 }
 0xac0   :  { %v3568_v50 = vadd.f32 %v6909_v3, %v3545_v2 }
 0xac1   :  { %v3794_v45 = vpop.f32.mrf.mxu0 }
 0xac2   :  { %3585 = vst.msk [vmem:[%s6997_s6 + $0x68] sm:$0xff] %vm3571_vm8, %v3568_v50 }
 0xac3   :  { %v3795_v63 = vpop.f32.mrf.mxu0 }
 0xac4   :  { %v3796_v29 = vadd.f32 %v3795_v63, %v3794_v45 }
 0xac5   :  { %v3797_v39 = vpop.f32.mrf.mxu0  ;;  %v3806_v16 = vpop.f32.mrf.mxu1 }
 0xac6   :  { %v3542_v35 = vmul.f32 0.5, %v3796_v29 }
 0xac7   :  { %v3798_v22 = vpop.f32.mrf.mxu0  ;;  %v3807_v13 = vpop.f32.mrf.mxu1 }
 0xac8   :  { %v3565_v30 = vadd.f32 %v6909_v3, %v3542_v35  ;;  %v3799_v42 = vadd.f32 %v3798_v22, %v3797_v39  ;;  %v3808_v60 = vadd.f32 %v3807_v13, %v3806_v16 }
 0xac9   :  { %v3809_v48 = vpop.f32.mrf.mxu1 }
 0xaca   :  { %3582 = vst.msk [vmem:[%s6997_s6 + $0x50] sm:$0xff] %vm3571_vm8, %v3565_v30  ;;  %v3543_v58 = vmul.f32 0.5, %v3799_v42  ;;  %v3546_v6 = vmul.f32 0.5, %v3808_v60 }
 0xacb   :  { %v3810_v7 = vpop.f32.mrf.mxu1 }
 0xacc   :  { %v3566_v56 = vadd.f32 %v6909_v3, %v3543_v58  ;;  %v3569_v34 = vadd.f32 %v6909_v3, %v3546_v6  ;;  %v3811_v19 = vadd.f32 %v3810_v7, %v3809_v48 }
 0xace   :  { %3583 = vst.msk [vmem:[%s6997_s6 + $0x58] sm:$0xff] %vm3571_vm8, %v3566_v56  ;;  %3586 = vst.msk [vmem:[%s6997_s6 + $0x70] sm:$0xff] %vm3571_vm8, %v3569_v34  ;;  %v3547_v52 = vmul.f32 0.5, %v3811_v19 }
 0xad0   :  { %v3570_v14 = vadd.f32 %v6909_v3, %v3547_v52 }
 0xad2   :  { %3587 = vst.msk [vmem:[%s6997_s6 + $0x78] sm:$0xff] %vm3571_vm8, %v3570_v14 }

</bundles_post_ra>
